<compile_context>
chip_gen: v6e
topology: v6e:2x2x1
jax: 0.10.0
libtpu: 0.0.40
codegen_flags: <defaults>
</compile_context>

<pallas_src>
import math
import functools

import jax
import jax.numpy as jnp
from jax import lax
from jax.experimental import pallas as pl
from jax.experimental.pallas import tpu as pltpu

KSIZE = 5
PAD = 2
MAX_ROW_TILE = 1024     # max pooled-output rows handled per conv grid step
FC_ROW_TILE = 256       # max batch rows per linear grid step


def _round_up(x, m):
    return -(-x // m) * m


def _min_row_blocks():
    """>=2 parallel row blocks only on multi-TensorCore parts (v7x)."""
    try:
        kind = jax.devices()[0].device_kind.lower()
    except Exception:
        return 1
    return 2 if "v7" in kind else 1


def _block_diag4(w):
    """Exact block-diagonal replication diag(w, w, w, w); off-diag is exact 0."""
    k, c = w.shape
    z = jnp.zeros((k, c), w.dtype)
    rows = [
        jnp.concatenate([w, z, z, z], axis=1),
        jnp.concatenate([z, w, z, z], axis=1),
        jnp.concatenate([z, z, w, z], axis=1),
        jnp.concatenate([z, z, z, w], axis=1),
    ]
    return jnp.concatenate(rows, axis=0)                    # (4k, 4c)


# ----------------------------- Pallas kernels ------------------------------ #

def _conv_relu_pool_kernel(q_ref, w_ref, b_ref, o_ref, *, c_out):
    """Fused conv (single dot over the K-concatenated pooling quadrants with a
    block-diagonal weight) + maxpool2 + bias + ReLU.

    q_ref : (tile, 4*K)      bf16  -- columns [q*K:(q+1)*K] are quadrant q
    w_ref : (4*K, 4*c_out)   bf16  -- block-diagonal replication of (K, c_out)
    b_ref : (1, c_out)       f32
    o_ref : (tile, c_out)    f32
    """
    z = jnp.dot(q_ref[...], w_ref[...], preferred_element_type=jnp.float32)
    # Max over the 4 quadrant column groups (static lane slices), then
    # bias + ReLU in f32 on the VPU.
    z0 = z[:, 0 * c_out:1 * c_out]
    z1 = z[:, 1 * c_out:2 * c_out]
    z2 = z[:, 2 * c_out:3 * c_out]
    z3 = z[:, 3 * c_out:4 * c_out]
    zmax = jnp.maximum(jnp.maximum(z0, z1), jnp.maximum(z2, z3))
    o_ref[...] = jnp.maximum(zmax + b_ref[...], 0.0).astype(o_ref.dtype)


def _linear_kernel(x_ref, w_ref, b_ref, o_ref):
    o_ref[...] = (jnp.dot(x_ref[...], w_ref[...],
                          preferred_element_type=jnp.float32)
                  + b_ref[...]).astype(o_ref.dtype)


# ------------------------------ Pallas wrappers ---------------------------- #

def conv_relu_pool(q, w_mat, b_row, c_out):
    """q: (n_rows, 4*K) K-concatenated quadrant im2col; returns (n_rows, c_out)."""
    n_rows, k4 = q.shape
    k_dim = k4 // 4

    n_blocks = max(_min_row_blocks(), pl.cdiv(n_rows, MAX_ROW_TILE))
    tile = _round_up(pl.cdiv(n_rows, n_blocks), 8)          # sublane aligned
    n_pad = tile * n_blocks

    q = jnp.pad(q, ((0, n_pad - n_rows), (0, 0))).astype(jnp.bfloat16)
    w_bd = _block_diag4(w_mat.astype(jnp.bfloat16))         # (4K, 4*c_out)
    b = b_row.astype(jnp.float32)

    out = pl.pallas_call(
        functools.partial(_conv_relu_pool_kernel, c_out=c_out),
        out_shape=jax.ShapeDtypeStruct((n_pad, c_out), jnp.float32),
        grid=(n_blocks,),
        in_specs=[pl.BlockSpec((tile, 4 * k_dim), lambda i: (i, 0)),
                  pl.BlockSpec((4 * k_dim, 4 * c_out), lambda i: (0, 0)),
                  pl.BlockSpec((1, c_out), lambda i: (0, 0))],
        out_specs=pl.BlockSpec((tile, c_out), lambda i: (i, 0)),
        compiler_params=pltpu.CompilerParams(dimension_semantics=("parallel",)),
    )(q, w_bd, b)
    return out[:n_rows]


def linear(x, w_mat, b_row):
    """x: (B, K), w_mat: (K, N), b_row: (1, N) -> (B, N).  Batch-tiled,
    output lane-padded to 128 for dense stores."""
    b, k = x.shape
    n = w_mat.shape[1]
    n_lane = _round_up(n, 128)

    n_blocks = max(1, pl.cdiv(b, FC_ROW_TILE))
    tile = _round_up(pl.cdiv(b, n_blocks), 8)
    b_pad = tile * n_blocks

    x_p = jnp.pad(x, ((0, b_pad - b), (0, 0))).astype(jnp.bfloat16)
    w_p = jnp.pad(w_mat, ((0, 0), (0, n_lane - n))).astype(jnp.bfloat16)
    b_p = jnp.pad(b_row, ((0, 0), (0, n_lane - n))).astype(jnp.float32)

    out = pl.pallas_call(
        _linear_kernel,
        out_shape=jax.ShapeDtypeStruct((b_pad, n_lane), jnp.float32),
        grid=(n_blocks,),
        in_specs=[pl.BlockSpec((tile, k), lambda i: (i, 0)),
                  pl.BlockSpec((k, n_lane), lambda i: (0, 0)),
                  pl.BlockSpec((1, n_lane), lambda i: (0, 0))],
        out_specs=pl.BlockSpec((tile, n_lane), lambda i: (i, 0)),
        compiler_params=pltpu.CompilerParams(dimension_semantics=("parallel",)),
    )(x_p, w_p, b_p)
    return out[:b, :n]


# ------------------------------- glue (JAX) -------------------------------- #

def quadrant_im2col_concat(x_nhwc, k=KSIZE, pad=PAD):
    """Build ONE im2col matrix with the 4 pooling quadrants concatenated along K.

    Quadrant (dy, dx) covers conv-output pixels (2i+dy, 2j+dx).  Within each
    quadrant block the feature order is ci*k*k + kh*k + kw, matching
    torch weight.reshape(Cout, -1).  Output: (B*Ho*Wo, 4*C*k*k).
    """
    B, H, W, C = x_nhwc.shape
    Ho, Wo = H // 2, W // 2
    xp = jnp.pad(x_nhwc, ((0, 0), (pad, pad), (pad, pad), (0, 0)))
    quads = []
    for dy in range(2):
        for dx in range(2):
            cols = []
            for kh in range(k):
                for kw in range(k):
                    cols.append(xp[:, dy + kh: dy + kh + H: 2,
                                     dx + kw: dx + kw + W: 2, :])  # (B,Ho,Wo,C)
            p = jnp.stack(cols, axis=-1)                 # (B, Ho, Wo, C, k*k)
            quads.append(p.reshape(B, Ho, Wo, C * k * k))
    q = jnp.concatenate(quads, axis=-1)                  # minor-axis concat only
    return q.reshape(B * Ho * Wo, 4 * C * k * k), (Ho, Wo)


def cnn_forward(params, x_nchw):
    """Returns (logits (B,3), flattened features (B, 32*7*7)) like the torch module."""
    B = x_nchw.shape[0]
    x = jnp.transpose(x_nchw, (0, 2, 3, 1)).astype(jnp.float32)   # NHWC

    # conv1 block: 1 -> 16 channels, 28x28 -> 14x14
    q1, (h1, w1) = quadrant_im2col_concat(x)
    wm1 = params["conv1_w"].reshape(16, -1).T                     # (25, 16)
    bm1 = params["conv1_b"].reshape(1, -1)
    y1 = conv_relu_pool(q1, wm1, bm1, 16).reshape(B, h1, w1, 16)

    # conv2 block: 16 -> 32 channels, 14x14 -> 7x7
    q2, (h2, w2) = quadrant_im2col_concat(y1)
    wm2 = params["conv2_w"].reshape(32, -1).T                     # (400, 32)
    bm2 = params["conv2_b"].reshape(1, -1)
    y2 = conv_relu_pool(q2, wm2, bm2, 32).reshape(B, h2, w2, 32)

    # Flatten in NCHW order: required because `feat` is a returned output of the
    # torch module (x.view(B, -1) on an NCHW tensor).
    feat = jnp.transpose(y2, (0, 3, 1, 2)).reshape(B, -1)         # (B, 1568)

    logits = linear(feat, params["fc_w"].T, params["fc_b"].reshape(1, -1))
    return logits, feat


# ------------------------------ reference ---------------------------------- #

def cnn_reference(params, x_nchw):
    dn = ("NCHW", "OIHW", "NCHW")
    y = lax.conv_general_dilated(x_nchw, params["conv1_w"], (1, 1),
                                 ((PAD, PAD), (PAD, PAD)), dimension_numbers=dn)
    y = jnp.maximum(y + params["conv1_b"].reshape(1, -1, 1, 1), 0.0)
    y = lax.reduce_window(y, -jnp.inf, lax.max, (1, 1, 2, 2), (1, 1, 2, 2), "VALID")
    y = lax.conv_general_dilated(y, params["conv2_w"], (1, 1),
                                 ((PAD, PAD), (PAD, PAD)), dimension_numbers=dn)
    y = jnp.maximum(y + params["conv2_b"].reshape(1, -1, 1, 1), 0.0)
    y = lax.reduce_window(y, -jnp.inf, lax.max, (1, 1, 2, 2), (1, 1, 2, 2), "VALID")
    feat = y.reshape(y.shape[0], -1)
    logits = feat @ params["fc_w"].T + params["fc_b"]
    return logits, feat


# ------------------------------ params init -------------------------------- #

def init_params(key):
    ks = jax.random.split(key, 6)

    def uniform(k, shape, fan_in):
        bound = 1.0 / math.sqrt(fan_in)
        return jax.random.uniform(k, shape, jnp.float32, -bound, bound)

    return {
        "conv1_w": uniform(ks[0], (16, 1, 5, 5), 1 * 5 * 5),
        "conv1_b": uniform(ks[1], (16,), 1 * 5 * 5),
        "conv2_w": uniform(ks[2], (32, 16, 5, 5), 16 * 5 * 5),
        "conv2_b": uniform(ks[3], (32,), 16 * 5 * 5),
        "fc_w":    uniform(ks[4], (3, 32 * 7 * 7), 32 * 7 * 7),
        "fc_b":    uniform(ks[5], (3,), 32 * 7 * 7),
    }


# --------------------------------- main ------------------------------------ #

if __name__ == "__main__":
    key = jax.random.PRNGKey(0)
    k_params, k_x = jax.random.split(key)
    params = init_params(k_params)

    # batch=2, channels=1, spatial=28 (required by the 32*7*7 Linear layer)
    x = jax.random.normal(k_x, (2, 1, 28, 28), dtype=jnp.float32)

    logits, feat = jax.jit(cnn_forward)(params, x)
    jax.block_until_ready((logits, feat))

    ref_logits, ref_feat = cnn_reference(params, x)
    assert logits.shape == (2, 3) and feat.shape == (2, 32 * 7 * 7)
    # Tolerance relaxed vs. the pure-f32 reference because MXU inputs are bf16
    # (f32 accumulation); errors are O(1e-3) for O(0.3-1) activations.
    assert jnp.allclose(feat, ref_feat, rtol=2e-2, atol=2e-2), "feature mismatch"
    assert jnp.allclose(logits, ref_logits, rtol=2e-2, atol=2e-2), "logit mismatch"

    print("KERNEL_OK")
</pallas_src>

<mosaic_0001>
module attributes {stable_mosaic.version = 11 : i64} {
  func.func @_conv_relu_pool_kernel(%arg0: i32, %arg1: memref<392x100xbf16, #tpu.memory_space<vmem>>, %arg2: memref<100x64xbf16, #tpu.memory_space<vmem>>, %arg3: memref<1x16xf32, #tpu.memory_space<vmem>>, %arg4: memref<392x16xf32, #tpu.memory_space<vmem>>) attributes {dimension_semantics = [#tpu.dimension_semantics<parallel>], iteration_bounds = array<i64: 1>, scalar_prefetch = 0 : i64, scratch_operands = 0 : i64, tpu.core_type = #tpu.core_type<tc>, window_params = [{transform_indices = @transform_0, window_bounds = array<i64: 392, 100>}, {pipeline_mode = #tpu.pipeline_mode<synchronous>, transform_indices = @transform_1, window_bounds = array<i64: 100, 64>}, {pipeline_mode = #tpu.pipeline_mode<synchronous>, transform_indices = @transform_2, window_bounds = array<i64: 1, 16>}, {transform_indices = @transform_3, window_bounds = array<i64: 392, 16>}]} {
    %c0 = arith.constant 0 : index
    %c0_0 = arith.constant 0 : index
    %0 = vector.load %arg1[%c0, %c0_0] : memref<392x100xbf16, #tpu.memory_space<vmem>>, vector<392x100xbf16>
    %c0_1 = arith.constant 0 : index
    %c0_2 = arith.constant 0 : index
    %1 = vector.load %arg2[%c0_1, %c0_2] : memref<100x64xbf16, #tpu.memory_space<vmem>>, vector<100x64xbf16>
    %cst = arith.constant dense<0.000000e+00> : vector<392x64xf32>
    %2 = tpu.matmul %0, %1, %cst {dimension_numbers = #tpu.dot_dimension_numbers<[1], [0], [0], [1], [0, 0, 1, 1], [], []>} : vector<392x100xbf16>, vector<100x64xbf16>, vector<392x64xf32> -> vector<392x64xf32>
    %3 = vector.extract_strided_slice %2 {offsets = [0, 0], sizes = [392, 16], strides = [1, 1]} : vector<392x64xf32> to vector<392x16xf32>
    %4 = vector.extract_strided_slice %2 {offsets = [0, 16], sizes = [392, 16], strides = [1, 1]} : vector<392x64xf32> to vector<392x16xf32>
    %5 = vector.extract_strided_slice %2 {offsets = [0, 32], sizes = [392, 16], strides = [1, 1]} : vector<392x64xf32> to vector<392x16xf32>
    %6 = vector.extract_strided_slice %2 {offsets = [0, 48], sizes = [392, 16], strides = [1, 1]} : vector<392x64xf32> to vector<392x16xf32>
    %7 = arith.maximumf %3, %4 : vector<392x16xf32>
    %8 = arith.maximumf %5, %6 : vector<392x16xf32>
    %9 = arith.maximumf %7, %8 : vector<392x16xf32>
    %c0_3 = arith.constant 0 : index
    %c0_4 = arith.constant 0 : index
    %10 = vector.load %arg3[%c0_3, %c0_4] : memref<1x16xf32, #tpu.memory_space<vmem>>, vector<1x16xf32>
    %11 = vector.broadcast %10 : vector<1x16xf32> to vector<392x16xf32>
    %12 = arith.addf %9, %11 : vector<392x16xf32>
    %cst_5 = arith.constant 0.000000e+00 : f32
    %13 = vector.broadcast %cst_5 : f32 to vector<392x16xf32>
    %14 = arith.maximumf %12, %13 : vector<392x16xf32>
    %c0_6 = arith.constant 0 : index
    %c0_7 = arith.constant 0 : index
    %15 = vector.load %arg4[%c0_6, %c0_7] : memref<392x16xf32, #tpu.memory_space<vmem>>, vector<392x16xf32>
    tpu.vector_store %arg4[%c0_6, %c0_7], %14 {strides = array<i32>} : memref<392x16xf32, #tpu.memory_space<vmem>>, vector<392x16xf32>,
    return
  }
  func.func @transform_0(%arg0: i32) -> (i32, i32) {
    %c0_i32 = arith.constant 0 : i32
    %c0_i32_0 = arith.constant 0 : i32
    return %arg0, %c0_i32 : i32, i32
  }
  func.func @transform_1(%arg0: i32) -> (i32, i32) {
    %c0_i32 = arith.constant 0 : i32
    %c0_i32_0 = arith.constant 0 : i32
    %c0_i32_1 = arith.constant 0 : i32
    return %c0_i32, %c0_i32_0 : i32, i32
  }
  func.func @transform_2(%arg0: i32) -> (i32, i32) {
    %c0_i32 = arith.constant 0 : i32
    %c0_i32_0 = arith.constant 0 : i32
    %c0_i32_1 = arith.constant 0 : i32
    return %c0_i32, %c0_i32_0 : i32, i32
  }
  func.func @transform_3(%arg0: i32) -> (i32, i32) {
    %c0_i32 = arith.constant 0 : i32
    %c0_i32_0 = arith.constant 0 : i32
    return %arg0, %c0_i32 : i32, i32
  }
}

module attributes {stable_mosaic.version = 11 : i64} {
  func.func @_conv_relu_pool_kernel(%arg0: i32, %arg1: memref<104x1600xbf16, #tpu.memory_space<vmem>>, %arg2: memref<1600x128xbf16, #tpu.memory_space<vmem>>, %arg3: memref<1x32xf32, #tpu.memory_space<vmem>>, %arg4: memref<104x32xf32, #tpu.memory_space<vmem>>) attributes {dimension_semantics = [#tpu.dimension_semantics<parallel>], iteration_bounds = array<i64: 1>, scalar_prefetch = 0 : i64, scratch_operands = 0 : i64, tpu.core_type = #tpu.core_type<tc>, window_params = [{transform_indices = @transform_0, window_bounds = array<i64: 104, 1600>}, {pipeline_mode = #tpu.pipeline_mode<synchronous>, transform_indices = @transform_1, window_bounds = array<i64: 1600, 128>}, {pipeline_mode = #tpu.pipeline_mode<synchronous>, transform_indices = @transform_2, window_bounds = array<i64: 1, 32>}, {transform_indices = @transform_3, window_bounds = array<i64: 104, 32>}]} {
    %c0 = arith.constant 0 : index
    %c0_0 = arith.constant 0 : index
    %0 = vector.load %arg1[%c0, %c0_0] : memref<104x1600xbf16, #tpu.memory_space<vmem>>, vector<104x1600xbf16>
    %c0_1 = arith.constant 0 : index
    %c0_2 = arith.constant 0 : index
    %1 = vector.load %arg2[%c0_1, %c0_2] : memref<1600x128xbf16, #tpu.memory_space<vmem>>, vector<1600x128xbf16>
    %cst = arith.constant dense<0.000000e+00> : vector<104x128xf32>
    %2 = tpu.matmul %0, %1, %cst {dimension_numbers = #tpu.dot_dimension_numbers<[1], [0], [0], [1], [0, 0, 1, 1], [], []>} : vector<104x1600xbf16>, vector<1600x128xbf16>, vector<104x128xf32> -> vector<104x128xf32>
    %3 = vector.extract_strided_slice %2 {offsets = [0, 0], sizes = [104, 32], strides = [1, 1]} : vector<104x128xf32> to vector<104x32xf32>
    %4 = vector.extract_strided_slice %2 {offsets = [0, 32], sizes = [104, 32], strides = [1, 1]} : vector<104x128xf32> to vector<104x32xf32>
    %5 = vector.extract_strided_slice %2 {offsets = [0, 64], sizes = [104, 32], strides = [1, 1]} : vector<104x128xf32> to vector<104x32xf32>
    %6 = vector.extract_strided_slice %2 {offsets = [0, 96], sizes = [104, 32], strides = [1, 1]} : vector<104x128xf32> to vector<104x32xf32>
    %7 = arith.maximumf %3, %4 : vector<104x32xf32>
    %8 = arith.maximumf %5, %6 : vector<104x32xf32>
    %9 = arith.maximumf %7, %8 : vector<104x32xf32>
    %c0_3 = arith.constant 0 : index
    %c0_4 = arith.constant 0 : index
    %10 = vector.load %arg3[%c0_3, %c0_4] : memref<1x32xf32, #tpu.memory_space<vmem>>, vector<1x32xf32>
    %11 = vector.broadcast %10 : vector<1x32xf32> to vector<104x32xf32>
    %12 = arith.addf %9, %11 : vector<104x32xf32>
    %cst_5 = arith.constant 0.000000e+00 : f32
    %13 = vector.broadcast %cst_5 : f32 to vector<104x32xf32>
    %14 = arith.maximumf %12, %13 : vector<104x32xf32>
    %c0_6 = arith.constant 0 : index
    %c0_7 = arith.constant 0 : index
    %15 = vector.load %arg4[%c0_6, %c0_7] : memref<104x32xf32, #tpu.memory_space<vmem>>, vector<104x32xf32>
    tpu.vector_store %arg4[%c0_6, %c0_7], %14 {strides = array<i32>} : memref<104x32xf32, #tpu.memory_space<vmem>>, vector<104x32xf32>,
    return
  }
  func.func @transform_0(%arg0: i32) -> (i32, i32) {
    %c0_i32 = arith.constant 0 : i32
    %c0_i32_0 = arith.constant 0 : i32
    return %arg0, %c0_i32 : i32, i32
  }
  func.func @transform_1(%arg0: i32) -> (i32, i32) {
    %c0_i32 = arith.constant 0 : i32
    %c0_i32_0 = arith.constant 0 : i32
    %c0_i32_1 = arith.constant 0 : i32
    return %c0_i32, %c0_i32_0 : i32, i32
  }
  func.func @transform_2(%arg0: i32) -> (i32, i32) {
    %c0_i32 = arith.constant 0 : i32
    %c0_i32_0 = arith.constant 0 : i32
    %c0_i32_1 = arith.constant 0 : i32
    return %c0_i32, %c0_i32_0 : i32, i32
  }
  func.func @transform_3(%arg0: i32) -> (i32, i32) {
    %c0_i32 = arith.constant 0 : i32
    %c0_i32_0 = arith.constant 0 : i32
    return %arg0, %c0_i32 : i32, i32
  }
}

module attributes {stable_mosaic.version = 11 : i64} {
  func.func @_linear_kernel(%arg0: i32, %arg1: memref<8x1568xbf16, #tpu.memory_space<vmem>>, %arg2: memref<1568x128xbf16, #tpu.memory_space<vmem>>, %arg3: memref<1x128xf32, #tpu.memory_space<vmem>>, %arg4: memref<8x128xf32, #tpu.memory_space<vmem>>) attributes {dimension_semantics = [#tpu.dimension_semantics<parallel>], iteration_bounds = array<i64: 1>, scalar_prefetch = 0 : i64, scratch_operands = 0 : i64, tpu.core_type = #tpu.core_type<tc>, window_params = [{transform_indices = @transform_0, window_bounds = array<i64: 8, 1568>}, {pipeline_mode = #tpu.pipeline_mode<synchronous>, transform_indices = @transform_1, window_bounds = array<i64: 1568, 128>}, {pipeline_mode = #tpu.pipeline_mode<synchronous>, transform_indices = @transform_2, window_bounds = array<i64: 1, 128>}, {transform_indices = @transform_3, window_bounds = array<i64: 8, 128>}]} {
    %c0 = arith.constant 0 : index
    %c0_0 = arith.constant 0 : index
    %0 = vector.load %arg1[%c0, %c0_0] : memref<8x1568xbf16, #tpu.memory_space<vmem>>, vector<8x1568xbf16>
    %c0_1 = arith.constant 0 : index
    %c0_2 = arith.constant 0 : index
    %1 = vector.load %arg2[%c0_1, %c0_2] : memref<1568x128xbf16, #tpu.memory_space<vmem>>, vector<1568x128xbf16>
    %cst = arith.constant dense<0.000000e+00> : vector<8x128xf32>
    %2 = tpu.matmul %0, %1, %cst {dimension_numbers = #tpu.dot_dimension_numbers<[1], [0], [0], [1], [0, 0, 1, 1], [], []>} : vector<8x1568xbf16>, vector<1568x128xbf16>, vector<8x128xf32> -> vector<8x128xf32>
    %c0_3 = arith.constant 0 : index
    %c0_4 = arith.constant 0 : index
    %3 = vector.load %arg3[%c0_3, %c0_4] : memref<1x128xf32, #tpu.memory_space<vmem>>, vector<1x128xf32>
    %4 = vector.broadcast %3 : vector<1x128xf32> to vector<8x128xf32>
    %5 = arith.addf %2, %4 : vector<8x128xf32>
    %c0_5 = arith.constant 0 : index
    %c0_6 = arith.constant 0 : index
    %6 = vector.load %arg4[%c0_5, %c0_6] : memref<8x128xf32, #tpu.memory_space<vmem>>, vector<8x128xf32>
    tpu.vector_store %arg4[%c0_5, %c0_6], %5 {strides = array<i32>} : memref<8x128xf32, #tpu.memory_space<vmem>>, vector<8x128xf32>,
    return
  }
  func.func @transform_0(%arg0: i32) -> (i32, i32) {
    %c0_i32 = arith.constant 0 : i32
    %c0_i32_0 = arith.constant 0 : i32
    return %arg0, %c0_i32 : i32, i32
  }
  func.func @transform_1(%arg0: i32) -> (i32, i32) {
    %c0_i32 = arith.constant 0 : i32
    %c0_i32_0 = arith.constant 0 : i32
    %c0_i32_1 = arith.constant 0 : i32
    return %c0_i32, %c0_i32_0 : i32, i32
  }
  func.func @transform_2(%arg0: i32) -> (i32, i32) {
    %c0_i32 = arith.constant 0 : i32
    %c0_i32_0 = arith.constant 0 : i32
    %c0_i32_1 = arith.constant 0 : i32
    return %c0_i32, %c0_i32_0 : i32, i32
  }
  func.func @transform_3(%arg0: i32) -> (i32, i32) {
    %c0_i32 = arith.constant 0 : i32
    %c0_i32_0 = arith.constant 0 : i32
    return %arg0, %c0_i32 : i32, i32
  }
}

</mosaic_0001>

<bundles_post_ra>
// kernel: cnn_forward.3
= control target key start
LH: loop header
LB: loop body
LE: loop exit
PB: predicated region body
PF: predicated region fallthrough
CT: control target
= control target key end

     0   :  { %vm315_vm0 = vcmask 1041408   ;;  %v1454_v0 = vmov 0.0   ;;  %vm1455_vm1 = vmmov 0   ;;  %vm239_vm2 = vcmask 818176   ;;  %s1456_s20 = smov 112   ;;  %s2403_s1 = inlined_call_operand.vmem [shape: bf16[100,64], index: 1, kind: input, shape index: {}]   ;;  %s2404_s0 = inlined_call_operand.vmem [shape: bf16[392,100], index: 0, kind: input, shape index: {}]   ;;  %s2405_s2 = inlined_call_operand.vmem [shape: f32[1,16], index: 2, kind: input, shape index: {}]   ;;  %s2406_s3 = inlined_call_operand.vmem [shape: f32[392,16], index: 3, kind: output, shape index: {}]  }
   0x1   :  { %1290 = vmatprep.subr.bf16.mxu0 %v1454_v0  ;;  %1404 = vmatprep.subr.bf16.mxu1 %v1454_v0  ;;  %v1422_v1 = vld [vmem:[%s2403_s1 + $0x30] ss:$0 sps:$4 sm:$0x33]   ;;  %v1423_v3 = vld [vmem:[%s2403_s1 + $0x28] sm:$0xff]   ;;  %v1424_v4 = vld [vmem:[%s2403_s1 + $0x20] sm:$0xff]   ;;  %vm1146_vm3 = vcmask 130048  }
   0x2   :  { %1304 = vmatprep.mubr.msk.bf16.mxu0 %vm1455_vm1, %v1454_v0  ;;  %1356 = vmatprep.mubr.msk.bf16.mxu1 %vm1455_vm1, %v1454_v0  ;;  %v317_v2 = vsel %vm315_vm0, %v1422_v1, 0  ;;  %v1425_v5 = vld [vmem:[%s2403_s1 + $0x18] sm:$0xff]   ;;  %v1426_v6 = vld [vmem:[%s2403_s1 + $0x10] sm:$0xff]   ;;  %v1427_v7 = vld [vmem:[%s2403_s1 + $0x8] sm:$0xff]  }
   0x3   :  { %1291 = vmatpush3.bf16.msra.mxu0 %v317_v2  ;;  %1411 = vmatpush3.bf16.msra.mxu1 %v317_v2  ;;  %v1428_v8 = vld [vmem:[%s2403_s1] sm:$0xff]   ;;  %v1430_v10 = vld [vmem:[%s2404_s0 + $0x68] sm:$0xff]   ;;  %v1432_v12 = vld [vmem:[%s2404_s0 + $0x70] sm:$0xff]  }
   0x4   :  { %1292 = vmatprep.subr.bf16.mxu0 %v1454_v0  ;;  %1405 = vmatprep.subr.bf16.mxu1 %v1454_v0  ;;  %v1429_v9 = vld [vmem:[%s2404_s0] sm:$0xff]   ;;  %v1431_v11 = vld [vmem:[%s2404_s0 + $0x8] sm:$0xff]   ;;  %v1433_v13 = vld [vmem:[%s2404_s0 + $0x10] sm:$0xff]  }
   0x5   :  { %v1434_v14 = vld [vmem:[%s2404_s0 + $0x78] sm:$0xff]   ;;  %v1436_v16 = vld [vmem:[%s2404_s0 + $0x80] sm:$0xff]   ;;  %v1438_v18 = vld [vmem:[%s2404_s0 + $0x88] sm:$0xff]  }
   0x6   :  { %v1435_v15 = vld [vmem:[%s2404_s0 + $0x18] sm:$0xff]   ;;  %v1437_v17 = vld [vmem:[%s2404_s0 + $0x20] sm:$0xff]   ;;  %v1439_v19 = vld [vmem:[%s2404_s0 + $0x28] sm:$0xff]  }
   0x7   :  { %1293 = vmatpush3.bf16.msra.mxu0 %v1423_v3  ;;  %1412 = vmatpush3.bf16.msra.mxu1 %v1423_v3  ;;  %v1440_v20 = vld [vmem:[%s2404_s0 + $0x90] sm:$0xff]   ;;  %v1442_v22 = vld [vmem:[%s2404_s0 + $0x98] sm:$0xff]   ;;  %v1444_v24 = vld [vmem:[%s2404_s0 + $0xa0] sm:$0xff]  }
   0x8   :  { %1294 = vmatprep.subr.bf16.mxu0 %v1454_v0  ;;  %1406 = vmatprep.subr.bf16.mxu1 %v1454_v0  ;;  %v1441_v21 = vld [vmem:[%s2404_s0 + $0x30] sm:$0xff]   ;;  %v1443_v23 = vld [vmem:[%s2404_s0 + $0x38] sm:$0xff]   ;;  %v1445_v25 = vld [vmem:[%s2404_s0 + $0x40] sm:$0xff]  }
   0x9   :  { %v1446_v26 = vld [vmem:[%s2404_s0 + $0xa8] sm:$0xff]   ;;  %v1448_v28 = vld [vmem:[%s2404_s0 + $0xb0] sm:$0xff]   ;;  %v1450_v30 = vld [vmem:[%s2404_s0 + $0xb8] sm:$0xff]  }
   0xa   :  { %v1447_v27 = vld [vmem:[%s2404_s0 + $0x48] sm:$0xff]   ;;  %v1449_v29 = vld [vmem:[%s2404_s0 + $0x50] sm:$0xff]   ;;  %v1451_v31 = vld [vmem:[%s2404_s0 + $0x58] sm:$0xff]  }
   0xb   :  { %1295 = vmatpush3.bf16.msra.mxu0 %v1424_v4  ;;  %1413 = vmatpush3.bf16.msra.mxu1 %v1424_v4  ;;  %v1452_v32 = vld [vmem:[%s2404_s0 + $0xc0] ss:$0 sps:$4 sm:$0xff]  }
   0xc   :  { %1296 = vmatprep.subr.bf16.mxu0 %v1454_v0  ;;  %1407 = vmatprep.subr.bf16.mxu1 %v1454_v0  ;;  %v1453_v33 = vld [vmem:[%s2404_s0 + $0x60] sm:$0xff]   ;;  %s1457_s0 = smov 96  }
   0xf   :  { %1297 = vmatpush3.bf16.msra.mxu0 %v1425_v5  ;;  %1414 = vmatpush3.bf16.msra.mxu1 %v1425_v5 }
  0x10   :  { %1298 = vmatprep.subr.bf16.mxu0 %v1454_v0  ;;  %1408 = vmatprep.subr.bf16.mxu1 %v1454_v0 }
  0x13   :  { %1299 = vmatpush3.bf16.msra.mxu0 %v1426_v6  ;;  %1415 = vmatpush3.bf16.msra.mxu1 %v1426_v6 }
  0x14   :  { %1300 = vmatprep.subr.bf16.mxu0 %v1454_v0  ;;  %1409 = vmatprep.subr.bf16.mxu1 %v1454_v0 }
  0x17   :  { %1301 = vmatpush3.bf16.msra.mxu0 %v1427_v7  ;;  %1416 = vmatpush3.bf16.msra.mxu1 %v1427_v7 }
  0x18   :  { %1302 = vmatprep.subr.bf16.mxu0 %v1454_v0  ;;  %1410 = vmatprep.subr.bf16.mxu1 %v1454_v0 }
  0x1b   :  { %1303 = vmatpush3.bf16.msra.mxu0 %v1428_v8  ;;  %1417 = vmatpush3.bf16.msra.mxu1 %v1428_v8 }
  0x1e   :  { %1305 = vmatmul.mubr.msk.bf16.vlgmr.msra.gmra.mxu0 %vm239_vm2, %v1429_v9  ;;  %1357 = vmatmul.mubr.msk.bf16.vlgmr.msra.gmra.mxu1 %vm239_vm2, %v1430_v10 }
  0x1f   :  { %1308 = vmatprep.mubr.msk.bf16.mxu0 %vm1455_vm1, %v1454_v0  ;;  %1360 = vmatprep.mubr.msk.bf16.mxu1 %vm1455_vm1, %v1454_v0 }
  0x26   :  { %1309 = vmatmul.mubr.msk.bf16.gmra.mxu0 %vm239_vm2, %v1431_v11  ;;  %1361 = vmatmul.mubr.msk.bf16.gmra.mxu1 %vm239_vm2, %v1432_v12 }
  0x27   :  { %1312 = vmatprep.mubr.msk.bf16.mxu0 %vm1455_vm1, %v1454_v0  ;;  %1364 = vmatprep.mubr.msk.bf16.mxu1 %vm1455_vm1, %v1454_v0 }
  0x2e   :  { %1313 = vmatmul.mubr.msk.bf16.gmra.mxu0 %vm239_vm2, %v1433_v13  ;;  %1365 = vmatmul.mubr.msk.bf16.gmra.mxu1 %vm239_vm2, %v1434_v14 }
  0x2f   :  { %1316 = vmatprep.mubr.msk.bf16.mxu0 %vm1455_vm1, %v1454_v0  ;;  %1368 = vmatprep.mubr.msk.bf16.mxu1 %vm1455_vm1, %v1454_v0 }
  0x36   :  { %1317 = vmatmul.mubr.msk.bf16.gmra.mxu0 %vm239_vm2, %v1435_v15  ;;  %1369 = vmatmul.mubr.msk.bf16.gmra.mxu1 %vm239_vm2, %v1436_v16 }
  0x37   :  { %1320 = vmatprep.mubr.msk.bf16.mxu0 %vm1455_vm1, %v1454_v0  ;;  %1372 = vmatprep.mubr.msk.bf16.mxu1 %vm1455_vm1, %v1454_v0 }
  0x3e   :  { %1321 = vmatmul.mubr.msk.bf16.gmra.mxu0 %vm239_vm2, %v1437_v17  ;;  %1373 = vmatmul.mubr.msk.bf16.gmra.mxu1 %vm239_vm2, %v1438_v18 }
  0x3f   :  { %1324 = vmatprep.mubr.msk.bf16.mxu0 %vm1455_vm1, %v1454_v0  ;;  %1376 = vmatprep.mubr.msk.bf16.mxu1 %vm1455_vm1, %v1454_v0 }
  0x46   :  { %1325 = vmatmul.mubr.msk.bf16.gmra.mxu0 %vm239_vm2, %v1439_v19  ;;  %1377 = vmatmul.mubr.msk.bf16.gmra.mxu1 %vm239_vm2, %v1440_v20 }
  0x47   :  { %1328 = vmatprep.mubr.msk.bf16.mxu0 %vm1455_vm1, %v1454_v0  ;;  %1380 = vmatprep.mubr.msk.bf16.mxu1 %vm1455_vm1, %v1454_v0 }
  0x4e   :  { %1329 = vmatmul.mubr.msk.bf16.gmra.mxu0 %vm239_vm2, %v1441_v21  ;;  %1381 = vmatmul.mubr.msk.bf16.gmra.mxu1 %vm239_vm2, %v1442_v22 }
  0x4f   :  { %1332 = vmatprep.mubr.msk.bf16.mxu0 %vm1455_vm1, %v1454_v0  ;;  %1384 = vmatprep.mubr.msk.bf16.mxu1 %vm1455_vm1, %v1454_v0 }
  0x56   :  { %1333 = vmatmul.mubr.msk.bf16.gmra.mxu0 %vm239_vm2, %v1443_v23  ;;  %1385 = vmatmul.mubr.msk.bf16.gmra.mxu1 %vm239_vm2, %v1444_v24 }
  0x57   :  { %1336 = vmatprep.mubr.msk.bf16.mxu0 %vm1455_vm1, %v1454_v0  ;;  %1388 = vmatprep.mubr.msk.bf16.mxu1 %vm1455_vm1, %v1454_v0 }
  0x5e   :  { %1337 = vmatmul.mubr.msk.bf16.gmra.mxu0 %vm239_vm2, %v1445_v25  ;;  %1389 = vmatmul.mubr.msk.bf16.gmra.mxu1 %vm239_vm2, %v1446_v26 }
  0x5f   :  { %1340 = vmatprep.mubr.msk.bf16.mxu0 %vm1455_vm1, %v1454_v0  ;;  %1392 = vmatprep.mubr.msk.bf16.mxu1 %vm1455_vm1, %v1454_v0 }
  0x66   :  { %1341 = vmatmul.mubr.msk.bf16.gmra.mxu0 %vm239_vm2, %v1447_v27  ;;  %1393 = vmatmul.mubr.msk.bf16.gmra.mxu1 %vm239_vm2, %v1448_v28 }
  0x67   :  { %1344 = vmatprep.mubr.msk.bf16.mxu0 %vm1455_vm1, %v1454_v0  ;;  %1396 = vmatprep.mubr.msk.bf16.mxu1 %vm1455_vm1, %v1454_v0 }
  0x6e   :  { %1345 = vmatmul.mubr.msk.bf16.gmra.mxu0 %vm239_vm2, %v1449_v29  ;;  %1397 = vmatmul.mubr.msk.bf16.gmra.mxu1 %vm239_vm2, %v1450_v30 }
  0x6f   :  { %1348 = vmatprep.mubr.msk.bf16.mxu0 %vm1455_vm1, %v1454_v0  ;;  %1400 = vmatprep.mubr.msk.bf16.mxu1 %vm1455_vm1, %v1454_v0 }
  0x76   :  { %1349 = vmatmul.mubr.msk.bf16.gmra.mxu0 %vm239_vm2, %v1451_v31  ;;  %1401 = vmatmul.mubr.msk.bf16.gmra.mxu1 %vm239_vm2, %v1452_v32 }
  0x77   :  { %1352 = vmatprep.mubr.msk.bf16.mxu0 %vm1455_vm1, %v1454_v0 }
  0x7e   :  { %1353 = vmatmul.mubr.msk.bf16.gmra.mxu0 %vm239_vm2, %v1453_v33 }
  0xde   :  { %v1663_v34 = vpop.f32.mrf.mxu0  ;;  %v1665_v35 = vpop.f32.mrf.mxu1 }
  0xdf   :  { %600 = vrot.lane.b32.xlu0 %v1663_v34, %s1456_s20 }
  0xe0   :  { %v1306_v36 = vpop.f32.mrf.mxu0  ;;  %v1358_v37 = vpop.f32.mrf.mxu1 }
  0xe2   :  { %v1669_v38 = vpop.f32.mrf.mxu0  ;;  %v1671_v39 = vpop.f32.mrf.mxu1 }
  0xe3   :  { %654 = vrot.lane.b32.xlu1 %v1671_v39, %s1456_s20  ;;  %652 = vrot.lane.b32.xlu0 %v1665_v35, %s1456_s20 }
  0xe4   :  { %v1307_v40 = vpop.f32.mrf.mxu0  ;;  %v1359_v41 = vpop.f32.mrf.mxu1 }
  0xe6   :  { %v1677_v42 = vpop.f32.mrf.mxu0  ;;  %v1679_v43 = vpop.f32.mrf.mxu1 }
  0xe7   :  { %602 = vrot.lane.b32.xlu0 %v1669_v38, %s1456_s20  ;;  %604 = vrot.lane.b32.xlu1 %v1677_v42, %s1456_s20 }
  0xe8   :  { %v1310_v44 = vpop.f32.mrf.mxu0  ;;  %v1362_v45 = vpop.f32.mrf.mxu1 }
  0xea   :  { %v1685_v46 = vpop.f32.mrf.mxu0  ;;  %v1687_v47 = vpop.f32.mrf.mxu1 }
  0xeb   :  { %656 = vrot.lane.b32.xlu0 %v1679_v43, %s1456_s20  ;;  %606 = vrot.lane.b32.xlu1 %v1685_v46, %s1456_s20 }
  0xec   :  { %v1311_v48 = vpop.f32.mrf.mxu0  ;;  %v1363_v49 = vpop.f32.mrf.mxu1 }
  0xee   :  { %v1693_v50 = vpop.f32.mrf.mxu0  ;;  %v1695_v51 = vpop.f32.mrf.mxu1 }
  0xef   :  { %658 = vrot.lane.b32.xlu1 %v1687_v47, %s1456_s20  ;;  %608 = vrot.lane.b32.xlu0 %v1693_v50, %s1456_s20 }
  0xf0   :  { %v1314_v52 = vpop.f32.mrf.mxu0  ;;  %v1366_v53 = vpop.f32.mrf.mxu1 }
  0xf2   :  { %v1701_v54 = vpop.f32.mrf.mxu0  ;;  %v1703_v55 = vpop.f32.mrf.mxu1 }
  0xf3   :  { %660 = vrot.lane.b32.xlu0 %v1695_v51, %s1456_s20  ;;  %610 = vrot.lane.b32.xlu1 %v1701_v54, %s1456_s20 }
  0xf4   :  { %v1315_v56 = vpop.f32.mrf.mxu0  ;;  %v1367_v57 = vpop.f32.mrf.mxu1 }
  0xf6   :  { %v1709_v58 = vpop.f32.mrf.mxu0  ;;  %v1711_v59 = vpop.f32.mrf.mxu1 }
  0xf7   :  { %662 = vrot.lane.b32.xlu1 %v1703_v55, %s1456_s20  ;;  %612 = vrot.lane.b32.xlu0 %v1709_v58, %s1456_s20 }
  0xf8   :  { %v1318_v60 = vpop.f32.mrf.mxu0  ;;  %v1370_v61 = vpop.f32.mrf.mxu1 }
  0xfa   :  { %v1717_v62 = vpop.f32.mrf.mxu0  ;;  %v1719_v63 = vpop.f32.mrf.mxu1 }
  0xfb   :  { %664 = vrot.lane.b32.xlu0 %v1711_v59, %s1456_s20  ;;  %614 = vrot.lane.b32.xlu1 %v1717_v62, %s1456_s20 }
  0xfc   :  { %v1319_v0 = vpop.f32.mrf.mxu0  ;;  %v1371_v1 = vpop.f32.mrf.mxu1 }
  0xfe   :  { %v1725_v2 = vpop.f32.mrf.mxu0  ;;  %v1727_v3 = vpop.f32.mrf.mxu1 }
  0xff   :  { %666 = vrot.lane.b32.xlu1 %v1719_v63, %s1456_s20  ;;  %616 = vrot.lane.b32.xlu0 %v1725_v2, %s1456_s20 }
 0x100   :  { %v1322_v4 = vpop.f32.mrf.mxu0  ;;  %v1374_v5 = vpop.f32.mrf.mxu1 }
 0x102   :  { %v1733_v6 = vpop.f32.mrf.mxu0  ;;  %v1735_v7 = vpop.f32.mrf.mxu1 }
 0x103   :  { %668 = vrot.lane.b32.xlu0 %v1727_v3, %s1456_s20  ;;  %618 = vrot.lane.b32.xlu1 %v1733_v6, %s1456_s20 }
 0x104   :  { %v1323_v8 = vpop.f32.mrf.mxu0  ;;  %v1375_v9 = vpop.f32.mrf.mxu1 }
 0x106   :  { %v1741_v10 = vpop.f32.mrf.mxu0  ;;  %v1743_v11 = vpop.f32.mrf.mxu1 }
 0x107   :  { %670 = vrot.lane.b32.xlu1 %v1735_v7, %s1456_s20  ;;  %620 = vrot.lane.b32.xlu0 %v1741_v10, %s1456_s20 }
 0x108   :  { %v1326_v12 = vpop.f32.mrf.mxu0  ;;  %v1378_v13 = vpop.f32.mrf.mxu1 }
 0x10a   :  { %v1749_v14 = vpop.f32.mrf.mxu0  ;;  %v1751_v15 = vpop.f32.mrf.mxu1 }
 0x10b   :  { %672 = vrot.lane.b32.xlu0 %v1743_v11, %s1456_s20  ;;  %622 = vrot.lane.b32.xlu1 %v1749_v14, %s1456_s20 }
 0x10c   :  { %v1327_v16 = vpop.f32.mrf.mxu0  ;;  %v1379_v17 = vpop.f32.mrf.mxu1 }
 0x10e   :  { %v1757_v18 = vpop.f32.mrf.mxu0  ;;  %v1759_v19 = vpop.f32.mrf.mxu1 }
 0x10f   :  { %674 = vrot.lane.b32.xlu1 %v1751_v15, %s1456_s20  ;;  %624 = vrot.lane.b32.xlu0 %v1757_v18, %s1456_s20 }
 0x110   :  { %v1330_v20 = vpop.f32.mrf.mxu0  ;;  %v1382_v21 = vpop.f32.mrf.mxu1 }
 0x112   :  { %v1765_v22 = vpop.f32.mrf.mxu0  ;;  %v1767_v23 = vpop.f32.mrf.mxu1 }
 0x113   :  { %676 = vrot.lane.b32.xlu0 %v1759_v19, %s1456_s20  ;;  %626 = vrot.lane.b32.xlu1 %v1765_v22, %s1456_s20 }
 0x114   :  { %v1331_v24 = vpop.f32.mrf.mxu0  ;;  %v1383_v25 = vpop.f32.mrf.mxu1 }
 0x116   :  { %v1773_v26 = vpop.f32.mrf.mxu0  ;;  %v1775_v27 = vpop.f32.mrf.mxu1 }
 0x117   :  { %678 = vrot.lane.b32.xlu1 %v1767_v23, %s1456_s20  ;;  %628 = vrot.lane.b32.xlu0 %v1773_v26, %s1456_s20 }
 0x118   :  { %v1334_v28 = vpop.f32.mrf.mxu0  ;;  %v1386_v29 = vpop.f32.mrf.mxu1 }
 0x11a   :  { %v1781_v30 = vpop.f32.mrf.mxu0  ;;  %v1783_v31 = vpop.f32.mrf.mxu1 }
 0x11b   :  { %680 = vrot.lane.b32.xlu0 %v1775_v27, %s1456_s20  ;;  %630 = vrot.lane.b32.xlu1 %v1781_v30, %s1456_s20 }
 0x11c   :  { %v1335_v32 = vpop.f32.mrf.mxu0  ;;  %v1387_v33 = vpop.f32.mrf.mxu1 }
 0x11e   :  { %v1789_v36 = vpop.f32.mrf.mxu0  ;;  %v1791_v37 = vpop.f32.mrf.mxu1 }
 0x11f   :  { %682 = vrot.lane.b32.xlu1 %v1783_v31, %s1456_s20  ;;  %632 = vrot.lane.b32.xlu0 %v1789_v36, %s1456_s20 }
 0x120   :  { %v1338_v40 = vpop.f32.mrf.mxu0  ;;  %v1390_v41 = vpop.f32.mrf.mxu1 }
 0x122   :  { %v1797_v44 = vpop.f32.mrf.mxu0  ;;  %v1799_v45 = vpop.f32.mrf.mxu1 }
 0x123   :  { %684 = vrot.lane.b32.xlu0 %v1791_v37, %s1456_s20  ;;  %634 = vrot.lane.b32.xlu1 %v1797_v44, %s1456_s20 }
 0x124   :  { %v1339_v48 = vpop.f32.mrf.mxu0  ;;  %v1391_v49 = vpop.f32.mrf.mxu1 }
 0x126   :  { %v1805_v52 = vpop.f32.mrf.mxu0  ;;  %v1807_v53 = vpop.f32.mrf.mxu1 }
 0x127   :  { %686 = vrot.lane.b32.xlu1 %v1799_v45, %s1456_s20  ;;  %636 = vrot.lane.b32.xlu0 %v1805_v52, %s1456_s20 }
 0x128   :  { %v1342_v56 = vpop.f32.mrf.mxu0  ;;  %v1394_v57 = vpop.f32.mrf.mxu1 }
 0x12a   :  { %v1813_v60 = vpop.f32.mrf.mxu0  ;;  %v1815_v61 = vpop.f32.mrf.mxu1 }
 0x12b   :  { %688 = vrot.lane.b32.xlu0 %v1807_v53, %s1456_s20  ;;  %638 = vrot.lane.b32.xlu1 %v1813_v60, %s1456_s20 }
 0x12c   :  { %v1343_v0 = vpop.f32.mrf.mxu0  ;;  %v1395_v1 = vpop.f32.mrf.mxu1 }
 0x12e   :  { %v1821_v4 = vpop.f32.mrf.mxu0  ;;  %v1823_v5 = vpop.f32.mrf.mxu1 }
 0x12f   :  { %690 = vrot.lane.b32.xlu1 %v1815_v61, %s1456_s20  ;;  %640 = vrot.lane.b32.xlu0 %v1821_v4, %s1456_s20 }
 0x130   :  { %v1346_v8 = vpop.f32.mrf.mxu0  ;;  %v1398_v9 = vpop.f32.mrf.mxu1 }
 0x132   :  { %v1829_v12 = vpop.f32.mrf.mxu0  ;;  %v1831_v13 = vpop.f32.mrf.mxu1 }
 0x133   :  { %692 = vrot.lane.b32.xlu0 %v1823_v5, %s1456_s20  ;;  %642 = vrot.lane.b32.xlu1 %v1829_v12, %s1456_s20 }
 0x134   :  { %v1347_v16 = vpop.f32.mrf.mxu0  ;;  %v1399_v17 = vpop.f32.mrf.mxu1 }
 0x136   :  { %v1837_v20 = vpop.f32.mrf.mxu0  ;;  %v1839_v21 = vpop.f32.mrf.mxu1 }
 0x137   :  { %694 = vrot.lane.b32.xlu1 %v1831_v13, %s1456_s20  ;;  %644 = vrot.lane.b32.xlu0 %v1837_v20, %s1456_s20 }
 0x138   :  { %v1350_v24 = vpop.f32.mrf.mxu0  ;;  %v1402_v25 = vpop.f32.mrf.mxu1 }
 0x13a   :  { %v1845_v28 = vpop.f32.mrf.mxu0  ;;  %v548_v29 = vpop.f32.mrf.mxu1 }
 0x13b   :  { %696 = vrot.lane.b32.xlu0 %v1839_v21, %s1456_s20  ;;  %646 = vrot.lane.b32.xlu1 %v1845_v28, %s1456_s20 }
 0x13c   :  { %v1351_v32 = vpop.f32.mrf.mxu0  ;;  %v1403_v33 = vpop.f32.mrf.mxu1 }
 0x13e   :  { %v1851_v40 = vpop.f32.mrf.mxu0 }
 0x13f   :  { %648 = vrot.lane.b32.xlu0 %v1851_v40, %s1456_s20 }
 0x140   :  { %v1354_v41 = vpop.f32.mrf.mxu0 }
 0x142   :  { %v1855_v48 = vpop.f32.mrf.mxu0 }
 0x143   :  { %650 = vrot.lane.b32.xlu1 %v1855_v48, %s1456_s20 }
 0x144   :  { %v1355_v49 = vpop.f32.mrf.mxu0 }
 0x151   :  { %v601_v56 = vpop.permute.xlu0 %600 }
 0x152   :  { %v1860_v57 = vmax.f32 %v1663_v34, %v601_v56 }
 0x154   :  { %845 = vrot.lane.b32.xlu1 %v1860_v57, %s1457_s0 }
 0x155   :  { %v655_v0 = vpop.permute.xlu1 %654  ;;  %v653_v1 = vpop.permute.xlu0 %652 }
 0x156   :  { %v1865_v8 = vmax.f32 %v1665_v35, %v653_v1  ;;  %v1880_v25 = vmax.f32 %v1671_v39, %v655_v0 }
 0x158   :  { %897 = vrot.lane.b32.xlu1 %v1865_v8, %s1457_s0 }
 0x159   :  { %v603_v9 = vpop.permute.xlu0 %602  ;;  %v605_v16 = vpop.permute.xlu1 %604 }
 0x15a   :  { %v1870_v17 = vmax.f32 %v1669_v38, %v603_v9  ;;  %v1873_v34 = vmax.f32 %v1677_v42, %v605_v16 }
 0x15c   :  { %847 = vrot.lane.b32.xlu0 %v1870_v17, %s1457_s0  ;;  %849 = vrot.lane.b32.xlu1 %v1873_v34, %s1457_s0 }
 0x15d   :  { %v657_v24 = vpop.permute.xlu0 %656  ;;  %v607_v35 = vpop.permute.xlu1 %606 }
 0x15e   :  { %v1883_v29 = vmax.f32 %v1679_v43, %v657_v24  ;;  %v1890_v32 = vmax.f32 %v1685_v46, %v607_v35 }
 0x160   :  { %899 = vrot.lane.b32.xlu0 %v1880_v25, %s1457_s0  ;;  %901 = vrot.lane.b32.xlu1 %v1883_v29, %s1457_s0 }
 0x161   :  { %v659_v38 = vpop.permute.xlu1 %658  ;;  %v609_v42 = vpop.permute.xlu0 %608 }
 0x162   :  { %v1893_v33 = vmax.f32 %v1693_v50, %v609_v42  ;;  %v1900_v41 = vmax.f32 %v1687_v47, %v659_v38 }
 0x164   :  { %851 = vrot.lane.b32.xlu0 %v1890_v32, %s1457_s0  ;;  %853 = vrot.lane.b32.xlu1 %v1893_v33, %s1457_s0 }
 0x165   :  { %v661_v39 = vpop.permute.xlu0 %660  ;;  %v611_v43 = vpop.permute.xlu1 %610 }
 0x166   :  { %v1903_v49 = vmax.f32 %v1695_v51, %v661_v39  ;;  %v1910_v56 = vmax.f32 %v1701_v54, %v611_v43 }
 0x168   :  { %903 = vrot.lane.b32.xlu0 %v1900_v41, %s1457_s0  ;;  %905 = vrot.lane.b32.xlu1 %v1903_v49, %s1457_s0 }
 0x169   :  { %v663_v46 = vpop.permute.xlu1 %662  ;;  %v613_v50 = vpop.permute.xlu0 %612 }
 0x16a   :  { %v1913_v0 = vmax.f32 %v1709_v58, %v613_v50  ;;  %v1920_v1 = vmax.f32 %v1703_v55, %v663_v46 }
 0x16c   :  { %855 = vrot.lane.b32.xlu0 %v1910_v56, %s1457_s0  ;;  %857 = vrot.lane.b32.xlu1 %v1913_v0, %s1457_s0 }
 0x16d   :  { %v665_v47 = vpop.permute.xlu0 %664  ;;  %v615_v51 = vpop.permute.xlu1 %614 }
 0x16e   :  { %v1923_v9 = vmax.f32 %v1711_v59, %v665_v47  ;;  %v1930_v16 = vmax.f32 %v1717_v62, %v615_v51 }
 0x170   :  { %907 = vrot.lane.b32.xlu0 %v1920_v1, %s1457_s0  ;;  %909 = vrot.lane.b32.xlu1 %v1923_v9, %s1457_s0 }
 0x171   :  { %v667_v54 = vpop.permute.xlu1 %666  ;;  %v617_v58 = vpop.permute.xlu0 %616 }
 0x172   :  { %v1933_v24 = vmax.f32 %v1725_v2, %v617_v58  ;;  %v1940_v35 = vmax.f32 %v1719_v63, %v667_v54 }
 0x174   :  { %859 = vrot.lane.b32.xlu0 %v1930_v16, %s1457_s0  ;;  %861 = vrot.lane.b32.xlu1 %v1933_v24, %s1457_s0 }
 0x175   :  { %v669_v55 = vpop.permute.xlu0 %668  ;;  %v619_v59 = vpop.permute.xlu1 %618 }
 0x176   :  { %v1943_v38 = vmax.f32 %v1727_v3, %v669_v55  ;;  %v1950_v42 = vmax.f32 %v1733_v6, %v619_v59 }
 0x178   :  { %911 = vrot.lane.b32.xlu0 %v1940_v35, %s1457_s0  ;;  %913 = vrot.lane.b32.xlu1 %v1943_v38, %s1457_s0 }
 0x179   :  { %v671_v62 = vpop.permute.xlu1 %670  ;;  %v621_v2 = vpop.permute.xlu0 %620 }
 0x17a   :  { %v1953_v39 = vmax.f32 %v1741_v10, %v621_v2  ;;  %v1960_v43 = vmax.f32 %v1735_v7, %v671_v62 }
 0x17c   :  { %863 = vrot.lane.b32.xlu0 %v1950_v42, %s1457_s0  ;;  %865 = vrot.lane.b32.xlu1 %v1953_v39, %s1457_s0 }
 0x17d   :  { %v673_v63 = vpop.permute.xlu0 %672  ;;  %v623_v3 = vpop.permute.xlu1 %622 }
 0x17e   :  { %v1963_v46 = vmax.f32 %v1743_v11, %v673_v63  ;;  %v1970_v50 = vmax.f32 %v1749_v14, %v623_v3 }
 0x180   :  { %915 = vrot.lane.b32.xlu0 %v1960_v43, %s1457_s0  ;;  %917 = vrot.lane.b32.xlu1 %v1963_v46, %s1457_s0 }
 0x181   :  { %v675_v6 = vpop.permute.xlu1 %674  ;;  %v625_v10 = vpop.permute.xlu0 %624 }
 0x182   :  { %v1973_v47 = vmax.f32 %v1757_v18, %v625_v10  ;;  %v1980_v51 = vmax.f32 %v1751_v15, %v675_v6 }
 0x184   :  { %867 = vrot.lane.b32.xlu0 %v1970_v50, %s1457_s0  ;;  %869 = vrot.lane.b32.xlu1 %v1973_v47, %s1457_s0 }
 0x185   :  { %v677_v7 = vpop.permute.xlu0 %676  ;;  %v627_v11 = vpop.permute.xlu1 %626 }
 0x186   :  { %v1983_v54 = vmax.f32 %v1759_v19, %v677_v7  ;;  %v1990_v58 = vmax.f32 %v1765_v22, %v627_v11 }
 0x188   :  { %919 = vrot.lane.b32.xlu0 %v1980_v51, %s1457_s0  ;;  %921 = vrot.lane.b32.xlu1 %v1983_v54, %s1457_s0 }
 0x189   :  { %v679_v14 = vpop.permute.xlu1 %678  ;;  %v629_v18 = vpop.permute.xlu0 %628 }
 0x18a   :  { %v1993_v55 = vmax.f32 %v1773_v26, %v629_v18  ;;  %v2000_v59 = vmax.f32 %v1767_v23, %v679_v14 }
 0x18c   :  { %871 = vrot.lane.b32.xlu0 %v1990_v58, %s1457_s0  ;;  %873 = vrot.lane.b32.xlu1 %v1993_v55, %s1457_s0 }
 0x18d   :  { %v681_v15 = vpop.permute.xlu0 %680  ;;  %v631_v19 = vpop.permute.xlu1 %630 }
 0x18e   :  { %v2003_v62 = vmax.f32 %v1775_v27, %v681_v15  ;;  %v2010_v2 = vmax.f32 %v1781_v30, %v631_v19 }
 0x190   :  { %923 = vrot.lane.b32.xlu0 %v2000_v59, %s1457_s0  ;;  %925 = vrot.lane.b32.xlu1 %v2003_v62, %s1457_s0 }
 0x191   :  { %v683_v22 = vpop.permute.xlu1 %682  ;;  %v633_v26 = vpop.permute.xlu0 %632 }
 0x192   :  { %v2013_v63 = vmax.f32 %v1789_v36, %v633_v26  ;;  %v2020_v3 = vmax.f32 %v1783_v31, %v683_v22 }
 0x194   :  { %875 = vrot.lane.b32.xlu0 %v2010_v2, %s1457_s0  ;;  %877 = vrot.lane.b32.xlu1 %v2013_v63, %s1457_s0 }
 0x195   :  { %v685_v23 = vpop.permute.xlu0 %684  ;;  %v635_v27 = vpop.permute.xlu1 %634 }
 0x196   :  { %v2023_v6 = vmax.f32 %v1791_v37, %v685_v23  ;;  %v2030_v10 = vmax.f32 %v1797_v44, %v635_v27 }
 0x198   :  { %927 = vrot.lane.b32.xlu0 %v2020_v3, %s1457_s0  ;;  %929 = vrot.lane.b32.xlu1 %v2023_v6, %s1457_s0 }
 0x199   :  { %v687_v30 = vpop.permute.xlu1 %686  ;;  %v637_v36 = vpop.permute.xlu0 %636 }
 0x19a   :  { %v2033_v7 = vmax.f32 %v1805_v52, %v637_v36  ;;  %v2040_v11 = vmax.f32 %v1799_v45, %v687_v30 }
 0x19c   :  { %879 = vrot.lane.b32.xlu0 %v2030_v10, %s1457_s0  ;;  %881 = vrot.lane.b32.xlu1 %v2033_v7, %s1457_s0 }
 0x19d   :  { %v689_v31 = vpop.permute.xlu0 %688  ;;  %v639_v37 = vpop.permute.xlu1 %638 }
 0x19e   :  { %v2043_v14 = vmax.f32 %v1807_v53, %v689_v31  ;;  %v2050_v18 = vmax.f32 %v1813_v60, %v639_v37 }
 0x1a0   :  { %931 = vrot.lane.b32.xlu0 %v2040_v11, %s1457_s0  ;;  %933 = vrot.lane.b32.xlu1 %v2043_v14, %s1457_s0 }
 0x1a1   :  { %v691_v44 = vpop.permute.xlu1 %690  ;;  %v641_v52 = vpop.permute.xlu0 %640 }
 0x1a2   :  { %v2053_v15 = vmax.f32 %v1821_v4, %v641_v52  ;;  %v2060_v19 = vmax.f32 %v1815_v61, %v691_v44 }
 0x1a4   :  { %883 = vrot.lane.b32.xlu0 %v2050_v18, %s1457_s0  ;;  %885 = vrot.lane.b32.xlu1 %v2053_v15, %s1457_s0 }
 0x1a5   :  { %v693_v45 = vpop.permute.xlu0 %692  ;;  %v643_v53 = vpop.permute.xlu1 %642 }
 0x1a6   :  { %v2063_v22 = vmax.f32 %v1823_v5, %v693_v45  ;;  %v2070_v26 = vmax.f32 %v1829_v12, %v643_v53 }
 0x1a8   :  { %935 = vrot.lane.b32.xlu0 %v2060_v19, %s1457_s0  ;;  %937 = vrot.lane.b32.xlu1 %v2063_v22, %s1457_s0 }
 0x1a9   :  { %v695_v60 = vpop.permute.xlu1 %694  ;;  %v645_v4 = vpop.permute.xlu0 %644 }
 0x1aa   :  { %v2073_v23 = vmax.f32 %v1837_v20, %v645_v4 }
 0x1ac   :  { %887 = vrot.lane.b32.xlu0 %v2070_v26, %s1457_s0  ;;  %889 = vrot.lane.b32.xlu1 %v2073_v23, %s1457_s0 }
 0x1ad   :  { %v697_v61 = vpop.permute.xlu0 %696  ;;  %v647_v5 = vpop.permute.xlu1 %646 }
 0x1ae   :  { %v2080_v27 = vmax.f32 %v1845_v28, %v647_v5  ;;  %v2090_v36 = vmax.f32 %v1839_v21, %v697_v61  ;;  %v2100_v28 = vmax.f32 %v1831_v13, %v695_v60  ;;  %v2107_v21 = vld [vmem:[%s2405_s2] ss:$0 sm:$0xff] }
 0x1b0   :  { %891 = vrot.lane.b32.xlu0 %v2080_v27, %s1457_s0 }
 0x1b1   :  { %v649_v30 = vpop.permute.xlu0 %648 }
 0x1b2   :  { %v2085_v12 = vmax.f32 %v1851_v40, %v649_v30 }
 0x1b4   :  { %893 = vrot.lane.b32.xlu1 %v2085_v12, %s1457_s0 }
 0x1b5   :  { %v651_v20 = vpop.permute.xlu1 %650 }
 0x1b6   :  { %v2093_v31 = vmax.f32 %v1855_v48, %v651_v20 }
 0x1b8   :  { %941 = vrot.lane.b32.xlu1 %v2090_v36, %s1457_s0  ;;  %895 = vrot.lane.b32.xlu0 %v2093_v31, %s1457_s0 }
 0x1bc   :  { %939 = vrot.lane.b32.xlu0 %v2100_v28, %s1457_s0 }
 0x1c6   :  { %v846_v40 = vpop.permute.xlu1 %845 }
 0x1c7   :  { %v992_v48 = vmax.f32 %v1860_v57, %v846_v40 }
 0x1c9   :  { %v1048_v37 = vadd.f32 %v2107_v21, %v992_v48 }
 0x1ca   :  { %v898_v44 = vpop.permute.xlu1 %897 }
 0x1cb   :  { %v1097_v52 = vmax.f32 %v1048_v37, 0.0  ;;  %v1018_v45 = vmax.f32 %v1865_v8, %v898_v44 }
 0x1cd   :  { %1147 = vst.msk [vmem:[%s2406_s3] sm:$0xff] %vm1146_vm3, %v1097_v52  ;;  %v1074_v13 = vadd.f32 %v2107_v21, %v1018_v45 }
 0x1ce   :  { %v848_v53 = vpop.permute.xlu0 %847  ;;  %v850_v60 = vpop.permute.xlu1 %849 }
 0x1cf   :  { %v1123_v4 = vmax.f32 %v1074_v13, 0.0  ;;  %v993_v61 = vmax.f32 %v1870_v17, %v848_v53  ;;  %v994_v57 = vmax.f32 %v1873_v34, %v850_v60 }
 0x1d1   :  { %1173 = vst.msk [vmem:[%s2406_s3 + $0xd0] sm:$0xff] %vm1146_vm3, %v1123_v4  ;;  %v1049_v8 = vadd.f32 %v2107_v21, %v993_v61  ;;  %v1050_v5 = vadd.f32 %v2107_v21, %v994_v57 }
 0x1d2   :  { %v900_v30 = vpop.permute.xlu0 %899  ;;  %v902_v20 = vpop.permute.xlu1 %901 }
 0x1d3   :  { %v1098_v40 = vmax.f32 %v1049_v8, 0.0  ;;  %v1099_v48 = vmax.f32 %v1050_v5, 0.0  ;;  %v1019_v37 = vmax.f32 %v1880_v25, %v900_v30  ;;  %v1020_v44 = vmax.f32 %v1883_v29, %v902_v20 }
 0x1d5   :  { %1148 = vst.msk [vmem:[%s2406_s3 + $0x8] sm:$0xff] %vm1146_vm3, %v1098_v40  ;;  %1149 = vst.msk [vmem:[%s2406_s3 + $0x10] sm:$0xff] %vm1146_vm3, %v1099_v48  ;;  %v1075_v17 = vadd.f32 %v2107_v21, %v1019_v37  ;;  %v1076_v34 = vadd.f32 %v2107_v21, %v1020_v44 }
 0x1d6   :  { %v852_v52 = vpop.permute.xlu0 %851  ;;  %v854_v45 = vpop.permute.xlu1 %853 }
 0x1d7   :  { %v1124_v13 = vmax.f32 %v1075_v17, 0.0  ;;  %v1125_v25 = vmax.f32 %v1076_v34, 0.0  ;;  %v995_v29 = vmax.f32 %v1890_v32, %v852_v52  ;;  %v996_v53 = vmax.f32 %v1893_v33, %v854_v45 }
 0x1d9   :  { %1174 = vst.msk [vmem:[%s2406_s3 + $0xd8] sm:$0xff] %vm1146_vm3, %v1124_v13  ;;  %1175 = vst.msk [vmem:[%s2406_s3 + $0xe0] sm:$0xff] %vm1146_vm3, %v1125_v25  ;;  %v1051_v60 = vadd.f32 %v2107_v21, %v995_v29  ;;  %v1052_v4 = vadd.f32 %v2107_v21, %v996_v53 }
 0x1da   :  { %v904_v61 = vpop.permute.xlu0 %903  ;;  %v906_v57 = vpop.permute.xlu1 %905 }
 0x1db   :  { %v1100_v8 = vmax.f32 %v1051_v60, 0.0  ;;  %v1101_v32 = vmax.f32 %v1052_v4, 0.0  ;;  %v1021_v33 = vmax.f32 %v1900_v41, %v904_v61  ;;  %v1022_v5 = vmax.f32 %v1903_v49, %v906_v57 }
 0x1dd   :  { %1150 = vst.msk [vmem:[%s2406_s3 + $0x18] sm:$0xff] %vm1146_vm3, %v1100_v8  ;;  %1151 = vst.msk [vmem:[%s2406_s3 + $0x20] sm:$0xff] %vm1146_vm3, %v1101_v32  ;;  %v1077_v30 = vadd.f32 %v2107_v21, %v1021_v33  ;;  %v1078_v20 = vadd.f32 %v2107_v21, %v1022_v5 }
 0x1de   :  { %v856_v40 = vpop.permute.xlu0 %855  ;;  %v858_v48 = vpop.permute.xlu1 %857 }
 0x1df   :  { %v1126_v37 = vmax.f32 %v1077_v30, 0.0  ;;  %v1127_v41 = vmax.f32 %v1078_v20, 0.0  ;;  %v997_v49 = vmax.f32 %v1910_v56, %v856_v40  ;;  %v998_v44 = vmax.f32 %v1913_v0, %v858_v48 }
 0x1e1   :  { %1176 = vst.msk [vmem:[%s2406_s3 + $0xe8] sm:$0xff] %vm1146_vm3, %v1126_v37  ;;  %1177 = vst.msk [vmem:[%s2406_s3 + $0xf0] sm:$0xff] %vm1146_vm3, %v1127_v41  ;;  %v1053_v17 = vadd.f32 %v2107_v21, %v997_v49  ;;  %v1054_v34 = vadd.f32 %v2107_v21, %v998_v44 }
 0x1e2   :  { %v908_v52 = vpop.permute.xlu0 %907  ;;  %v910_v45 = vpop.permute.xlu1 %909 }
 0x1e3   :  { %v1102_v13 = vmax.f32 %v1053_v17, 0.0  ;;  %v1103_v56 = vmax.f32 %v1054_v34, 0.0  ;;  %v1023_v0 = vmax.f32 %v1920_v1, %v908_v52  ;;  %v1024_v25 = vmax.f32 %v1923_v9, %v910_v45 }
 0x1e5   :  { %1152 = vst.msk [vmem:[%s2406_s3 + $0x28] sm:$0xff] %vm1146_vm3, %v1102_v13  ;;  %1153 = vst.msk [vmem:[%s2406_s3 + $0x30] sm:$0xff] %vm1146_vm3, %v1103_v56  ;;  %v1079_v29 = vadd.f32 %v2107_v21, %v1023_v0  ;;  %v1080_v53 = vadd.f32 %v2107_v21, %v1024_v25 }
 0x1e6   :  { %v860_v60 = vpop.permute.xlu0 %859  ;;  %v862_v4 = vpop.permute.xlu1 %861 }
 0x1e7   :  { %v1128_v61 = vmax.f32 %v1079_v29, 0.0  ;;  %v1129_v1 = vmax.f32 %v1080_v53, 0.0  ;;  %v999_v9 = vmax.f32 %v1930_v16, %v860_v60  ;;  %v1000_v57 = vmax.f32 %v1933_v24, %v862_v4 }
 0x1e9   :  { %1178 = vst.msk [vmem:[%s2406_s3 + $0xf8] sm:$0xff] %vm1146_vm3, %v1128_v61  ;;  %1179 = vst.msk [vmem:[%s2406_s3 + $0x100] sm:$0xff] %vm1146_vm3, %v1129_v1  ;;  %v1055_v8 = vadd.f32 %v2107_v21, %v999_v9  ;;  %v1056_v32 = vadd.f32 %v2107_v21, %v1000_v57 }
 0x1ea   :  { %v912_v33 = vpop.permute.xlu0 %911  ;;  %v914_v5 = vpop.permute.xlu1 %913 }
 0x1eb   :  { %v1104_v30 = vmax.f32 %v1055_v8, 0.0  ;;  %v1105_v16 = vmax.f32 %v1056_v32, 0.0  ;;  %v1025_v24 = vmax.f32 %v1940_v35, %v912_v33  ;;  %v1026_v20 = vmax.f32 %v1943_v38, %v914_v5 }
 0x1ed   :  { %1154 = vst.msk [vmem:[%s2406_s3 + $0x38] sm:$0xff] %vm1146_vm3, %v1104_v30  ;;  %1155 = vst.msk [vmem:[%s2406_s3 + $0x40] sm:$0xff] %vm1146_vm3, %v1105_v16  ;;  %v1081_v40 = vadd.f32 %v2107_v21, %v1025_v24  ;;  %v1082_v48 = vadd.f32 %v2107_v21, %v1026_v20 }
 0x1ee   :  { %v864_v37 = vpop.permute.xlu0 %863  ;;  %v866_v41 = vpop.permute.xlu1 %865 }
 0x1ef   :  { %v1130_v49 = vmax.f32 %v1081_v40, 0.0  ;;  %v1131_v35 = vmax.f32 %v1082_v48, 0.0  ;;  %v1001_v38 = vmax.f32 %v1950_v42, %v864_v37  ;;  %v1002_v44 = vmax.f32 %v1953_v39, %v866_v41 }
 0x1f1   :  { %1180 = vst.msk [vmem:[%s2406_s3 + $0x108] sm:$0xff] %vm1146_vm3, %v1130_v49  ;;  %1181 = vst.msk [vmem:[%s2406_s3 + $0x110] sm:$0xff] %vm1146_vm3, %v1131_v35  ;;  %v1057_v17 = vadd.f32 %v2107_v21, %v1001_v38  ;;  %v1058_v34 = vadd.f32 %v2107_v21, %v1002_v44 }
 0x1f2   :  { %v916_v52 = vpop.permute.xlu0 %915  ;;  %v918_v45 = vpop.permute.xlu1 %917 }
 0x1f3   :  { %v1106_v13 = vmax.f32 %v1057_v17, 0.0  ;;  %v1107_v42 = vmax.f32 %v1058_v34, 0.0  ;;  %v1027_v39 = vmax.f32 %v1960_v43, %v916_v52  ;;  %v1028_v56 = vmax.f32 %v1963_v46, %v918_v45 }
 0x1f5   :  { %1156 = vst.msk [vmem:[%s2406_s3 + $0x48] sm:$0xff] %vm1146_vm3, %v1106_v13  ;;  %1157 = vst.msk [vmem:[%s2406_s3 + $0x50] sm:$0xff] %vm1146_vm3, %v1107_v42  ;;  %v1083_v0 = vadd.f32 %v2107_v21, %v1027_v39  ;;  %v1084_v25 = vadd.f32 %v2107_v21, %v1028_v56 }
 0x1f6   :  { %v868_v29 = vpop.permute.xlu0 %867  ;;  %v870_v53 = vpop.permute.xlu1 %869 }
 0x1f7   :  { %v1132_v60 = vmax.f32 %v1083_v0, 0.0  ;;  %v1133_v43 = vmax.f32 %v1084_v25, 0.0  ;;  %v1003_v46 = vmax.f32 %v1970_v50, %v868_v29  ;;  %v1004_v4 = vmax.f32 %v1973_v47, %v870_v53 }
 0x1f9   :  { %1182 = vst.msk [vmem:[%s2406_s3 + $0x118] sm:$0xff] %vm1146_vm3, %v1132_v60  ;;  %1183 = vst.msk [vmem:[%s2406_s3 + $0x120] sm:$0xff] %vm1146_vm3, %v1133_v43  ;;  %v1059_v61 = vadd.f32 %v2107_v21, %v1003_v46  ;;  %v1060_v1 = vadd.f32 %v2107_v21, %v1004_v4 }
 0x1fa   :  { %v920_v9 = vpop.permute.xlu0 %919  ;;  %v922_v57 = vpop.permute.xlu1 %921 }
 0x1fb   :  { %v1108_v8 = vmax.f32 %v1059_v61, 0.0  ;;  %v1109_v50 = vmax.f32 %v1060_v1, 0.0  ;;  %v1029_v47 = vmax.f32 %v1980_v51, %v920_v9  ;;  %v1030_v32 = vmax.f32 %v1983_v54, %v922_v57 }
 0x1fd   :  { %1158 = vst.msk [vmem:[%s2406_s3 + $0x58] sm:$0xff] %vm1146_vm3, %v1108_v8  ;;  %1159 = vst.msk [vmem:[%s2406_s3 + $0x60] sm:$0xff] %vm1146_vm3, %v1109_v50  ;;  %v1085_v33 = vadd.f32 %v2107_v21, %v1029_v47  ;;  %v1086_v5 = vadd.f32 %v2107_v21, %v1030_v32 }
 0x1fe   :  { %v872_v30 = vpop.permute.xlu0 %871  ;;  %v874_v16 = vpop.permute.xlu1 %873 }
 0x1ff   :  { %v1134_v24 = vmax.f32 %v1085_v33, 0.0  ;;  %v1135_v51 = vmax.f32 %v1086_v5, 0.0  ;;  %v1005_v54 = vmax.f32 %v1990_v58, %v872_v30  ;;  %v1006_v20 = vmax.f32 %v1993_v55, %v874_v16 }
 0x201   :  { %1184 = vst.msk [vmem:[%s2406_s3 + $0x128] sm:$0xff] %vm1146_vm3, %v1134_v24  ;;  %1185 = vst.msk [vmem:[%s2406_s3 + $0x130] sm:$0xff] %vm1146_vm3, %v1135_v51  ;;  %v1061_v40 = vadd.f32 %v2107_v21, %v1005_v54  ;;  %v1062_v48 = vadd.f32 %v2107_v21, %v1006_v20 }
 0x202   :  { %v924_v37 = vpop.permute.xlu0 %923  ;;  %v926_v41 = vpop.permute.xlu1 %925 }
 0x203   :  { %v1110_v49 = vmax.f32 %v1061_v40, 0.0  ;;  %v1111_v58 = vmax.f32 %v1062_v48, 0.0  ;;  %v1031_v55 = vmax.f32 %v2000_v59, %v924_v37  ;;  %v1032_v35 = vmax.f32 %v2003_v62, %v926_v41 }
 0x205   :  { %1160 = vst.msk [vmem:[%s2406_s3 + $0x68] sm:$0xff] %vm1146_vm3, %v1110_v49  ;;  %1161 = vst.msk [vmem:[%s2406_s3 + $0x70] sm:$0xff] %vm1146_vm3, %v1111_v58  ;;  %v1087_v38 = vadd.f32 %v2107_v21, %v1031_v55  ;;  %v1088_v44 = vadd.f32 %v2107_v21, %v1032_v35 }
 0x206   :  { %v876_v17 = vpop.permute.xlu0 %875  ;;  %v878_v34 = vpop.permute.xlu1 %877 }
 0x207   :  { %v1136_v52 = vmax.f32 %v1087_v38, 0.0  ;;  %v1137_v59 = vmax.f32 %v1088_v44, 0.0  ;;  %v1007_v62 = vmax.f32 %v2010_v2, %v876_v17  ;;  %v1008_v45 = vmax.f32 %v2013_v63, %v878_v34 }
 0x209   :  { %1186 = vst.msk [vmem:[%s2406_s3 + $0x138] sm:$0xff] %vm1146_vm3, %v1136_v52  ;;  %1187 = vst.msk [vmem:[%s2406_s3 + $0x140] sm:$0xff] %vm1146_vm3, %v1137_v59  ;;  %v1063_v13 = vadd.f32 %v2107_v21, %v1007_v62  ;;  %v1064_v42 = vadd.f32 %v2107_v21, %v1008_v45 }
 0x20a   :  { %v928_v39 = vpop.permute.xlu0 %927  ;;  %v930_v56 = vpop.permute.xlu1 %929 }
 0x20b   :  { %v1112_v0 = vmax.f32 %v1063_v13, 0.0  ;;  %v1113_v2 = vmax.f32 %v1064_v42, 0.0  ;;  %v1033_v63 = vmax.f32 %v2020_v3, %v928_v39  ;;  %v1034_v25 = vmax.f32 %v2023_v6, %v930_v56 }
 0x20d   :  { %1162 = vst.msk [vmem:[%s2406_s3 + $0x78] sm:$0xff] %vm1146_vm3, %v1112_v0  ;;  %1163 = vst.msk [vmem:[%s2406_s3 + $0x80] sm:$0xff] %vm1146_vm3, %v1113_v2  ;;  %v1089_v29 = vadd.f32 %v2107_v21, %v1033_v63  ;;  %v1090_v53 = vadd.f32 %v2107_v21, %v1034_v25 }
 0x20e   :  { %v880_v60 = vpop.permute.xlu0 %879  ;;  %v882_v43 = vpop.permute.xlu1 %881 }
 0x20f   :  { %v1138_v46 = vmax.f32 %v1089_v29, 0.0  ;;  %v1139_v3 = vmax.f32 %v1090_v53, 0.0  ;;  %v1009_v6 = vmax.f32 %v2030_v10, %v880_v60  ;;  %v1010_v4 = vmax.f32 %v2033_v7, %v882_v43 }
 0x211   :  { %1188 = vst.msk [vmem:[%s2406_s3 + $0x148] sm:$0xff] %vm1146_vm3, %v1138_v46  ;;  %1189 = vst.msk [vmem:[%s2406_s3 + $0x150] sm:$0xff] %vm1146_vm3, %v1139_v3  ;;  %v1065_v61 = vadd.f32 %v2107_v21, %v1009_v6  ;;  %v1066_v1 = vadd.f32 %v2107_v21, %v1010_v4 }
 0x212   :  { %v932_v9 = vpop.permute.xlu0 %931  ;;  %v934_v57 = vpop.permute.xlu1 %933 }
 0x213   :  { %v1114_v8 = vmax.f32 %v1065_v61, 0.0  ;;  %v1115_v10 = vmax.f32 %v1066_v1, 0.0  ;;  %v1035_v7 = vmax.f32 %v2040_v11, %v932_v9  ;;  %v1036_v50 = vmax.f32 %v2043_v14, %v934_v57 }
 0x215   :  { %1164 = vst.msk [vmem:[%s2406_s3 + $0x88] sm:$0xff] %vm1146_vm3, %v1114_v8  ;;  %1165 = vst.msk [vmem:[%s2406_s3 + $0x90] sm:$0xff] %vm1146_vm3, %v1115_v10  ;;  %v1091_v47 = vadd.f32 %v2107_v21, %v1035_v7  ;;  %v1092_v32 = vadd.f32 %v2107_v21, %v1036_v50 }
 0x216   :  { %v884_v33 = vpop.permute.xlu0 %883  ;;  %v886_v5 = vpop.permute.xlu1 %885 }
 0x217   :  { %v1140_v30 = vmax.f32 %v1091_v47, 0.0  ;;  %v1141_v11 = vmax.f32 %v1092_v32, 0.0  ;;  %v1011_v14 = vmax.f32 %v2050_v18, %v884_v33  ;;  %v1012_v16 = vmax.f32 %v2053_v15, %v886_v5 }
 0x219   :  { %1190 = vst.msk [vmem:[%s2406_s3 + $0x158] sm:$0xff] %vm1146_vm3, %v1140_v30  ;;  %1191 = vst.msk [vmem:[%s2406_s3 + $0x160] sm:$0xff] %vm1146_vm3, %v1141_v11  ;;  %v1067_v24 = vadd.f32 %v2107_v21, %v1011_v14  ;;  %v1068_v51 = vadd.f32 %v2107_v21, %v1012_v16 }
 0x21a   :  { %v936_v54 = vpop.permute.xlu0 %935  ;;  %v938_v20 = vpop.permute.xlu1 %937 }
 0x21b   :  { %v1116_v40 = vmax.f32 %v1067_v24, 0.0  ;;  %v1117_v18 = vmax.f32 %v1068_v51, 0.0  ;;  %v1037_v15 = vmax.f32 %v2060_v19, %v936_v54  ;;  %v1038_v48 = vmax.f32 %v2063_v22, %v938_v20 }
 0x21d   :  { %1166 = vst.msk [vmem:[%s2406_s3 + $0x98] sm:$0xff] %vm1146_vm3, %v1116_v40  ;;  %1167 = vst.msk [vmem:[%s2406_s3 + $0xa0] sm:$0xff] %vm1146_vm3, %v1117_v18  ;;  %v1093_v37 = vadd.f32 %v2107_v21, %v1037_v15  ;;  %v1094_v41 = vadd.f32 %v2107_v21, %v1038_v48 }
 0x21e   :  { %v888_v49 = vpop.permute.xlu0 %887  ;;  %v890_v58 = vpop.permute.xlu1 %889 }
 0x21f   :  { %v1142_v55 = vmax.f32 %v1093_v37, 0.0  ;;  %v1143_v19 = vmax.f32 %v1094_v41, 0.0  ;;  %v1013_v22 = vmax.f32 %v2070_v26, %v888_v49  ;;  %v1014_v35 = vmax.f32 %v2073_v23, %v890_v58 }
 0x221   :  { %1192 = vst.msk [vmem:[%s2406_s3 + $0x168] sm:$0xff] %vm1146_vm3, %v1142_v55  ;;  %1193 = vst.msk [vmem:[%s2406_s3 + $0x170] sm:$0xff] %vm1146_vm3, %v1143_v19  ;;  %v1069_v38 = vadd.f32 %v2107_v21, %v1013_v22  ;;  %v1070_v44 = vadd.f32 %v2107_v21, %v1014_v35 }
 0x222   :  { %v892_v17 = vpop.permute.xlu0 %891 }
 0x223   :  { %v1118_v34 = vmax.f32 %v1069_v38, 0.0  ;;  %v1119_v52 = vmax.f32 %v1070_v44, 0.0  ;;  %v1015_v26 = vmax.f32 %v2080_v27, %v892_v17 }
 0x225   :  { %1168 = vst.msk [vmem:[%s2406_s3 + $0xa8] sm:$0xff] %vm1146_vm3, %v1118_v34  ;;  %1169 = vst.msk [vmem:[%s2406_s3 + $0xb0] sm:$0xff] %vm1146_vm3, %v1119_v52  ;;  %v1071_v23 = vadd.f32 %v2107_v21, %v1015_v26 }
 0x226   :  { %v894_v59 = vpop.permute.xlu1 %893 }
 0x227   :  { %v1120_v62 = vmax.f32 %v1071_v23, 0.0  ;;  %v1016_v45 = vmax.f32 %v2085_v12, %v894_v59 }
 0x229   :  { %1170 = vst.msk [vmem:[%s2406_s3 + $0xb8] sm:$0xff] %vm1146_vm3, %v1120_v62  ;;  %v1072_v27 = vadd.f32 %v2107_v21, %v1016_v45 }
 0x22a   :  { %v896_v13 = vpop.permute.xlu0 %895  ;;  %v942_v42 = vpop.permute.xlu1 %941 }
 0x22b   :  { %v1121_v39 = vmax.f32 %v1072_v27, 0.0  ;;  %v1017_v56 = vmax.f32 %v2093_v31, %v896_v13  ;;  %v1040_v0 = vmax.f32 %v2090_v36, %v942_v42 }
 0x22d   :  { %1171 = vst.msk [vmem:[%s2406_s3 + $0xc0] sm:$0xff] %vm1146_vm3, %v1121_v39  ;;  %v1073_v12 = vadd.f32 %v2107_v21, %v1017_v56  ;;  %v1096_v2 = vadd.f32 %v2107_v21, %v1040_v0 }
 0x22e   :  { %v940_v63 = vpop.permute.xlu0 %939 }
 0x22f   :  { %v1122_v25 = vmax.f32 %v1073_v12, 0.0  ;;  %v1145_v29 = vmax.f32 %v1096_v2, 0.0  ;;  %v1039_v53 = vmax.f32 %v2100_v28, %v940_v63 }
 0x231   :  { %1172 = vst.msk [vmem:[%s2406_s3 + $0xc8] sm:$0xff] %vm1146_vm3, %v1122_v25  ;;  %1195 = vst.msk [vmem:[%s2406_s3 + $0x180] sm:$0xff] %vm1146_vm3, %v1145_v29  ;;  %v1095_v36 = vadd.f32 %v2107_v21, %v1039_v53 }
 0x233   :  { %v1144_v31 = vmax.f32 %v1095_v36, 0.0 }
 0x235   :  { %1194 = vst.msk [vmem:[%s2406_s3 + $0x178] sm:$0xff] %vm1146_vm3, %v1144_v31 }

// kernel: cnn_forward.4
= control target key start
LH: loop header
LB: loop body
LE: loop exit
PB: predicated region body
PF: predicated region fallthrough
CT: control target
= control target key end

     0   :  { %vm3002_vm0 = vmmov 0   ;;  %vm1341_vm1 = vcmask 523264   ;;  %s3004_s29 = smov 64   ;;  %vm2142_vm2 = vcmask 261120   ;;  %s3933_s1 = inlined_call_operand.vmem [shape: bf16[1600,128], index: 1, kind: input, shape index: {}]   ;;  %s3934_s0 = inlined_call_operand.vmem [shape: bf16[104,1600], index: 0, kind: input, shape index: {}]   ;;  %s3935_s2 = inlined_call_operand.vmem [shape: f32[1,32], index: 2, kind: input, shape index: {}]   ;;  %s3936_s3 = inlined_call_operand.vmem [shape: f32[104,32], index: 3, kind: output, shape index: {}]  }
   0x1   :  { %v2774_v0 = vld [vmem:[%s3933_s1 + $0x78] sm:$0xff]   ;;  %v2776_v2 = vld [vmem:[%s3933_s1 + $0x70] sm:$0xff]   ;;  %v2778_v4 = vld [vmem:[%s3933_s1 + $0x68] sm:$0xff]  }
   0x2   :  { %v2775_v1 = vld [vmem:[%s3933_s1 + $0x38] sm:$0xff]   ;;  %2754 = vmatprep.subr.bf16.mxu1 %v2774_v0  ;;  %2359 = vmatprep.subr.bf16.mxu0 %v2774_v0  ;;  %v2777_v3 = vld [vmem:[%s3933_s1 + $0x30] sm:$0xff]   ;;  %v2779_v5 = vld [vmem:[%s3933_s1 + $0x28] sm:$0xff]  }
   0x3   :  { %2762 = vmatpush3.bf16.msra.mxu1 %v2775_v1  ;;  %2360 = vmatpush3.bf16.msra.mxu0 %v2775_v1  ;;  %v2780_v6 = vld [vmem:[%s3933_s1 + $0x60] sm:$0xff]   ;;  %v2782_v8 = vld [vmem:[%s3933_s1 + $0x58] sm:$0xff]   ;;  %v2784_v10 = vld [vmem:[%s3933_s1 + $0x50] sm:$0xff]  }
   0x4   :  { %2755 = vmatprep.subr.bf16.mxu1 %v2776_v2  ;;  %2361 = vmatprep.subr.bf16.mxu0 %v2776_v2  ;;  %v2781_v7 = vld [vmem:[%s3933_s1 + $0x20] sm:$0xff]   ;;  %v2783_v9 = vld [vmem:[%s3933_s1 + $0x18] sm:$0xff]   ;;  %v2785_v13 = vld [vmem:[%s3933_s1 + $0x10] sm:$0xff]  }
   0x5   :  { %v2792_v11 = vld [vmem:[%s3934_s0 + $0x1a4] ss:$52 sps:$4 sm:$0xff]   ;;  %v2786_v14 = vld [vmem:[%s3933_s1 + $0x48] sm:$0xff]   ;;  %v2790_v18 = vld [vmem:[%s3934_s0 + $0x1a0] ss:$52 sps:$4 sm:$0xff]  }
   0x6   :  { %v2795_v12 = vld [vmem:[%s3934_s0 + $0x4] ss:$52 sps:$4 sm:$0xff]   ;;  %1427 = vmatprep.mubr.bf16.mxu1 %v2792_v11  ;;  %v2787_v15 = vld [vmem:[%s3933_s1 + $0x8] sm:$0xff]   ;;  %v2793_v19 = vld [vmem:[%s3934_s0] ss:$52 sps:$4 sm:$0xff]  }
   0x7   :  { %2763 = vmatpush3.bf16.msra.mxu1 %v2777_v3  ;;  %2362 = vmatpush3.bf16.msra.mxu0 %v2777_v3  ;;  %v2788_v16 = vld [vmem:[%s3933_s1 + $0x40] sm:$0xff]   ;;  %v2796_v20 = vld [vmem:[%s3933_s1 + $0xf8] sm:$0xff]   ;;  %v2800_v24 = vld [vmem:[%s3933_s1 + $0xf0] sm:$0xff]  }
   0x8   :  { %2756 = vmatprep.subr.bf16.mxu1 %v2778_v4  ;;  %2363 = vmatprep.subr.bf16.mxu0 %v2778_v4  ;;  %v2789_v17 = vld [vmem:[%s3933_s1] sm:$0xff]   ;;  %v2798_v21 = vld [vmem:[%s3933_s1 + $0x178] sm:$0xff]   ;;  %v2802_v25 = vld [vmem:[%s3933_s1 + $0x170] sm:$0xff]  }
   0x9   :  { %1395 = vmatprep.mubr.bf16.mxu0 %v2795_v12  ;;  %v2797_v22 = vld [vmem:[%s3933_s1 + $0xb8] sm:$0xff]   ;;  %v2804_v26 = vld [vmem:[%s3934_s0 + $0x6c] ss:$52 sps:$4 sm:$0xff]   ;;  %v2801_v27 = vld [vmem:[%s3933_s1 + $0xb0] sm:$0xff]  }
   0xa   :  { %v2799_v23 = vld [vmem:[%s3933_s1 + $0x138] sm:$0xff]   ;;  %v2810_v28 = vld [vmem:[%s3934_s0 + $0x20c] ss:$52 sps:$4 sm:$0xff]   ;;  %v2803_v29 = vld [vmem:[%s3933_s1 + $0x130] sm:$0xff]  }
   0xb   :  { %2764 = vmatpush3.bf16.msra.mxu1 %v2779_v5  ;;  %2364 = vmatpush3.bf16.msra.mxu0 %v2779_v5  ;;  %v2806_v30 = vld [vmem:[%s3933_s1 + $0xe8] sm:$0xff]   ;;  %v2814_v36 = vld [vmem:[%s3933_s1 + $0xe0] sm:$0xff]   ;;  %v99_v40 = vld [vmem:[%s3934_s0 + $0x270] sm:$0xff] }
   0xc   :  { %2757 = vmatprep.subr.bf16.mxu1 %v2780_v6  ;;  %2365 = vmatprep.subr.bf16.mxu0 %v2780_v6  ;;  %v2807_v31 = vld [vmem:[%s3934_s0 + $0x68] ss:$52 sps:$4 sm:$0xff]   ;;  %v2816_v37 = vld [vmem:[%s3933_s1 + $0x160] sm:$0xff]   ;;  %v2239_v42 = vcombine.high %v99_v40, %v99_v40  ;;  %v2238_v48 = vcombine.low %v99_v40, %v99_v40  ;;  %v2827_v49 = vld [vmem:[%s3933_s1 + $0xd0] sm:$0xff]  }
   0xd   :  { %v2809_v32 = vld [vmem:[%s3933_s1 + $0x168] sm:$0xff]   ;;  %v2815_v38 = vld [vmem:[%s3933_s1 + $0xa0] sm:$0xff]   ;;  %v2820_v43 = vld [vmem:[%s3933_s1 + $0xd8] sm:$0xff]  }
   0xe   :  { %v2808_v33 = vld [vmem:[%s3933_s1 + $0xa8] sm:$0xff]   ;;  %v2817_v41 = vld [vmem:[%s3933_s1 + $0x120] sm:$0xff]   ;;  %v2823_v45 = vld [vmem:[%s3933_s1 + $0x158] sm:$0xff]  }
   0xf   :  { %2765 = vmatpush3.bf16.msra.mxu1 %v2781_v7  ;;  %2366 = vmatpush3.bf16.msra.mxu0 %v2781_v7  ;;  %v2813_v34 = vld [vmem:[%s3934_s0 + $0x208] ss:$52 sps:$4 sm:$0xff]   ;;  %v2821_v44 = vld [vmem:[%s3934_s0 + $0xd0] ss:$52 sps:$4 sm:$0xff]   ;;  %v2834_v55 = vld [vmem:[%s3934_s0 + $0x138] ss:$52 sps:$4 sm:$0xff]  }
  0x10   :  { %2758 = vmatprep.subr.bf16.mxu1 %v2782_v8  ;;  %2367 = vmatprep.subr.bf16.mxu0 %v2782_v8  ;;  %v2812_v35 = vld [vmem:[%s3933_s1 + $0x128] sm:$0xff]   ;;  %v2822_v46 = vld [vmem:[%s3933_s1 + $0x98] sm:$0xff]   ;;  %v2829_v50 = vld [vmem:[%s3933_s1 + $0x150] sm:$0xff]  }
  0x11   :  { %v2818_v39 = vld [vmem:[%s3934_s0 + $0xd4] ss:$52 sps:$4 sm:$0xff]   ;;  %v2825_v47 = vld [vmem:[%s3933_s1 + $0x118] sm:$0xff]   ;;  %v2838_v59 = vld [vmem:[%s3933_s1 + $0xc0] sm:$0xff]  }
  0x12   :  { %v2828_v51 = vld [vmem:[%s3933_s1 + $0x90] sm:$0xff]   ;;  %v2833_v54 = vld [vmem:[%s3933_s1 + $0xc8] sm:$0xff]   ;;  %v2840_v60 = vld [vmem:[%s3933_s1 + $0x140] sm:$0xff]  }
  0x13   :  { %2766 = vmatpush3.bf16.msra.mxu1 %v2783_v9  ;;  %2368 = vmatpush3.bf16.msra.mxu0 %v2783_v9  ;;  %v2831_v52 = vld [vmem:[%s3934_s0 + $0x13c] ss:$52 sps:$4 sm:$0xff]   ;;  %v2836_v56 = vld [vmem:[%s3933_s1 + $0x148] sm:$0xff]   ;;  %v2839_v62 = vld [vmem:[%s3933_s1 + $0x80] sm:$0xff]  }
  0x14   :  { %2759 = vmatprep.subr.bf16.mxu1 %v2784_v10  ;;  %2369 = vmatprep.subr.bf16.mxu0 %v2784_v10  ;;  %v2830_v53 = vld [vmem:[%s3933_s1 + $0x110] sm:$0xff]   ;;  %v2835_v57 = vld [vmem:[%s3933_s1 + $0x88] sm:$0xff]   ;;  %v2841_v0 = vld [vmem:[%s3933_s1 + $0x100] sm:$0xff]  }
  0x15   :  { %v2837_v58 = vld [vmem:[%s3933_s1 + $0x108] sm:$0xff]   ;;  %v2845_v2 = vld [vmem:[%s3934_s0 + $0x10] ss:$52 sps:$4 sm:$0xff]   ;;  %v2848_v3 = vld [vmem:[%s3933_s1 + $0x1f8] sm:$0xff]  }
  0x16   :  { %v2844_v61 = vld [vmem:[%s3934_s0 + $0xc] ss:$52 sps:$4 sm:$0xff]   ;;  %v2847_v63 = vld [vmem:[%s3934_s0 + $0x14] ss:$52 sps:$4 sm:$0xff]   ;;  %v2849_v4 = vld [vmem:[%s3933_s1 + $0x1b8] sm:$0xff]  }
  0x17   :  { %2767 = vmatpush3.bf16.msra.mxu1 %v2785_v13  ;;  %2370 = vmatpush3.bf16.msra.mxu0 %v2785_v13  ;;  %v2842_v1 = vld [vmem:[%s3934_s0 + $0x8] ss:$52 sps:$4 sm:$0xff]   ;;  %v2853_v7 = vld [vmem:[%s3933_s1 + $0x1f0] sm:$0xff]   ;;  %v2859_v12 = vld [vmem:[%s3934_s0 + $0x78] ss:$52 sps:$4 sm:$0xff]  }
  0x18   :  { %2760 = vmatprep.subr.bf16.mxu1 %v2786_v14  ;;  %2371 = vmatprep.subr.bf16.mxu0 %v2786_v14  ;;  %v2850_v5 = vld [vmem:[%s3933_s1 + $0x278] sm:$0xff]   ;;  %v2851_v6 = vld [vmem:[%s3934_s0 + $0x74] ss:$52 sps:$4 sm:$0xff]   ;;  %v2855_v11 = vld [vmem:[%s3934_s0 + $0x70] ss:$52 sps:$4 sm:$0xff]  }
  0x19   :  { %v2854_v8 = vld [vmem:[%s3933_s1 + $0x238] sm:$0xff]   ;;  %v2858_v10 = vld [vmem:[%s3933_s1 + $0x1b0] sm:$0xff]   ;;  %v2861_v14 = vld [vmem:[%s3933_s1 + $0x1e8] sm:$0xff]  }
  0x1a   :  { %v2856_v9 = vld [vmem:[%s3934_s0 + $0x7c] ss:$52 sps:$4 sm:$0xff]  }
  0x1b   :  { %2768 = vmatpush3.bf16.msra.mxu1 %v2787_v15  ;;  %2372 = vmatpush3.bf16.msra.mxu0 %v2787_v15  ;;  %v2860_v13 = vld [vmem:[%s3933_s1 + $0x270] sm:$0xff]  }
  0x1c   :  { %2761 = vmatprep.subr.bf16.mxu1 %v2788_v16  ;;  %2373 = vmatprep.subr.bf16.mxu0 %v2788_v16  ;;  %v2862_v15 = vld [vmem:[%s3933_s1 + $0x230] sm:$0xff]  }
  0x1d   :  { %v2863_v16 = vld [vmem:[%s3934_s0 + $0xdc] ss:$52 sps:$4 sm:$0xff]  }
  0x1e   :  { %v2889_v40 = vld [vmem:[%s3934_s0 + $0x1b0] ss:$52 sps:$4 sm:$0xff]  }
  0x1f   :  { %2769 = vmatpush3.bf16.msra.mxu1 %v2789_v17  ;;  %2374 = vmatpush3.bf16.msra.mxu0 %v2789_v17  ;;  %v2865_v17 = vld [vmem:[%s3933_s1 + $0x1a8] sm:$0xff]  }
  0x20   :  { %2417 = vmatprep.subr.bf16.mxu1 %v2796_v20  ;;  %2475 = vmatprep.subr.bf16.mxu0 %v2798_v21  ;;  %v2866_v20 = vld [vmem:[%s3934_s0 + $0xd8] ss:$52 sps:$4 sm:$0xff]   ;;  %v2869_v21 = vld [vmem:[%s3934_s0 + $0xe0] ss:$52 sps:$4 sm:$0xff]  }
  0x22   :  { %1428 = vmatmul.mubr.bf16.vlgmr.msra.gmra.mxu1 %v2790_v18  ;;  %1396 = vmatmul.mubr.bf16.vlgmr.msra.gmra.mxu0 %v2793_v19  ;;  %v2867_v18 = vld [vmem:[%s3934_s0 + $0xe4] ss:$52 sps:$4 sm:$0xff]   ;;  %v2870_v19 = vld [vmem:[%s3933_s1 + $0x268] sm:$0xff]  }
  0x23   :  { %2418 = vmatpush3.bf16.msra.mxu1 %v2797_v22  ;;  %2476 = vmatpush3.bf16.msra.mxu0 %v2799_v23  ;;  %v2871_v22 = vld [vmem:[%s3933_s1 + $0x1e0] sm:$0xff]   ;;  %v2872_v23 = vld [vmem:[%s3933_s1 + $0x228] sm:$0xff]  }
  0x24   :  { %2419 = vmatprep.subr.bf16.mxu1 %v2800_v24  ;;  %2477 = vmatprep.subr.bf16.mxu0 %v2802_v25  ;;  %v2873_v24 = vld [vmem:[%s3933_s1 + $0x1a0] sm:$0xff]  }
  0x25   :  { %1403 = vmatprep.mubr.bf16.mxu0 %v2804_v26  ;;  %1435 = vmatprep.mubr.bf16.mxu1 %v2810_v28  ;;  %v2874_v25 = vld [vmem:[%s3934_s0 + $0x144] ss:$52 sps:$4 sm:$0xff]   ;;  %v2877_v26 = vld [vmem:[%s3934_s0 + $0x14c] ss:$52 sps:$4 sm:$0xff]  }
  0x26   :  { %v2881_v28 = vld [vmem:[%s3933_s1 + $0x1d8] sm:$0xff]  }
  0x27   :  { %2420 = vmatpush3.bf16.msra.mxu1 %v2801_v27  ;;  %2478 = vmatpush3.bf16.msra.mxu0 %v2803_v29  ;;  %v2880_v27 = vld [vmem:[%s3933_s1 + $0x260] sm:$0xff]  }
  0x28   :  { %2421 = vmatprep.subr.bf16.mxu1 %v2806_v30  ;;  %2479 = vmatprep.subr.bf16.mxu0 %v2809_v32  ;;  %v2882_v29 = vld [vmem:[%s3933_s1 + $0x220] sm:$0xff]   ;;  %v2883_v30 = vld [vmem:[%s3933_s1 + $0x198] sm:$0xff]  }
  0x29   :  { %v2879_v32 = vld [vmem:[%s3934_s0 + $0x148] ss:$52 sps:$4 sm:$0xff]  }
  0x2a   :  { %1404 = vmatmul.mubr.bf16.gmra.mxu0 %v2807_v31  ;;  %1436 = vmatmul.mubr.bf16.gmra.mxu1 %v2813_v34  ;;  %v2876_v31 = vld [vmem:[%s3934_s0 + $0x140] ss:$52 sps:$4 sm:$0xff]  }
  0x2b   :  { %2422 = vmatpush3.bf16.msra.mxu1 %v2808_v33  ;;  %2480 = vmatpush3.bf16.msra.mxu0 %v2812_v35  ;;  %v2884_v33 = vld [vmem:[%s3934_s0 + $0x1ac] ss:$52 sps:$4 sm:$0xff]   ;;  %v2887_v34 = vld [vmem:[%s3934_s0 + $0x1b4] ss:$52 sps:$4 sm:$0xff]   ;;  %v2890_v35 = vld [vmem:[%s3933_s1 + $0x258] sm:$0xff]  }
  0x2c   :  { %2423 = vmatprep.subr.bf16.mxu1 %v2814_v36  ;;  %2481 = vmatprep.subr.bf16.mxu0 %v2816_v37  ;;  %v2891_v36 = vld [vmem:[%s3933_s1 + $0x1d0] sm:$0xff]   ;;  %v2892_v37 = vld [vmem:[%s3933_s1 + $0x218] sm:$0xff]  }
  0x2d   :  { %1411 = vmatprep.mubr.bf16.mxu0 %v2818_v39  ;;  %1443 = vmatprep.mubr.bf16.mxu1 %v2239_v42  ;;  %v2886_v39 = vld [vmem:[%s3934_s0 + $0x1a8] ss:$52 sps:$4 sm:$0xff]  }
  0x2e   :  { %v2897_v42 = vld [vmem:[%s3934_s0 + $0x21c] ss:$52 sps:$4 sm:$0xff]  }
  0x2f   :  { %2424 = vmatpush3.bf16.msra.mxu1 %v2815_v38  ;;  %2482 = vmatpush3.bf16.msra.mxu0 %v2817_v41  ;;  %v2893_v38 = vld [vmem:[%s3933_s1 + $0x190] sm:$0xff]  }
  0x30   :  { %2425 = vmatprep.subr.bf16.mxu1 %v2820_v43  ;;  %2483 = vmatprep.subr.bf16.mxu0 %v2823_v45  ;;  %v2894_v41 = vld [vmem:[%s3934_s0 + $0x214] ss:$52 sps:$4 sm:$0xff]  }
  0x31   :  { %v2900_v43 = vld [vmem:[%s3933_s1 + $0x250] sm:$0xff]  }
  0x32   :  { %1412 = vmatmul.mubr.bf16.gmra.mxu0 %v2821_v44  ;;  %1444 = vmatmul.mubr.bf16.gmra.mxu1 %v2238_v48  ;;  %v2901_v44 = vld [vmem:[%s3933_s1 + $0x1c8] sm:$0xff]   ;;  %v2902_v45 = vld [vmem:[%s3933_s1 + $0x210] sm:$0xff]   ;;  %v101_v48 = vld [vmem:[%s3934_s0 + $0x280] sm:$0xff] }
  0x33   :  { %2426 = vmatpush3.bf16.msra.mxu1 %v2822_v46  ;;  %2484 = vmatpush3.bf16.msra.mxu0 %v2825_v47  ;;  %v2903_v46 = vld [vmem:[%s3933_s1 + $0x188] sm:$0xff]   ;;  %v100_v47 = vld [vmem:[%s3934_s0 + $0x278] sm:$0xff] }
  0x34   :  { %2427 = vmatprep.subr.bf16.mxu1 %v2827_v49  ;;  %2485 = vmatprep.subr.bf16.mxu0 %v2829_v50  ;;  %v2907_v49 = vld [vmem:[%s3933_s1 + $0x248] sm:$0xff]   ;;  %v2896_v50 = vld [vmem:[%s3934_s0 + $0x210] ss:$52 sps:$4 sm:$0xff]  }
  0x35   :  { %1419 = vmatprep.mubr.bf16.mxu0 %v2831_v52  ;;  %1483 = vmatprep.mubr.bf16.mxu1 %v2844_v61  ;;  %v2909_v52 = vld [vmem:[%s3933_s1 + $0x1c0] sm:$0xff]   ;;  %v2240_v61 = vcombine.low %v100_v47, %v100_v47 }
  0x37   :  { %2428 = vmatpush3.bf16.msra.mxu1 %v2828_v51  ;;  %2486 = vmatpush3.bf16.msra.mxu0 %v2830_v53  ;;  %v2899_v51 = vld [vmem:[%s3934_s0 + $0x218] ss:$52 sps:$4 sm:$0xff]  }
  0x38   :  { %2429 = vmatprep.subr.bf16.mxu1 %v2833_v54  ;;  %2487 = vmatprep.subr.bf16.mxu0 %v2836_v56  ;;  %v2910_v53 = vld [vmem:[%s3933_s1 + $0x208] sm:$0xff]   ;;  %v2911_v54 = vld [vmem:[%s3933_s1 + $0x180] sm:$0xff]   ;;  %v2243_v56 = vcombine.high %v101_v48, %v101_v48 }
  0x3a   :  { %1420 = vmatmul.mubr.bf16.gmra.mxu0 %v2834_v55  ;;  %v2241_v55 = vcombine.high %v100_v47, %v100_v47 }
  0x3b   :  { %2430 = vmatpush3.bf16.msra.mxu1 %v2835_v57  ;;  %2488 = vmatpush3.bf16.msra.mxu0 %v2837_v58  ;;  %v2912_v57 = vld [vmem:[%s3933_s1 + $0x240] sm:$0xff]  }
  0x3c   :  { %2431 = vmatprep.subr.bf16.mxu1 %v2838_v59  ;;  %2489 = vmatprep.subr.bf16.mxu0 %v2840_v60  ;;  %v2913_v58 = vld [vmem:[%s3933_s1 + $0x200] sm:$0xff]   ;;  %v2920_v59 = vld [vmem:[%s3933_s1 + $0x2f8] sm:$0xff]   ;;  %v3001_v60 = vmov 0.0  }
  0x3d   :  { %1571 = vmatprep.mubr.bf16.mxu0 %v2847_v63  ;;  %v2916_v63 = vld [vmem:[%s3934_s0 + $0x1c] ss:$52 sps:$4 sm:$0xff]  }
  0x3f   :  { %2432 = vmatpush3.bf16.msra.mxu1 %v2839_v62  ;;  %2490 = vmatpush3.bf16.msra.mxu0 %v2841_v0  ;;  %v2242_v62 = vcombine.low %v101_v48, %v101_v48  ;;  %v2919_v0 = vld [vmem:[%s3934_s0 + $0x24] ss:$52 sps:$4 sm:$0xff]   ;;  %v2976_v48 = vld [vmem:[%s3934_s0 + $0x2c] ss:$52 sps:$4 sm:$0xff]  }
  0x40   :  { %2533 = vmatprep.subr.bf16.mxu1 %v2848_v3  ;;  %2591 = vmatprep.subr.bf16.mxu0 %v2850_v5  ;;  %v2921_v3 = vld [vmem:[%s3933_s1 + $0x2b8] sm:$0xff]   ;;  %v2924_v5 = vld [vmem:[%s3933_s1 + $0x2f0] sm:$0xff]  }
  0x42   :  { %1484 = vmatmul.mubr.bf16.vlgmr.msra.gmra.mxu1 %v2842_v1  ;;  %1572 = vmatmul.mubr.bf16.vlgmr.msra.gmra.mxu0 %v2845_v2  ;;  %v2914_v1 = vld [vmem:[%s3934_s0 + $0x18] ss:$52 sps:$4 sm:$0xff]   ;;  %v2917_v2 = vld [vmem:[%s3934_s0 + $0x20] ss:$52 sps:$4 sm:$0xff]  }
  0x43   :  { %2534 = vmatpush3.bf16.msra.mxu1 %v2849_v4  ;;  %1491 = vmatprep.mubr.bf16.mxu1 %v2851_v6  ;;  %v2922_v4 = vld [vmem:[%s3934_s0 + $0x84] ss:$52 sps:$4 sm:$0xff]  }
  0x44   :  { %2535 = vmatprep.subr.bf16.mxu1 %v2853_v7  ;;  %2592 = vmatpush3.bf16.msra.mxu0 %v2854_v8  ;;  %v2925_v6 = vld [vmem:[%s3933_s1 + $0x318] sm:$0xff]   ;;  %v2927_v7 = vld [vmem:[%s3934_s0 + $0x8c] ss:$52 sps:$4 sm:$0xff]   ;;  %v2929_v8 = vld [vmem:[%s3933_s1 + $0x2b0] sm:$0xff]  }
  0x45   :  { %1579 = vmatprep.mubr.bf16.mxu0 %v2856_v9  ;;  %2593 = vmatprep.subr.bf16.mxu0 %v2860_v13  ;;  %v2931_v9 = vld [vmem:[%s3933_s1 + $0x2e8] sm:$0xff]  }
  0x46   :  { %v2932_v13 = vld [vmem:[%s3934_s0 + $0xec] ss:$52 sps:$4 sm:$0xff]  }
  0x47   :  { %2536 = vmatpush3.bf16.msra.mxu1 %v2858_v10  ;;  %v2940_v10 = vld [vmem:[%s3933_s1 + $0x310] sm:$0xff]  }
  0x48   :  { %2537 = vmatprep.subr.bf16.mxu1 %v2861_v14  ;;  %2594 = vmatpush3.bf16.msra.mxu0 %v2862_v15  ;;  %v2934_v14 = vld [vmem:[%s3933_s1 + $0x2a8] sm:$0xff]  }
  0x49   :  { %2595 = vmatprep.subr.bf16.mxu0 %v2870_v19  ;;  %v2936_v15 = vld [vmem:[%s3934_s0 + $0xf4] ss:$52 sps:$4 sm:$0xff]  }
  0x4a   :  { %1492 = vmatmul.mubr.bf16.gmra.mxu1 %v2855_v11  ;;  %1580 = vmatmul.mubr.bf16.gmra.mxu0 %v2859_v12  ;;  %v2926_v11 = vld [vmem:[%s3934_s0 + $0x80] ss:$52 sps:$4 sm:$0xff]   ;;  %v2930_v12 = vld [vmem:[%s3934_s0 + $0x88] ss:$52 sps:$4 sm:$0xff]  }
  0x4b   :  { %1499 = vmatprep.mubr.bf16.mxu1 %v2863_v16  ;;  %2538 = vmatpush3.bf16.msra.mxu1 %v2865_v17  ;;  %v2939_v16 = vld [vmem:[%s3933_s1 + $0x2e0] sm:$0xff]   ;;  %v2957_v19 = vld [vmem:[%s3933_s1 + $0x308] sm:$0xff]  }
  0x4c   :  { %1587 = vmatprep.mubr.bf16.mxu0 %v2867_v18  ;;  %2539 = vmatprep.subr.bf16.mxu1 %v2871_v22  ;;  %v2941_v17 = vld [vmem:[%s3933_s1 + $0x2a0] sm:$0xff]   ;;  %v2948_v18 = vld [vmem:[%s3933_s1 + $0x2d8] sm:$0xff]   ;;  %v2942_v22 = vld [vmem:[%s3934_s0 + $0x154] ss:$52 sps:$4 sm:$0xff]  }
  0x4d   :  { %2596 = vmatpush3.bf16.msra.mxu0 %v2872_v23  ;;  %v2945_v23 = vld [vmem:[%s3934_s0 + $0x15c] ss:$52 sps:$4 sm:$0xff]  }
  0x4e   :  { %2597 = vmatprep.subr.bf16.mxu0 %v2880_v27  ;;  %v2944_v27 = vld [vmem:[%s3934_s0 + $0x150] ss:$52 sps:$4 sm:$0xff]  }
  0x4f   :  { %2540 = vmatpush3.bf16.msra.mxu1 %v2873_v24  ;;  %v2949_v24 = vld [vmem:[%s3933_s1 + $0x298] sm:$0xff]  }
  0x50   :  { %2541 = vmatprep.subr.bf16.mxu1 %v2881_v28  ;;  %v2972_v28 = vld [vmem:[%s3933_s1 + $0x300] sm:$0xff]  }
  0x51   :  { %2598 = vmatpush3.bf16.msra.mxu0 %v2882_v29  ;;  %v2965_v29 = vld [vmem:[%s3933_s1 + $0x2c8] sm:$0xff]  }
  0x52   :  { %1500 = vmatmul.mubr.bf16.gmra.mxu1 %v2866_v20  ;;  %1588 = vmatmul.mubr.bf16.gmra.mxu0 %v2869_v21  ;;  %v2935_v20 = vld [vmem:[%s3934_s0 + $0xe8] ss:$52 sps:$4 sm:$0xff]   ;;  %v2938_v21 = vld [vmem:[%s3934_s0 + $0xf0] ss:$52 sps:$4 sm:$0xff]  }
  0x53   :  { %1507 = vmatprep.mubr.bf16.mxu1 %v2874_v25  ;;  %1595 = vmatprep.mubr.bf16.mxu0 %v2877_v26  ;;  %v2956_v25 = vld [vmem:[%s3933_s1 + $0x2d0] sm:$0xff]  }
  0x54   :  { %2542 = vmatpush3.bf16.msra.mxu1 %v2883_v30  ;;  %2599 = vmatprep.subr.bf16.mxu0 %v2890_v35  ;;  %v2958_v26 = vld [vmem:[%s3933_s1 + $0x290] sm:$0xff]   ;;  %v2947_v30 = vld [vmem:[%s3934_s0 + $0x158] ss:$52 sps:$4 sm:$0xff]   ;;  %v2973_v35 = vld [vmem:[%s3933_s1 + $0x280] sm:$0xff]  }
  0x55   :  { %2543 = vmatprep.subr.bf16.mxu1 %v2891_v36  ;;  %2600 = vmatpush3.bf16.msra.mxu0 %v2892_v37  ;;  %v2952_v36 = vld [vmem:[%s3934_s0 + $0x1b8] ss:$52 sps:$4 sm:$0xff]   ;;  %v2955_v37 = vld [vmem:[%s3934_s0 + $0x1c0] ss:$52 sps:$4 sm:$0xff]  }
  0x56   :  { %2601 = vmatprep.subr.bf16.mxu0 %v2900_v43  ;;  %v2964_v43 = vld [vmem:[%s3934_s0 + $0x228] ss:$52 sps:$4 sm:$0xff]  }
  0x58   :  { %2544 = vmatpush3.bf16.msra.mxu1 %v2893_v38  ;;  %v2959_v38 = vld [vmem:[%s3934_s0 + $0x224] ss:$52 sps:$4 sm:$0xff]  }
  0x59   :  { %2545 = vmatprep.subr.bf16.mxu1 %v2901_v44  ;;  %2602 = vmatpush3.bf16.msra.mxu0 %v2902_v45 }
  0x5a   :  { %1508 = vmatmul.mubr.bf16.gmra.mxu1 %v2876_v31  ;;  %1596 = vmatmul.mubr.bf16.gmra.mxu0 %v2879_v32  ;;  %v2950_v31 = vld [vmem:[%s3934_s0 + $0x1bc] ss:$52 sps:$4 sm:$0xff]   ;;  %v2953_v32 = vld [vmem:[%s3934_s0 + $0x1c4] ss:$52 sps:$4 sm:$0xff]  }
  0x5b   :  { %1515 = vmatprep.mubr.bf16.mxu1 %v2884_v33  ;;  %1603 = vmatprep.mubr.bf16.mxu0 %v2887_v34  ;;  %v2966_v33 = vld [vmem:[%s3933_s1 + $0x288] sm:$0xff]   ;;  %v2971_v34 = vld [vmem:[%s3933_s1 + $0x2c0] sm:$0xff]  }
  0x5c   :  { %2546 = vmatpush3.bf16.msra.mxu1 %v2903_v46  ;;  %2603 = vmatprep.subr.bf16.mxu0 %v2907_v49  ;;  %v2974_v49 = vld [vmem:[%s3934_s0 + $0x28] ss:$52 sps:$4 sm:$0xff]  }
  0x5d   :  { %2547 = vmatprep.subr.bf16.mxu1 %v2909_v52  ;;  %2604 = vmatpush3.bf16.msra.mxu0 %v2910_v53  ;;  %v2980_v52 = vld [vmem:[%s3934_s0 + $0x90] ss:$52 sps:$4 sm:$0xff]   ;;  %v2981_v53 = vld [vmem:[%s3934_s0 + $0x98] ss:$52 sps:$4 sm:$0xff]  }
  0x5e   :  { %2605 = vmatprep.subr.bf16.mxu0 %v2912_v57  ;;  %v2986_v57 = vld [vmem:[%s3934_s0 + $0x164] ss:$52 sps:$4 sm:$0xff]  }
  0x60   :  { %2548 = vmatpush3.bf16.msra.mxu1 %v2911_v54  ;;  %v2982_v54 = vld [vmem:[%s3934_s0 + $0xfc] ss:$52 sps:$4 sm:$0xff]  }
  0x61   :  { %2606 = vmatpush3.bf16.msra.mxu0 %v2913_v58  ;;  %2649 = vmatprep.subr.bf16.mxu1 %v2920_v59  ;;  %v2988_v58 = vld [vmem:[%s3934_s0 + $0x160] ss:$52 sps:$4 sm:$0xff]   ;;  %v2989_v59 = vld [vmem:[%s3934_s0 + $0x168] ss:$52 sps:$4 sm:$0xff]  }
  0x62   :  { %1516 = vmatmul.mubr.bf16.gmra.mxu1 %v2886_v39  ;;  %1604 = vmatmul.mubr.bf16.gmra.mxu0 %v2889_v40  ;;  %v2962_v39 = vld [vmem:[%s3934_s0 + $0x22c] ss:$52 sps:$4 sm:$0xff]  }
  0x63   :  { %1523 = vmatprep.mubr.bf16.mxu1 %v2894_v41  ;;  %1611 = vmatprep.mubr.bf16.mxu0 %v2897_v42  ;;  %v102_v40 = vld [vmem:[%s3934_s0 + $0x288] sm:$0xff]  ;;  %v103_v41 = vld [vmem:[%s3934_s0 + $0x290] sm:$0xff] }
  0x64   :  { %2718 = vmatprep.subr.bf16.mxu0 %v3001_v60  ;;  %v2961_v42 = vld [vmem:[%s3934_s0 + $0x220] ss:$52 sps:$4 sm:$0xff]   ;;  %v2245_v44 = vcombine.high %v102_v40, %v102_v40  ;;  %v2247_v45 = vcombine.high %v103_v41, %v103_v41  ;;  %v2244_v46 = vcombine.low %v102_v40, %v102_v40  ;;  %v2246_v47 = vcombine.low %v103_v41, %v103_v41 }
  0x6a   :  { %1524 = vmatmul.mubr.bf16.gmra.mxu1 %v2896_v50  ;;  %1612 = vmatmul.mubr.bf16.gmra.mxu0 %v2899_v51  ;;  %v2977_v50 = vld [vmem:[%s3934_s0 + $0x30] ss:$52 sps:$4 sm:$0xff]   ;;  %v2978_v51 = vld [vmem:[%s3934_s0 + $0x94] ss:$52 sps:$4 sm:$0xff]  }
  0x6b   :  { %1531 = vmatprep.mubr.bf16.mxu1 %v2241_v55  ;;  %1619 = vmatprep.mubr.bf16.mxu0 %v2243_v56  ;;  %v2984_v55 = vld [vmem:[%s3934_s0 + $0xf8] ss:$52 sps:$4 sm:$0xff]   ;;  %v2985_v56 = vld [vmem:[%s3934_s0 + $0x100] ss:$52 sps:$4 sm:$0xff]  }
  0x72   :  { %1532 = vmatmul.mubr.bf16.gmra.mxu1 %v2240_v61  ;;  %1620 = vmatmul.mubr.bf16.gmra.mxu0 %v2242_v62  ;;  %v2990_v61 = vld [vmem:[%s3934_s0 + $0x1cc] ss:$52 sps:$4 sm:$0xff]   ;;  %v2992_v62 = vld [vmem:[%s3934_s0 + $0x1c8] ss:$52 sps:$4 sm:$0xff]  }
  0x73   :  { %1659 = vmatprep.mubr.bf16.mxu1 %v2916_v63  ;;  %1747 = vmatprep.mubr.bf16.mxu0 %v2919_v0  ;;  %v2993_v63 = vld [vmem:[%s3934_s0 + $0x1d0] ss:$52 sps:$4 sm:$0xff]   ;;  %v2994_v0 = vld [vmem:[%s3934_s0 + $0x234] ss:$52 sps:$4 sm:$0xff]  }
  0x7a   :  { %1660 = vmatmul.mubr.bf16.vlgmr.msra.gmra.mxu1 %v2914_v1  ;;  %1748 = vmatmul.mubr.bf16.vlgmr.msra.gmra.mxu0 %v2917_v2  ;;  %v104_v1 = vld [vmem:[%s3934_s0 + $0x298] sm:$0xff]  ;;  %v2996_v2 = vld [vmem:[%s3934_s0 + $0x230] ss:$52 sps:$4 sm:$0xff]  }
  0x7b   :  { %2650 = vmatpush3.bf16.msra.mxu1 %v2921_v3  ;;  %1667 = vmatprep.mubr.bf16.mxu1 %v2922_v4  ;;  %v2997_v3 = vld [vmem:[%s3934_s0 + $0x238] ss:$52 sps:$4 sm:$0xff]   ;;  %v2249_v4 = vcombine.high %v104_v1, %v104_v1 }
  0x7c   :  { %2651 = vmatprep.subr.bf16.mxu1 %v2924_v5  ;;  %2719 = vmatpush3.bf16.msra.mxu0 %v2925_v6  ;;  %v2248_v5 = vcombine.low %v104_v1, %v104_v1  ;;  %v3000_v6 = vld [vmem:[%s3934_s0 + $0x2a0] ss:$0 sps:$4 sm:$0xff]   ;;  %s3003_s0 = smov 96  }
  0x7d   :  { %1755 = vmatprep.mubr.bf16.mxu0 %v2927_v7  ;;  %2720 = vmatprep.subr.bf16.mxu0 %v3001_v60 }
  0x7f   :  { %2652 = vmatpush3.bf16.msra.mxu1 %v2929_v8 }
  0x80   :  { %2653 = vmatprep.subr.bf16.mxu1 %v2931_v9  ;;  %2721 = vmatpush3.bf16.msra.mxu0 %v2940_v10 }
  0x81   :  { %2722 = vmatprep.subr.bf16.mxu0 %v3001_v60 }
  0x82   :  { %1668 = vmatmul.mubr.bf16.gmra.mxu1 %v2926_v11  ;;  %1756 = vmatmul.mubr.bf16.gmra.mxu0 %v2930_v12 }
  0x83   :  { %1675 = vmatprep.mubr.bf16.mxu1 %v2932_v13  ;;  %2654 = vmatpush3.bf16.msra.mxu1 %v2934_v14 }
  0x84   :  { %1763 = vmatprep.mubr.bf16.mxu0 %v2936_v15  ;;  %2655 = vmatprep.subr.bf16.mxu1 %v2939_v16 }
  0x85   :  { %2723 = vmatpush3.bf16.msra.mxu0 %v2957_v19 }
  0x86   :  { %2724 = vmatprep.subr.bf16.mxu0 %v3001_v60 }
  0x87   :  { %2656 = vmatpush3.bf16.msra.mxu1 %v2941_v17 }
  0x88   :  { %2657 = vmatprep.subr.bf16.mxu1 %v2948_v18 }
  0x89   :  { %2725 = vmatpush3.bf16.msra.mxu0 %v2972_v28 }
  0x8a   :  { %1676 = vmatmul.mubr.bf16.gmra.mxu1 %v2935_v20  ;;  %1764 = vmatmul.mubr.bf16.gmra.mxu0 %v2938_v21 }
  0x8b   :  { %1683 = vmatprep.mubr.bf16.mxu1 %v2942_v22  ;;  %1771 = vmatprep.mubr.bf16.mxu0 %v2945_v23 }
  0x8c   :  { %2658 = vmatpush3.bf16.msra.mxu1 %v2949_v24 }
  0x8d   :  { %2659 = vmatprep.subr.bf16.mxu1 %v2956_v25 }
  0x90   :  { %2660 = vmatpush3.bf16.msra.mxu1 %v2958_v26 }
  0x91   :  { %2661 = vmatprep.subr.bf16.mxu1 %v2965_v29 }
  0x92   :  { %1684 = vmatmul.mubr.bf16.gmra.mxu1 %v2944_v27  ;;  %1772 = vmatmul.mubr.bf16.gmra.mxu0 %v2947_v30 }
  0x93   :  { %1691 = vmatprep.mubr.bf16.mxu1 %v2950_v31  ;;  %1779 = vmatprep.mubr.bf16.mxu0 %v2953_v32 }
  0x94   :  { %2662 = vmatpush3.bf16.msra.mxu1 %v2966_v33 }
  0x95   :  { %2663 = vmatprep.subr.bf16.mxu1 %v2971_v34 }
  0x98   :  { %2664 = vmatpush3.bf16.msra.mxu1 %v2973_v35 }
  0x9a   :  { %1692 = vmatmul.mubr.bf16.gmra.mxu1 %v2952_v36  ;;  %1780 = vmatmul.mubr.bf16.gmra.mxu0 %v2955_v37 }
  0x9b   :  { %1699 = vmatprep.mubr.bf16.mxu1 %v2959_v38  ;;  %1787 = vmatprep.mubr.bf16.mxu0 %v2962_v39 }
  0xa2   :  { %1700 = vmatmul.mubr.bf16.gmra.mxu1 %v2961_v42  ;;  %1788 = vmatmul.mubr.bf16.gmra.mxu0 %v2964_v43 }
  0xa3   :  { %1707 = vmatprep.mubr.bf16.mxu1 %v2245_v44  ;;  %1795 = vmatprep.mubr.bf16.mxu0 %v2247_v45 }
  0xaa   :  { %1708 = vmatmul.mubr.bf16.gmra.mxu1 %v2244_v46  ;;  %1796 = vmatmul.mubr.bf16.gmra.mxu0 %v2246_v47 }
  0xab   :  { %1835 = vmatprep.mubr.bf16.mxu1 %v2976_v48  ;;  %2726 = vmatprep.mubr.msk.bf16.mxu0 %vm3002_vm0, %v3001_v60 }
  0xb2   :  { %1836 = vmatmul.mubr.bf16.vlgmr.msra.gmra.mxu1 %v2974_v49  ;;  %2727 = vmatmul.mubr.msk.bf16.vlgmr.msra.gmra.mxu0 %vm1341_vm1, %v2977_v50 }
  0xb3   :  { %1843 = vmatprep.mubr.bf16.mxu1 %v2978_v51  ;;  %2730 = vmatprep.mubr.msk.bf16.mxu0 %vm3002_vm0, %v3001_v60 }
  0xba   :  { %1844 = vmatmul.mubr.bf16.gmra.mxu1 %v2980_v52  ;;  %2731 = vmatmul.mubr.msk.bf16.gmra.mxu0 %vm1341_vm1, %v2981_v53 }
  0xbb   :  { %1851 = vmatprep.mubr.bf16.mxu1 %v2982_v54  ;;  %2734 = vmatprep.mubr.msk.bf16.mxu0 %vm3002_vm0, %v3001_v60 }
  0xc2   :  { %1852 = vmatmul.mubr.bf16.gmra.mxu1 %v2984_v55  ;;  %2735 = vmatmul.mubr.msk.bf16.gmra.mxu0 %vm1341_vm1, %v2985_v56 }
  0xc3   :  { %1859 = vmatprep.mubr.bf16.mxu1 %v2986_v57  ;;  %2738 = vmatprep.mubr.msk.bf16.mxu0 %vm3002_vm0, %v3001_v60 }
  0xca   :  { %1860 = vmatmul.mubr.bf16.gmra.mxu1 %v2988_v58  ;;  %2739 = vmatmul.mubr.msk.bf16.gmra.mxu0 %vm1341_vm1, %v2989_v59 }
  0xcb   :  { %1867 = vmatprep.mubr.bf16.mxu1 %v2990_v61  ;;  %2742 = vmatprep.mubr.msk.bf16.mxu0 %vm3002_vm0, %v3001_v60 }
  0xd2   :  { %1868 = vmatmul.mubr.bf16.gmra.mxu1 %v2992_v62  ;;  %2743 = vmatmul.mubr.msk.bf16.gmra.mxu0 %vm1341_vm1, %v2993_v63 }
  0xd3   :  { %1875 = vmatprep.mubr.bf16.mxu1 %v2994_v0  ;;  %2746 = vmatprep.mubr.msk.bf16.mxu0 %vm3002_vm0, %v3001_v60 }
  0xda   :  { %1876 = vmatmul.mubr.bf16.gmra.mxu1 %v2996_v2  ;;  %2747 = vmatmul.mubr.msk.bf16.gmra.mxu0 %vm1341_vm1, %v2997_v3 }
  0xdb   :  { %1883 = vmatprep.mubr.bf16.mxu1 %v2249_v4  ;;  %2750 = vmatprep.mubr.msk.bf16.mxu0 %vm3002_vm0, %v3001_v60 }
  0xe2   :  { %v2399_v7 = vpop.f32.mrf.mxu1  ;;  %1884 = vmatmul.mubr.bf16.gmra.mxu1 %v2248_v5  ;;  %v2375_v8 = vpop.f32.mrf.mxu0  ;;  %2751 = vmatmul.mubr.msk.bf16.gmra.mxu0 %vm1341_vm1, %v3000_v6 }
  0xe4   :  { %v2400_v9 = vpop.f32.mrf.mxu1  ;;  %v2376_v10 = vpop.f32.mrf.mxu0 }
  0xe5   :  { %v3605_v11 = vadd.f32 %v2400_v9, %v2399_v7  ;;  %v2377_v12 = vadd.f32 %v2376_v10, %v2375_v8 }
  0xe6   :  { %v2402_v13 = vpop.f32.mrf.mxu1  ;;  %v2378_v14 = vpop.f32.mrf.mxu0 }
  0xe8   :  { %v2403_v15 = vpop.f32.mrf.mxu1  ;;  %v2379_v16 = vpop.f32.mrf.mxu0 }
  0xe9   :  { %v3607_v60 = vadd.f32 %v2403_v15, %v2402_v13  ;;  %v2380_v17 = vadd.f32 %v2379_v16, %v2378_v14 }
  0xea   :  { %v2381_v18 = vpop.f32.mrf.mxu0  ;;  %v2405_v19 = vpop.f32.mrf.mxu1 }
  0xec   :  { %v2382_v20 = vpop.f32.mrf.mxu0  ;;  %v2406_v21 = vpop.f32.mrf.mxu1 }
  0xed   :  { %v2383_v22 = vadd.f32 %v2382_v20, %v2381_v18  ;;  %v3609_v23 = vadd.f32 %v2406_v21, %v2405_v19 }
  0xee   :  { %v2384_v24 = vpop.f32.mrf.mxu0  ;;  %v2408_v25 = vpop.f32.mrf.mxu1 }
  0xf0   :  { %v2385_v26 = vpop.f32.mrf.mxu0  ;;  %v2409_v27 = vpop.f32.mrf.mxu1 }
  0xf1   :  { %v2386_v28 = vadd.f32 %v2385_v26, %v2384_v24  ;;  %v3611_v29 = vadd.f32 %v2409_v27, %v2408_v25 }
  0xf2   :  { %v2387_v30 = vpop.f32.mrf.mxu0  ;;  %v2411_v31 = vpop.f32.mrf.mxu1 }
  0xf4   :  { %v2388_v32 = vpop.f32.mrf.mxu0  ;;  %v2412_v33 = vpop.f32.mrf.mxu1 }
  0xf5   :  { %v2389_v34 = vadd.f32 %v2388_v32, %v2387_v30  ;;  %v3613_v35 = vadd.f32 %v2412_v33, %v2411_v31 }
  0xf6   :  { %v2390_v36 = vpop.f32.mrf.mxu0  ;;  %v2414_v37 = vpop.f32.mrf.mxu1 }
  0xf8   :  { %v2391_v38 = vpop.f32.mrf.mxu0  ;;  %v2415_v39 = vpop.f32.mrf.mxu1 }
  0xf9   :  { %v2392_v40 = vadd.f32 %v2391_v38, %v2390_v36 }
  0xfa   :  { %v2393_v41 = vpop.f32.mrf.mxu0 }
  0xfc   :  { %v2394_v42 = vpop.f32.mrf.mxu0 }
  0xfd   :  { %v2395_v43 = vadd.f32 %v2394_v42, %v2393_v41 }
  0xfe   :  { %v2396_v44 = vpop.f32.mrf.mxu0 }
 0x100   :  { %v2397_v45 = vpop.f32.mrf.mxu0 }
 0x101   :  { %v3615_v46 = vadd.f32 %v2397_v45, %v2396_v44 }
 0x102   :  { %v2433_v47 = vpop.f32.mrf.mxu1  ;;  %v2491_v48 = vpop.f32.mrf.mxu0 }
 0x104   :  { %v2434_v49 = vpop.f32.mrf.mxu1  ;;  %v2492_v50 = vpop.f32.mrf.mxu0 }
 0x105   :  { %v2435_v51 = vadd.f32 %v2434_v49, %v2433_v47  ;;  %v2493_v52 = vadd.f32 %v2492_v50, %v2491_v48 }
 0x106   :  { %v2436_v53 = vpop.f32.mrf.mxu1  ;;  %v2494_v54 = vpop.f32.mrf.mxu0 }
 0x107   :  { %v1486_v55 = vadd.f32 %v2435_v51, %v2377_v12 }
 0x108   :  { %v2437_v56 = vpop.f32.mrf.mxu1  ;;  %v2495_v57 = vpop.f32.mrf.mxu0 }
 0x109   :  { %v3617_v58 = vadd.f32 %v2493_v52, %v1486_v55  ;;  %v2438_v59 = vadd.f32 %v2437_v56, %v2436_v53  ;;  %v2496_v61 = vadd.f32 %v2495_v57, %v2494_v54 }
 0x10a   :  { %v2439_v62 = vpop.f32.mrf.mxu1  ;;  %v2497_v63 = vpop.f32.mrf.mxu0 }
 0x10b   :  { %v1489_v0 = vadd.f32 %v2438_v59, %v2380_v17 }
 0x10c   :  { %v2440_v1 = vpop.f32.mrf.mxu1  ;;  %v2498_v2 = vpop.f32.mrf.mxu0 }
 0x10d   :  { %v3619_v3 = vadd.f32 %v2496_v61, %v1489_v0  ;;  %v2441_v4 = vadd.f32 %v2440_v1, %v2439_v62  ;;  %v2499_v5 = vadd.f32 %v2498_v2, %v2497_v63 }
 0x10e   :  { %v2442_v6 = vpop.f32.mrf.mxu1  ;;  %v2500_v7 = vpop.f32.mrf.mxu0 }
 0x10f   :  { %v1494_v8 = vadd.f32 %v2441_v4, %v2383_v22 }
 0x110   :  { %v2443_v9 = vpop.f32.mrf.mxu1  ;;  %v2501_v10 = vpop.f32.mrf.mxu0 }
 0x111   :  { %v3621_v12 = vadd.f32 %v2499_v5, %v1494_v8  ;;  %v2444_v13 = vadd.f32 %v2443_v9, %v2442_v6  ;;  %v2502_v14 = vadd.f32 %v2501_v10, %v2500_v7 }
 0x112   :  { %v2445_v15 = vpop.f32.mrf.mxu1  ;;  %v2503_v16 = vpop.f32.mrf.mxu0 }
 0x113   :  { %v1497_v18 = vadd.f32 %v2444_v13, %v2386_v28 }
 0x114   :  { %v2446_v19 = vpop.f32.mrf.mxu1  ;;  %v2504_v17 = vpop.f32.mrf.mxu0 }
 0x115   :  { %v3623_v20 = vadd.f32 %v2502_v14, %v1497_v18  ;;  %v2447_v21 = vadd.f32 %v2446_v19, %v2445_v15  ;;  %v2505_v24 = vadd.f32 %v2504_v17, %v2503_v16 }
 0x116   :  { %v2448_v25 = vpop.f32.mrf.mxu1  ;;  %v2506_v26 = vpop.f32.mrf.mxu0 }
 0x117   :  { %v1502_v27 = vadd.f32 %v2447_v21, %v2389_v34 }
 0x118   :  { %v2449_v30 = vpop.f32.mrf.mxu1  ;;  %v2507_v22 = vpop.f32.mrf.mxu0 }
 0x119   :  { %v3625_v31 = vadd.f32 %v2505_v24, %v1502_v27  ;;  %v2450_v32 = vadd.f32 %v2449_v30, %v2448_v25  ;;  %v2508_v33 = vadd.f32 %v2507_v22, %v2506_v26 }
 0x11a   :  { %v2451_v36 = vpop.f32.mrf.mxu1  ;;  %v2509_v37 = vpop.f32.mrf.mxu0 }
 0x11b   :  { %v1505_v38 = vadd.f32 %v2450_v32, %v2392_v40 }
 0x11c   :  { %v2452_v39 = vpop.f32.mrf.mxu1  ;;  %v2510_v28 = vpop.f32.mrf.mxu0 }
 0x11d   :  { %v3627_v41 = vadd.f32 %v2508_v33, %v1505_v38  ;;  %v2453_v42 = vadd.f32 %v2452_v39, %v2451_v36  ;;  %v2511_v44 = vadd.f32 %v2510_v28, %v2509_v37 }
 0x11e   :  { %v2454_v45 = vpop.f32.mrf.mxu1  ;;  %v2512_v47 = vpop.f32.mrf.mxu0 }
 0x11f   :  { %v1510_v48 = vadd.f32 %v2453_v42, %v2395_v43 }
 0x120   :  { %v2455_v49 = vpop.f32.mrf.mxu1  ;;  %v2513_v34 = vpop.f32.mrf.mxu0 }
 0x121   :  { %v3629_v50 = vadd.f32 %v2511_v44, %v1510_v48  ;;  %v2456_v51 = vadd.f32 %v2455_v49, %v2454_v45  ;;  %v2514_v52 = vadd.f32 %v2513_v34, %v2512_v47 }
 0x122   :  { %v2457_v53 = vpop.f32.mrf.mxu1  ;;  %v2515_v54 = vpop.f32.mrf.mxu0 }
 0x123   :  { %v1513_v55 = vadd.f32 %v2456_v51, %v3615_v46 }
 0x124   :  { %v2458_v40 = vpop.f32.mrf.mxu1  ;;  %v2516_v56 = vpop.f32.mrf.mxu0 }
 0x125   :  { %v3632_v57 = vadd.f32 %v2514_v52, %v1513_v55  ;;  %v2459_v59 = vadd.f32 %v2458_v40, %v2457_v53  ;;  %v2517_v61 = vadd.f32 %v2516_v56, %v2515_v54 }
 0x126   :  { %v2460_v62 = vpop.f32.mrf.mxu1  ;;  %v2518_v63 = vpop.f32.mrf.mxu0 }
 0x127   :  { %v1518_v43 = vadd.f32 %v2459_v59, %v3605_v11 }
 0x128   :  { %v2461_v0 = vpop.f32.mrf.mxu1  ;;  %v2519_v1 = vpop.f32.mrf.mxu0 }
 0x129   :  { %v3635_v2 = vadd.f32 %v2517_v61, %v1518_v43  ;;  %v2462_v4 = vadd.f32 %v2461_v0, %v2460_v62  ;;  %v2520_v5 = vadd.f32 %v2519_v1, %v2518_v63 }
 0x12a   :  { %v2463_v6 = vpop.f32.mrf.mxu1  ;;  %v2521_v7 = vpop.f32.mrf.mxu0 }
 0x12b   :  { %v1521_v46 = vadd.f32 %v2462_v4, %v3607_v60 }
 0x12c   :  { %v2464_v8 = vpop.f32.mrf.mxu1  ;;  %v2522_v9 = vpop.f32.mrf.mxu0 }
 0x12d   :  { %v3638_v10 = vadd.f32 %v2520_v5, %v1521_v46  ;;  %v2465_v13 = vadd.f32 %v2464_v8, %v2463_v6  ;;  %v2523_v14 = vadd.f32 %v2522_v9, %v2521_v7 }
 0x12e   :  { %v2466_v15 = vpop.f32.mrf.mxu1  ;;  %v2524_v16 = vpop.f32.mrf.mxu0 }
 0x12f   :  { %3937 = vst [vmem:[#allocation2_spill] sm:$0xff] %v3638_v10  ;;  %v1526_v11 = vadd.f32 %v2465_v13, %v3609_v23 }
 0x130   :  { %v2467_v18 = vpop.f32.mrf.mxu1  ;;  %v2525_v19 = vpop.f32.mrf.mxu0 }
 0x131   :  { %v3641_v17 = vadd.f32 %v2523_v14, %v1526_v11  ;;  %v2468_v21 = vadd.f32 %v2467_v18, %v2466_v15  ;;  %v2526_v24 = vadd.f32 %v2525_v19, %v2524_v16 }
 0x132   :  { %v2469_v25 = vpop.f32.mrf.mxu1  ;;  %v2527_v26 = vpop.f32.mrf.mxu0 }
 0x133   :  { %3938 = vst [vmem:[#allocation3_spill] sm:$0xff] %v3641_v17  ;;  %v1529_v60 = vadd.f32 %v2468_v21, %v3611_v29 }
 0x134   :  { %v2470_v27 = vpop.f32.mrf.mxu1  ;;  %v2528_v30 = vpop.f32.mrf.mxu0 }
 0x135   :  { %v3644_v22 = vadd.f32 %v2526_v24, %v1529_v60  ;;  %v2471_v32 = vadd.f32 %v2470_v27, %v2469_v25  ;;  %v2529_v33 = vadd.f32 %v2528_v30, %v2527_v26 }
 0x136   :  { %v2472_v36 = vpop.f32.mrf.mxu1  ;;  %v2530_v37 = vpop.f32.mrf.mxu0 }
 0x137   :  { %3939 = vst [vmem:[#allocation4_spill] sm:$0xff] %v3644_v22  ;;  %v1534_v23 = vadd.f32 %v2471_v32, %v3613_v35 }
 0x138   :  { %v2473_v38 = vpop.f32.mrf.mxu1  ;;  %v2531_v39 = vpop.f32.mrf.mxu0 }
 0x139   :  { %v3647_v28 = vadd.f32 %v2529_v33, %v1534_v23 }
 0x13a   :  { %v2549_v42 = vpop.f32.mrf.mxu1  ;;  %v2607_v44 = vpop.f32.mrf.mxu0 }
 0x13b   :  { %3940 = vst [vmem:[#allocation5_spill] sm:$0xff] %v3647_v28 }
 0x13c   :  { %v2550_v45 = vpop.f32.mrf.mxu1  ;;  %v2608_v47 = vpop.f32.mrf.mxu0 }
 0x13d   :  { %v2551_v22 = vadd.f32 %v2550_v45, %v2549_v42 }
 0x13e   :  { %v2552_v48 = vpop.f32.mrf.mxu1  ;;  %v3649_v29 = vpop.f32.mrf.mxu0 }
 0x140   :  { %v2553_v49 = vpop.f32.mrf.mxu1  ;;  %v2611_v34 = vpop.f32.mrf.mxu0 }
 0x142   :  { %v2555_v51 = vpop.f32.mrf.mxu1  ;;  %v3651_v52 = vpop.f32.mrf.mxu0 }
 0x144   :  { %v2556_v53 = vpop.f32.mrf.mxu1  ;;  %v3653_v54 = vpop.f32.mrf.mxu0 }
 0x145   :  { %v2557_v10 = vadd.f32 %v2556_v53, %v2555_v51 }
 0x146   :  { %v2558_v35 = vpop.f32.mrf.mxu1  ;;  %v3655_v55 = vpop.f32.mrf.mxu0 }
 0x148   :  { %v2559_v40 = vpop.f32.mrf.mxu1  ;;  %v3657_v56 = vpop.f32.mrf.mxu0 }
 0x14a   :  { %v3659_v59 = vpop.f32.mrf.mxu1  ;;  %v3661_v61 = vpop.f32.mrf.mxu0 }
 0x14c   :  { %v3663_v62 = vpop.f32.mrf.mxu1  ;;  %v3665_v63 = vpop.f32.mrf.mxu0 }
 0x14e   :  { %v3667_v43 = vpop.f32.mrf.mxu1  ;;  %v3669_v0 = vpop.f32.mrf.mxu0 }
 0x150   :  { %v3671_v1 = vpop.f32.mrf.mxu1  ;;  %v3673_v4 = vpop.f32.mrf.mxu0 }
 0x152   :  { %v3675_v5 = vpop.f32.mrf.mxu1  ;;  %v3677_v6 = vpop.f32.mrf.mxu0 }
 0x154   :  { %v3679_v7 = vpop.f32.mrf.mxu1  ;;  %v3681_v46 = vpop.f32.mrf.mxu0 }
 0x156   :  { %v3683_v8 = vpop.f32.mrf.mxu1  ;;  %v3685_v9 = vpop.f32.mrf.mxu0 }
 0x158   :  { %v3687_v13 = vpop.f32.mrf.mxu1  ;;  %v3689_v14 = vpop.f32.mrf.mxu0 }
 0x15a   :  { %v3691_v15 = vpop.f32.mrf.mxu1  ;;  %v3693_v16 = vpop.f32.mrf.mxu0 }
 0x15c   :  { %v3695_v11 = vpop.f32.mrf.mxu1  ;;  %v3697_v18 = vpop.f32.mrf.mxu0 }
 0x15e   :  { %v3699_v19 = vpop.f32.mrf.mxu1  ;;  %v3701_v21 = vpop.f32.mrf.mxu0 }
 0x15f   :  { %3941 = vst [vmem:[#allocation6_spill] sm:$0xff] %v3701_v21  ;;  %v2609_v21 = vadd.f32 %v2608_v47, %v2607_v44 }
 0x160   :  { %v3703_v24 = vpop.f32.mrf.mxu1  ;;  %v3705_v25 = vpop.f32.mrf.mxu0 }
 0x161   :  { %3942 = vst [vmem:[#allocation7_spill] sm:$0xff] %v3705_v25 }
 0x162   :  { %v3707_v26 = vpop.f32.mrf.mxu1  ;;  %v3709_v60 = vpop.f32.mrf.mxu0 }
 0x163   :  { %3943 = vst [vmem:[#allocation8_spill] sm:$0xff] %v3707_v26  ;;  %3944 = vst [vmem:[#allocation9_spill] sm:$0xff] %v3709_v60 }
 0x164   :  { %v3711_v27 = vpop.f32.mrf.mxu1  ;;  %v3713_v30 = vpop.f32.mrf.mxu0 }
 0x165   :  { %3945 = vst [vmem:[#allocation10_spill] sm:$0xff] %v3711_v27  ;;  %3946 = vst [vmem:[#allocation11_spill] sm:$0xff] %v3713_v30  ;;  %v2554_v30 = vadd.f32 %v2553_v49, %v2552_v48  ;;  %v2560_v49 = vadd.f32 %v2559_v40, %v2558_v35 }
 0x166   :  { %v3715_v32 = vpop.f32.mrf.mxu1  ;;  %v3717_v33 = vpop.f32.mrf.mxu0 }
 0x167   :  { %3947 = vst [vmem:[#allocation12_spill] sm:$0xff] %v3715_v32  ;;  %3948 = vst [vmem:[#allocation13_spill] sm:$0xff] %v3717_v33  ;;  %v1662_v33 = vadd.f32 %v2551_v22, %v3617_v58  ;;  %v1670_v58 = vadd.f32 %v2557_v10, %v3621_v12  ;;  %v2615_v22 = vadd.f32 %v3653_v54, %v3651_v52 }
 0x168   :  { %v3719_v36 = vpop.f32.mrf.mxu1  ;;  %v3721_v37 = vpop.f32.mrf.mxu0  ;;  %v2563_v12 = vadd.f32 %v3663_v62, %v3659_v59  ;;  %v2618_v54 = vadd.f32 %v3657_v56, %v3655_v55  ;;  %v2621_v62 = vadd.f32 %v3665_v63, %v3661_v61  ;;  %v2624_v61 = vadd.f32 %v3673_v4, %v3669_v0 }
 0x169   :  { %3949 = vst [vmem:[#allocation14_spill] sm:$0xff] %v3719_v36  ;;  %3950 = vst [vmem:[#allocation15_spill] sm:$0xff] %v3721_v37  ;;  %v1665_v37 = vadd.f32 %v2554_v30, %v3619_v3  ;;  %v1758_v35 = vadd.f32 %v2615_v22, %v1670_v58 }
 0x16a   :  { %v3723_v23 = vpop.f32.mrf.mxu1  ;;  %v3725_v38 = vpop.f32.mrf.mxu0  ;;  %v1678_v59 = vadd.f32 %v2563_v12, %v3625_v31  ;;  %v2569_v31 = vadd.f32 %v3679_v7, %v3675_v5  ;;  %v2627_v7 = vadd.f32 %v3681_v46, %v3677_v6  ;;  %v2630_v6 = vadd.f32 %v3689_v14, %v3685_v9 }
 0x16b   :  { %3951 = vst [vmem:[#allocation16_spill] sm:$0xff] %v3723_v23  ;;  %3952 = vst [vmem:[#allocation17_spill] sm:$0xff] %v3725_v38  ;;  %v1750_v38 = vadd.f32 %v2609_v21, %v1662_v33 }
 0x16c   :  { %v3727_v39 = vpop.f32.mrf.mxu1  ;;  %v3729_v28 = vpop.f32.mrf.mxu0  ;;  %v1686_v5 = vadd.f32 %v2569_v31, %v3629_v50  ;;  %v2575_v50 = vadd.f32 %v3695_v11, %v3691_v15  ;;  %v2633_v11 = vadd.f32 %v3697_v18, %v3693_v16  ;;  %v3958_v16 = vld [vmem:[#allocation6_spill] sm:$0xff]  ;;  %v3959_v18 = vld [vmem:[#allocation7_spill] sm:$0xff] }
 0x16d   :  { %3953 = vst [vmem:[#allocation18_spill] sm:$0xff] %v3727_v39  ;;  %3954 = vst [vmem:[#allocation19_spill] sm:$0xff] %v3729_v28  ;;  %v2612_v28 = vadd.f32 %v2611_v34, %v3649_v29 }
 0x16e   :  { %v2588_v60 = vpop.f32.mrf.mxu1  ;;  %v2646_v17 = vpop.f32.mrf.mxu0  ;;  %v1694_v15 = vadd.f32 %v2575_v50, %v3635_v2 }
 0x16f   :  { %v1753_v48 = vadd.f32 %v2612_v28, %v1665_v37  ;;  %v1673_v28 = vadd.f32 %v2560_v49, %v3623_v20  ;;  %v2566_v20 = vadd.f32 %v3671_v1, %v3667_v43  ;;  %v1766_v1 = vadd.f32 %v2621_v62, %v1678_v59 }
 0x170   :  { %v2589_v25 = vpop.f32.mrf.mxu1  ;;  %v2647_v32 = vpop.f32.mrf.mxu0  ;;  %v2636_v62 = vadd.f32 %v3959_v18, %v3958_v16 }
 0x172   :  { %v2665_v36 = vpop.f32.mrf.mxu1  ;;  %v1925_v27 = vpop.f32.mrf.mxu0 }
 0x174   :  { %v2666_v23 = vpop.f32.mrf.mxu1  ;;  %v2728_v26 = vpop.f32.mrf.mxu0 }
 0x175   :  { %v2667_v39 = vadd.f32 %v2666_v23, %v2665_v36  ;;  %v1681_v23 = vadd.f32 %v2566_v20, %v3627_v41  ;;  %v2572_v41 = vadd.f32 %v3687_v13, %v3683_v8  ;;  %v1774_v13 = vadd.f32 %v2627_v7, %v1686_v5  ;;  %v3956_v20 = vld [vmem:[#allocation8_spill] sm:$0xff] }
 0x176   :  { %v2668_v42 = vpop.f32.mrf.mxu1  ;;  %v1928_v45 = vpop.f32.mrf.mxu0  ;;  %v3965_v7 = vld [vmem:[#allocation4_spill] sm:$0xff] }
 0x177   :  { %v1838_v17 = vadd.f32 %v2667_v39, %v1750_v38 }
 0x178   :  { %v2669_v25 = vpop.f32.mrf.mxu1  ;;  %v2729_v60 = vpop.f32.mrf.mxu0 }
 0x179   :  { %v2670_v3 = vadd.f32 %v2669_v25, %v2668_v42  ;;  %v3737_v44 = vadd.f32 %v1925_v27, %v1838_v17  ;;  %v1761_v27 = vadd.f32 %v2618_v54, %v1673_v28 }
 0x17a   :  { %v2671_v47 = vpop.f32.mrf.mxu1  ;;  %v1933_v51 = vpop.f32.mrf.mxu0 }
 0x17b   :  { %v1841_v53 = vadd.f32 %v2670_v3, %v1753_v48  ;;  %1992 = vrot.lane.b32.xlu0 %v3737_v44, %s3003_s0  ;;  %v1769_v48 = vadd.f32 %v2624_v61, %v1681_v23  ;;  %v1689_v3 = vadd.f32 %v2572_v41, %v3632_v57  ;;  %v2578_v57 = vadd.f32 %v3703_v24, %v3699_v19  ;;  %v3960_v23 = vld [vmem:[#allocation12_spill] sm:$0xff] }
 0x17c   :  { %v2672_v29 = vpop.f32.mrf.mxu1  ;;  %v2732_v34 = vpop.f32.mrf.mxu0  ;;  %v1782_v24 = vadd.f32 %v2633_v11, %v1694_v15  ;;  %v3970_v15 = vld [vmem:[#allocation5_spill] sm:$0xff] }
 0x17d   :  { %v2673_v10 = vadd.f32 %v2672_v29, %v2671_v47  ;;  %v3744_v52 = vadd.f32 %v1928_v45, %v1841_v53  ;;  %v1777_v34 = vadd.f32 %v2630_v6, %v1689_v3  ;;  %v3966_v3 = vld [vmem:[#allocation16_spill] sm:$0xff]  ;;  %v3969_v6 = vld [vmem:[#allocation15_spill] sm:$0xff] }
 0x17e   :  { %v2674_v40 = vpop.f32.mrf.mxu1  ;;  %v1936_v21 = vpop.f32.mrf.mxu0 }
 0x17f   :  { %v1846_v26 = vadd.f32 %v2673_v10, %v1758_v35  ;;  %1994 = vrot.lane.b32.xlu0 %v3744_v52, %s3003_s0 }
 0x180   :  { %v2675_v30 = vpop.f32.mrf.mxu1  ;;  %v2733_v32 = vpop.f32.mrf.mxu0 }
 0x181   :  { %v2676_v33 = vadd.f32 %v2675_v30, %v2674_v40  ;;  %v3755_v36 = vadd.f32 %v1933_v51, %v1846_v26  ;;  %v3957_v30 = vld [vmem:[#allocation10_spill] sm:$0xff] }
 0x182   :  { %v2677_v55 = vpop.f32.mrf.mxu1  ;;  %v1941_v56 = vpop.f32.mrf.mxu0  ;;  %v2581_v2 = vadd.f32 %v3957_v30, %v3956_v20 }
 0x183   :  { %v1849_v37 = vadd.f32 %v2676_v33, %v1761_v27  ;;  %1996 = vrot.lane.b32.xlu1 %v3755_v36, %s3003_s0 }
 0x184   :  { %v2678_v38 = vpop.f32.mrf.mxu1  ;;  %v2736_v43 = vpop.f32.mrf.mxu0 }
 0x185   :  { %v2679_v39 = vadd.f32 %v2678_v38, %v2677_v55  ;;  %v3762_v42 = vadd.f32 %v1936_v21, %v1849_v37  ;;  %v3955_v21 = vld [vmem:[#allocation2_spill] sm:$0xff] }
 0x186   :  { %v2680_v63 = vpop.f32.mrf.mxu1  ;;  %v1944_v45 = vpop.f32.mrf.mxu0  ;;  %v1697_v26 = vadd.f32 %v2578_v57, %v3955_v21  ;;  %v3961_v38 = vld [vmem:[#allocation14_spill] sm:$0xff] }
 0x187   :  { %v1854_v17 = vadd.f32 %v2679_v39, %v1766_v1  ;;  %1998 = vrot.lane.b32.xlu1 %v3762_v42, %s3003_s0  ;;  %v2584_v43 = vadd.f32 %v3961_v38, %v3960_v23  ;;  %v3962_v39 = vld [vmem:[#allocation3_spill] sm:$0xff] }
 0x188   :  { %v2681_v49 = vpop.f32.mrf.mxu1  ;;  %v2737_v25 = vpop.f32.mrf.mxu0  ;;  %v1785_v37 = vadd.f32 %v2636_v62, %v1697_v26  ;;  %v1702_v61 = vadd.f32 %v2581_v2, %v3962_v39 }
 0x189   :  { %v2682_v60 = vadd.f32 %v2681_v49, %v2680_v63  ;;  %v3773_v58 = vadd.f32 %v1941_v56, %v1854_v17  ;;  %v3963_v63 = vld [vmem:[#allocation9_spill] sm:$0xff] }
 0x18a   :  { %v2683_v0 = vpop.f32.mrf.mxu1  ;;  %v1949_v4 = vpop.f32.mrf.mxu0 }
 0x18b   :  { %v1857_v22 = vadd.f32 %v2682_v60, %v1769_v48  ;;  %2000 = vrot.lane.b32.xlu0 %v3773_v58, %s3003_s0  ;;  %v1705_v60 = vadd.f32 %v2584_v43, %v3965_v7 }
 0x18c   :  { %v2684_v47 = vpop.f32.mrf.mxu1  ;;  %v2740_v8 = vpop.f32.mrf.mxu0 }
 0x18d   :  { %v2685_v51 = vadd.f32 %v2684_v47, %v2683_v0  ;;  %v3780_v53 = vadd.f32 %v1944_v45, %v1857_v22  ;;  %v3964_v45 = vld [vmem:[#allocation11_spill] sm:$0xff]  ;;  %v3967_v47 = vld [vmem:[#allocation18_spill] sm:$0xff] }
 0x18e   :  { %v2686_v46 = vpop.f32.mrf.mxu1  ;;  %v1952_v28 = vpop.f32.mrf.mxu0  ;;  %v2639_v17 = vadd.f32 %v3964_v45, %v3963_v63  ;;  %v2587_v8 = vadd.f32 %v3967_v47, %v3966_v3 }
 0x18f   :  { %v1862_v29 = vadd.f32 %v2685_v51, %v1774_v13  ;;  %2002 = vrot.lane.b32.xlu1 %v3780_v53, %s3003_s0  ;;  %v3968_v51 = vld [vmem:[#allocation13_spill] sm:$0xff] }
 0x190   :  { %v2687_v35 = vpop.f32.mrf.mxu1  ;;  %v2741_v12 = vpop.f32.mrf.mxu0  ;;  %v1790_v22 = vadd.f32 %v2639_v17, %v1702_v61  ;;  %v1710_v11 = vadd.f32 %v2587_v8, %v3970_v15 }
 0x191   :  { %v2688_v10 = vadd.f32 %v2687_v35, %v2686_v46  ;;  %v3791_v54 = vadd.f32 %v1949_v4, %v1862_v29  ;;  %v2642_v46 = vadd.f32 %v3969_v6, %v3968_v51 }
 0x192   :  { %v2689_v9 = vpop.f32.mrf.mxu1  ;;  %v1957_v14 = vpop.f32.mrf.mxu0 }
 0x193   :  { %v1865_v40 = vadd.f32 %v2688_v10, %v1777_v34  ;;  %2004 = vrot.lane.b32.xlu0 %v3791_v54, %s3003_s0  ;;  %v1793_v57 = vadd.f32 %v2642_v46, %v1705_v60  ;;  %v3971_v10 = vld [vmem:[#allocation17_spill] sm:$0xff] }
 0x194   :  { %v2690_v27 = vpop.f32.mrf.mxu1  ;;  %v2744_v19 = vpop.f32.mrf.mxu0 }
 0x195   :  { %v2691_v32 = vadd.f32 %v2690_v27, %v2689_v9  ;;  %v3798_v59 = vadd.f32 %v1952_v28, %v1865_v40  ;;  %v3972_v9 = vld [vmem:[#allocation19_spill] sm:$0xff] }
 0x196   :  { %v2692_v33 = vpop.f32.mrf.mxu1  ;;  %v1960_v55 = vpop.f32.mrf.mxu0 }
 0x197   :  { %v1870_v56 = vadd.f32 %v2691_v32, %v1782_v24  ;;  %2006 = vrot.lane.b32.xlu1 %v3798_v59, %s3003_s0 }
 0x198   :  { %v2693_v1 = vpop.f32.mrf.mxu1  ;;  %v2745_v31 = vpop.f32.mrf.mxu0 }
 0x199   :  { %v2694_v48 = vadd.f32 %v2693_v1, %v2692_v33  ;;  %v3809_v41 = vadd.f32 %v1957_v14, %v1870_v56  ;;  %v2645_v14 = vadd.f32 %v3972_v9, %v3971_v10 }
 0x19a   :  { %v2695_v49 = vpop.f32.mrf.mxu1  ;;  %v1965_v25 = vpop.f32.mrf.mxu0 }
 0x19b   :  { %v1873_v5 = vadd.f32 %v2694_v48, %v1785_v37  ;;  %2008 = vrot.lane.b32.xlu0 %v3809_v41, %s3003_s0  ;;  %v1798_v30 = vadd.f32 %v2645_v14, %v1710_v11 }
 0x19c   :  { %v2696_v0 = vpop.f32.mrf.mxu1  ;;  %v2748_v4 = vpop.f32.mrf.mxu0 }
 0x19d   :  { %v2697_v13 = vadd.f32 %v2696_v0, %v2695_v49  ;;  %v1961_v50 = vadd.f32 %v1960_v55, %v1873_v5  ;;  %v3862_v0 = vld [vmem:[%s3935_s2] ss:$0 sm:$0xff] }
 0x19e   :  { %v2698_v28 = vpop.f32.mrf.mxu1  ;;  %v1968_v29 = vpop.f32.mrf.mxu0 }
 0x19f   :  { %v1878_v34 = vadd.f32 %v2697_v13, %v1790_v22  ;;  %2010 = vrot.lane.b32.xlu1 %v1961_v50, %s3003_s0 }
 0x1a0   :  { %v2699_v35 = vpop.f32.mrf.mxu1  ;;  %v2749_v12 = vpop.f32.mrf.mxu0 }
 0x1a1   :  { %v2700_v40 = vadd.f32 %v2699_v35, %v2698_v28  ;;  %v1966_v21 = vadd.f32 %v1965_v25, %v1878_v34 }
 0x1a2   :  { %v2701_v26 = vpop.f32.mrf.mxu1  ;;  %v1973_v27 = vpop.f32.mrf.mxu0 }
 0x1a3   :  { %v1881_v19 = vadd.f32 %v2700_v40, %v1793_v57  ;;  %2012 = vrot.lane.b32.xlu0 %v1966_v21, %s3003_s0 }
 0x1a4   :  { %v2702_v24 = vpop.f32.mrf.mxu1  ;;  %v2752_v20 = vpop.f32.mrf.mxu0 }
 0x1a5   :  { %v2703_v2 = vadd.f32 %v2702_v24, %v2701_v26  ;;  %v1969_v32 = vadd.f32 %v1968_v29, %v1881_v19 }
 0x1a6   :  { %v2704_v16 = vpop.f32.mrf.mxu1  ;;  %v1976_v18 = vpop.f32.mrf.mxu0 }
 0x1a7   :  { %v1886_v62 = vadd.f32 %v2703_v2, %v1798_v30  ;;  %2014 = vrot.lane.b32.xlu1 %v1969_v32, %s3003_s0 }
 0x1a8   :  { %v2705_v33 = vpop.f32.mrf.mxu1  ;;  %v2753_v55 = vpop.f32.mrf.mxu0 }
 0x1a9   :  { %v1974_v56 = vadd.f32 %v1973_v27, %v1886_v62 }
 0x1ab   :  { %2016 = vrot.lane.b32.xlu0 %v1974_v56, %s3003_s0 }
 0x1ed   :  { %v1993_v37 = vpop.permute.xlu0 %1992 }
 0x1ee   :  { %v2031_v23 = vmax.f32 %v3737_v44, %v1993_v37 }
 0x1f0   :  { %2057 = vrot.lane.b32.xlu1 %v2031_v23, %s3004_s29 }
 0x1f1   :  { %v1995_v38 = vpop.permute.xlu0 %1994 }
 0x1f2   :  { %v2032_v43 = vmax.f32 %v3744_v52, %v1995_v38 }
 0x1f4   :  { %2059 = vrot.lane.b32.xlu0 %v2032_v43, %s3004_s29 }
 0x1f5   :  { %v1997_v1 = vpop.permute.xlu1 %1996 }
 0x1f6   :  { %v2033_v31 = vmax.f32 %v3755_v36, %v1997_v1 }
 0x1f8   :  { %2061 = vrot.lane.b32.xlu1 %v2033_v31, %s3004_s29 }
 0x1f9   :  { %v1999_v39 = vpop.permute.xlu1 %1998 }
 0x1fa   :  { %v2034_v61 = vmax.f32 %v3762_v42, %v1999_v39 }
 0x1fc   :  { %2063 = vrot.lane.b32.xlu0 %v2034_v61, %s3004_s29 }
 0x1fd   :  { %v2001_v63 = vpop.permute.xlu0 %2000 }
 0x1fe   :  { %v2035_v44 = vmax.f32 %v3773_v58, %v2001_v63 }
 0x200   :  { %2065 = vrot.lane.b32.xlu1 %v2035_v44, %s3004_s29 }
 0x201   :  { %v2003_v45 = vpop.permute.xlu1 %2002 }
 0x202   :  { %v2036_v52 = vmax.f32 %v3780_v53, %v2003_v45 }
 0x204   :  { %2067 = vrot.lane.b32.xlu0 %v2036_v52, %s3004_s29 }
 0x205   :  { %v2005_v17 = vpop.permute.xlu0 %2004 }
 0x206   :  { %v2037_v36 = vmax.f32 %v3791_v54, %v2005_v17 }
 0x208   :  { %2069 = vrot.lane.b32.xlu1 %v2037_v36, %s3004_s29 }
 0x209   :  { %v2007_v48 = vpop.permute.xlu1 %2006 }
 0x20a   :  { %v2038_v42 = vmax.f32 %v3798_v59, %v2007_v48 }
 0x20c   :  { %2071 = vrot.lane.b32.xlu0 %v2038_v42, %s3004_s29 }
 0x20d   :  { %v2009_v49 = vpop.permute.xlu0 %2008 }
 0x20e   :  { %v2039_v58 = vmax.f32 %v3809_v41, %v2009_v49 }
 0x210   :  { %2073 = vrot.lane.b32.xlu1 %v2039_v58, %s3004_s29 }
 0x211   :  { %v2011_v25 = vpop.permute.xlu1 %2010 }
 0x212   :  { %v3843_v5 = vmax.f32 %v1961_v50, %v2011_v25 }
 0x214   :  { %2075 = vrot.lane.b32.xlu0 %v3843_v5, %s3004_s29 }
 0x215   :  { %v2013_v53 = vpop.permute.xlu0 %2012 }
 0x216   :  { %v3847_v54 = vmax.f32 %v1966_v21, %v2013_v53 }
 0x218   :  { %2077 = vrot.lane.b32.xlu1 %v3847_v54, %s3004_s29 }
 0x219   :  { %v2015_v59 = vpop.permute.xlu1 %2014 }
 0x21a   :  { %v3851_v7 = vmax.f32 %v1969_v32, %v2015_v59 }
 0x21c   :  { %2079 = vrot.lane.b32.xlu0 %v3851_v7, %s3004_s29 }
 0x21d   :  { %v2017_v41 = vpop.permute.xlu0 %2016 }
 0x21e   :  { %v3855_v60 = vmax.f32 %v1974_v56, %v2017_v41 }
 0x220   :  { %2081 = vrot.lane.b32.xlu1 %v3855_v60, %s3004_s29 }
 0x262   :  { %v2058_v4 = vpop.permute.xlu1 %2057 }
 0x263   :  { %v2096_v22 = vmax.f32 %v2031_v23, %v2058_v4 }
 0x265   :  { %v2116_v3 = vadd.f32 %v3862_v0, %v2096_v22 }
 0x266   :  { %v2060_v47 = vpop.permute.xlu0 %2059 }
 0x267   :  { %v2129_v8 = vmax.f32 %v2116_v3, 0.0  ;;  %v2097_v13 = vmax.f32 %v2032_v43, %v2060_v47 }
 0x269   :  { %2143 = vst.msk [vmem:[%s3936_s3] sm:$0xff] %vm2142_vm2, %v2129_v8  ;;  %v2117_v50 = vadd.f32 %v3862_v0, %v2097_v13 }
 0x26a   :  { %v2062_v51 = vpop.permute.xlu1 %2061 }
 0x26b   :  { %v2130_v6 = vmax.f32 %v2117_v50, 0.0  ;;  %v2098_v46 = vmax.f32 %v2033_v31, %v2062_v51 }
 0x26d   :  { %2144 = vst.msk [vmem:[%s3936_s3 + $0x8] sm:$0xff] %vm2142_vm2, %v2130_v6  ;;  %v2118_v28 = vadd.f32 %v3862_v0, %v2098_v46 }
 0x26e   :  { %v2064_v29 = vpop.permute.xlu0 %2063 }
 0x26f   :  { %v2131_v34 = vmax.f32 %v2118_v28, 0.0  ;;  %v2099_v57 = vmax.f32 %v2034_v61, %v2064_v29 }
 0x271   :  { %2145 = vst.msk [vmem:[%s3936_s3 + $0x10] sm:$0xff] %vm2142_vm2, %v2131_v34  ;;  %v2119_v35 = vadd.f32 %v3862_v0, %v2099_v57 }
 0x272   :  { %v2066_v12 = vpop.permute.xlu1 %2065 }
 0x273   :  { %v2132_v15 = vmax.f32 %v2119_v35, 0.0  ;;  %v2100_v11 = vmax.f32 %v2035_v44, %v2066_v12 }
 0x275   :  { %2146 = vst.msk [vmem:[%s3936_s3 + $0x18] sm:$0xff] %vm2142_vm2, %v2132_v15  ;;  %v2120_v10 = vadd.f32 %v3862_v0, %v2100_v11 }
 0x276   :  { %v2068_v9 = vpop.permute.xlu0 %2067 }
 0x277   :  { %v2133_v14 = vmax.f32 %v2120_v10, 0.0  ;;  %v2101_v40 = vmax.f32 %v2036_v52, %v2068_v9 }
 0x279   :  { %2147 = vst.msk [vmem:[%s3936_s3 + $0x20] sm:$0xff] %vm2142_vm2, %v2133_v14  ;;  %v2121_v21 = vadd.f32 %v3862_v0, %v2101_v40 }
 0x27a   :  { %v2070_v26 = vpop.permute.xlu1 %2069 }
 0x27b   :  { %v2134_v27 = vmax.f32 %v2121_v21, 0.0  ;;  %v2102_v19 = vmax.f32 %v2037_v36, %v2070_v26 }
 0x27d   :  { %2148 = vst.msk [vmem:[%s3936_s3 + $0x28] sm:$0xff] %vm2142_vm2, %v2134_v27  ;;  %v2122_v24 = vadd.f32 %v3862_v0, %v2102_v19 }
 0x27e   :  { %v2072_v20 = vpop.permute.xlu0 %2071 }
 0x27f   :  { %v2135_v30 = vmax.f32 %v2122_v24, 0.0  ;;  %v2103_v2 = vmax.f32 %v2038_v42, %v2072_v20 }
 0x281   :  { %2149 = vst.msk [vmem:[%s3936_s3 + $0x30] sm:$0xff] %vm2142_vm2, %v2135_v30  ;;  %v2123_v32 = vadd.f32 %v3862_v0, %v2103_v2 }
 0x282   :  { %v2074_v16 = vpop.permute.xlu1 %2073 }
 0x283   :  { %v2136_v18 = vmax.f32 %v2123_v32, 0.0  ;;  %v2104_v62 = vmax.f32 %v2039_v58, %v2074_v16 }
 0x285   :  { %2150 = vst.msk [vmem:[%s3936_s3 + $0x38] sm:$0xff] %vm2142_vm2, %v2136_v18  ;;  %v2124_v33 = vadd.f32 %v3862_v0, %v2104_v62 }
 0x286   :  { %v2076_v55 = vpop.permute.xlu0 %2075 }
 0x287   :  { %v2137_v56 = vmax.f32 %v2124_v33, 0.0  ;;  %v2105_v37 = vmax.f32 %v3843_v5, %v2076_v55 }
 0x289   :  { %2151 = vst.msk [vmem:[%s3936_s3 + $0x40] sm:$0xff] %vm2142_vm2, %v2137_v56  ;;  %v2125_v23 = vadd.f32 %v3862_v0, %v2105_v37 }
 0x28a   :  { %v2078_v38 = vpop.permute.xlu1 %2077 }
 0x28b   :  { %v2138_v43 = vmax.f32 %v2125_v23, 0.0  ;;  %v2106_v1 = vmax.f32 %v3847_v54, %v2078_v38 }
 0x28d   :  { %2152 = vst.msk [vmem:[%s3936_s3 + $0x48] sm:$0xff] %vm2142_vm2, %v2138_v43  ;;  %v2126_v31 = vadd.f32 %v3862_v0, %v2106_v1 }
 0x28e   :  { %v2080_v39 = vpop.permute.xlu0 %2079 }
 0x28f   :  { %v2139_v61 = vmax.f32 %v2126_v31, 0.0  ;;  %v2107_v63 = vmax.f32 %v3851_v7, %v2080_v39 }
 0x291   :  { %2153 = vst.msk [vmem:[%s3936_s3 + $0x50] sm:$0xff] %vm2142_vm2, %v2139_v61  ;;  %v2127_v44 = vadd.f32 %v3862_v0, %v2107_v63 }
 0x292   :  { %v2082_v45 = vpop.permute.xlu1 %2081 }
 0x293   :  { %v2140_v52 = vmax.f32 %v2127_v44, 0.0  ;;  %v2108_v17 = vmax.f32 %v3855_v60, %v2082_v45 }
 0x295   :  { %2154 = vst.msk [vmem:[%s3936_s3 + $0x58] sm:$0xff] %vm2142_vm2, %v2140_v52  ;;  %v2128_v36 = vadd.f32 %v3862_v0, %v2108_v17 }
 0x297   :  { %v2141_v48 = vmax.f32 %v2128_v36, 0.0 }
 0x299   :  { %2155 = vst.msk [vmem:[%s3936_s3 + $0x60] sm:$0xff] %vm2142_vm2, %v2141_v48 }

// kernel: cnn_forward.5
= control target key start
LH: loop header
LB: loop body
LE: loop exit
PB: predicated region body
PF: predicated region fallthrough
CT: control target
= control target key end

     0   :  { %vm1517_vm0 = vmmov 0   ;;  %vm858_vm1 = vcmask 261120   ;;  %s1859_s1 = inlined_call_operand.vmem [shape: bf16[1568,128], index: 1, kind: input, shape index: {}]   ;;  %s1860_s0 = inlined_call_operand.vmem [shape: bf16[8,1568], index: 0, kind: input, shape index: {}]   ;;  %s1861_s2 = inlined_call_operand.vmem [shape: f32[1,128], index: 2, kind: input, shape index: {}]   ;;  %s1862_s3 = inlined_call_operand.vmem [shape: f32[8,128], index: 3, kind: output, shape index: {}]  }
   0x1   :  { %v1405_v0 = vld [vmem:[%s1859_s1 + $0x78] sm:$0xff]   ;;  %v1409_v4 = vld [vmem:[%s1859_s1 + $0x70] sm:$0xff]   ;;  %v1413_v8 = vld [vmem:[%s1859_s1 + $0x68] sm:$0xff]  }
   0x2   :  { %v1406_v1 = vld [vmem:[%s1859_s1 + $0xf8] sm:$0xff]   ;;  %1260 = vmatprep.subr.bf16.mxu0 %v1405_v0  ;;  %v1410_v5 = vld [vmem:[%s1859_s1 + $0xf0] sm:$0xff]   ;;  %v1414_v9 = vld [vmem:[%s1859_s1 + $0xe8] sm:$0xff]  }
   0x3   :  { %v1407_v2 = vld [vmem:[%s1859_s1 + $0x38] sm:$0xff]   ;;  %1282 = vmatprep.subr.bf16.mxu1 %v1406_v1  ;;  %v1411_v6 = vld [vmem:[%s1859_s1 + $0x30] sm:$0xff]   ;;  %v1415_v10 = vld [vmem:[%s1859_s1 + $0x28] sm:$0xff]  }
   0x4   :  { %v1408_v3 = vld [vmem:[%s1859_s1 + $0xb8] sm:$0xff]   ;;  %1261 = vmatpush3.bf16.msra.mxu0 %v1407_v2  ;;  %v1412_v7 = vld [vmem:[%s1859_s1 + $0xb0] sm:$0xff]   ;;  %v1416_v11 = vld [vmem:[%s1859_s1 + $0xa8] sm:$0xff]  }
   0x5   :  { %1283 = vmatpush3.bf16.msra.mxu1 %v1408_v3  ;;  %1262 = vmatprep.subr.bf16.mxu0 %v1409_v4  ;;  %v1417_v12 = vld [vmem:[%s1859_s1 + $0x60] sm:$0xff]   ;;  %v1421_v16 = vld [vmem:[%s1859_s1 + $0x58] sm:$0xff]   ;;  %v1425_v20 = vld [vmem:[%s1859_s1 + $0x50] sm:$0xff]  }
   0x6   :  { %1284 = vmatprep.subr.bf16.mxu1 %v1410_v5  ;;  %v1418_v13 = vld [vmem:[%s1859_s1 + $0xe0] sm:$0xff]   ;;  %v1422_v17 = vld [vmem:[%s1859_s1 + $0xd8] sm:$0xff]   ;;  %v1426_v21 = vld [vmem:[%s1859_s1 + $0xd0] sm:$0xff]  }
   0x7   :  { %v1419_v14 = vld [vmem:[%s1859_s1 + $0x20] sm:$0xff]   ;;  %v1423_v18 = vld [vmem:[%s1859_s1 + $0x18] sm:$0xff]   ;;  %v1427_v22 = vld [vmem:[%s1859_s1 + $0x10] sm:$0xff]  }
   0x8   :  { %1263 = vmatpush3.bf16.msra.mxu0 %v1411_v6  ;;  %v1420_v15 = vld [vmem:[%s1859_s1 + $0xa0] sm:$0xff]   ;;  %v1424_v19 = vld [vmem:[%s1859_s1 + $0x98] sm:$0xff]   ;;  %v1428_v23 = vld [vmem:[%s1859_s1 + $0x90] sm:$0xff]  }
   0x9   :  { %1285 = vmatpush3.bf16.msra.mxu1 %v1412_v7  ;;  %1264 = vmatprep.subr.bf16.mxu0 %v1413_v8  ;;  %v1429_v24 = vld [vmem:[%s1859_s1 + $0x48] sm:$0xff]   ;;  %v1433_v28 = vld [vmem:[%s1859_s1 + $0x40] sm:$0xff]   ;;  %v1441_v38 = vld [vmem:[%s1859_s1 + $0x178] sm:$0xff]  }
   0xa   :  { %1286 = vmatprep.subr.bf16.mxu1 %v1414_v9  ;;  %v1430_v25 = vld [vmem:[%s1859_s1 + $0xc8] sm:$0xff]   ;;  %v1434_v29 = vld [vmem:[%s1859_s1 + $0xc0] sm:$0xff]   ;;  %v1442_v39 = vld [vmem:[%s1859_s1 + $0x1f8] sm:$0xff]  }
   0xb   :  { %v1431_v26 = vld [vmem:[%s1859_s1 + $0x8] sm:$0xff]   ;;  %v1435_v30 = vld [vmem:[%s1859_s1] sm:$0xff]   ;;  %v1443_v40 = vld [vmem:[%s1859_s1 + $0x138] sm:$0xff]  }
   0xc   :  { %1265 = vmatpush3.bf16.msra.mxu0 %v1415_v10  ;;  %v1432_v27 = vld [vmem:[%s1859_s1 + $0x88] sm:$0xff]   ;;  %v1436_v31 = vld [vmem:[%s1859_s1 + $0x80] sm:$0xff]   ;;  %v1444_v41 = vld [vmem:[%s1859_s1 + $0x1b8] sm:$0xff]  }
   0xd   :  { %1287 = vmatpush3.bf16.msra.mxu1 %v1416_v11  ;;  %1266 = vmatprep.subr.bf16.mxu0 %v1417_v12  ;;  %v15_v32 = vld [vmem:[%s1860_s0] sm:$0xff]  ;;  %v16_v33 = vld [vmem:[%s1860_s0 + $0x8] sm:$0xff]  ;;  %v1445_v42 = vld [vmem:[%s1859_s1 + $0x170] sm:$0xff]  }
   0xe   :  { %1288 = vmatprep.subr.bf16.mxu1 %v1418_v13  ;;  %v1148_v34 = vcombine.low %v15_v32, %v15_v32  ;;  %v1149_v35 = vcombine.high %v15_v32, %v15_v32  ;;  %v1150_v36 = vcombine.low %v16_v33, %v16_v33  ;;  %v1151_v37 = vcombine.high %v16_v33, %v16_v33  ;;  %v1446_v43 = vld [vmem:[%s1859_s1 + $0x1f0] sm:$0xff]   ;;  %v1449_v46 = vld [vmem:[%s1859_s1 + $0x168] sm:$0xff]   ;;  %v1453_v50 = vld [vmem:[%s1859_s1 + $0x160] sm:$0xff]  }
   0xf   :  { %v1447_v44 = vld [vmem:[%s1859_s1 + $0x130] sm:$0xff]   ;;  %v1450_v47 = vld [vmem:[%s1859_s1 + $0x1e8] sm:$0xff]   ;;  %v1454_v51 = vld [vmem:[%s1859_s1 + $0x1e0] sm:$0xff]  }
  0x10   :  { %1267 = vmatpush3.bf16.msra.mxu0 %v1419_v14  ;;  %894 = vmatprep.mubr.bf16.mxu0 %v1149_v35  ;;  %v1448_v45 = vld [vmem:[%s1859_s1 + $0x1b0] sm:$0xff]   ;;  %v1451_v48 = vld [vmem:[%s1859_s1 + $0x128] sm:$0xff]   ;;  %v1455_v52 = vld [vmem:[%s1859_s1 + $0x120] sm:$0xff]  }
  0x11   :  { %1289 = vmatpush3.bf16.msra.mxu1 %v1420_v15  ;;  %1268 = vmatprep.subr.bf16.mxu0 %v1421_v16  ;;  %v1452_v49 = vld [vmem:[%s1859_s1 + $0x1a8] sm:$0xff]   ;;  %v1456_v53 = vld [vmem:[%s1859_s1 + $0x1a0] sm:$0xff]   ;;  %v1457_v54 = vld [vmem:[%s1859_s1 + $0x158] sm:$0xff]  }
  0x12   :  { %1290 = vmatprep.subr.bf16.mxu1 %v1422_v17  ;;  %934 = vmatprep.mubr.bf16.mxu1 %v1151_v37  ;;  %v1458_v55 = vld [vmem:[%s1859_s1 + $0x1d8] sm:$0xff]   ;;  %v1461_v58 = vld [vmem:[%s1859_s1 + $0x150] sm:$0xff]   ;;  %v1465_v62 = vld [vmem:[%s1859_s1 + $0x148] sm:$0xff]  }
  0x13   :  { %v1459_v56 = vld [vmem:[%s1859_s1 + $0x118] sm:$0xff]   ;;  %v1462_v59 = vld [vmem:[%s1859_s1 + $0x1d0] sm:$0xff]   ;;  %v1466_v63 = vld [vmem:[%s1859_s1 + $0x1c8] sm:$0xff]  }
  0x14   :  { %1269 = vmatpush3.bf16.msra.mxu0 %v1423_v18  ;;  %v1460_v57 = vld [vmem:[%s1859_s1 + $0x198] sm:$0xff]   ;;  %v1463_v60 = vld [vmem:[%s1859_s1 + $0x110] sm:$0xff]   ;;  %v1467_v0 = vld [vmem:[%s1859_s1 + $0x108] sm:$0xff]  }
  0x15   :  { %1291 = vmatpush3.bf16.msra.mxu1 %v1424_v19  ;;  %1270 = vmatprep.subr.bf16.mxu0 %v1425_v20  ;;  %v1464_v61 = vld [vmem:[%s1859_s1 + $0x190] sm:$0xff]   ;;  %v1468_v1 = vld [vmem:[%s1859_s1 + $0x188] sm:$0xff]   ;;  %v1469_v2 = vld [vmem:[%s1859_s1 + $0x140] sm:$0xff]  }
  0x16   :  { %1292 = vmatprep.subr.bf16.mxu1 %v1426_v21  ;;  %v1470_v3 = vld [vmem:[%s1859_s1 + $0x1c0] sm:$0xff]   ;;  %v17_v6 = vld [vmem:[%s1860_s0 + $0x10] sm:$0xff]  ;;  %v18_v9 = vld [vmem:[%s1860_s0 + $0x18] sm:$0xff] }
  0x17   :  { %v1471_v4 = vld [vmem:[%s1859_s1 + $0x100] sm:$0xff]   ;;  %v1152_v7 = vcombine.low %v17_v6, %v17_v6  ;;  %v1153_v8 = vcombine.high %v17_v6, %v17_v6  ;;  %v1154_v10 = vcombine.low %v18_v9, %v18_v9  ;;  %v1155_v11 = vcombine.high %v18_v9, %v18_v9  ;;  %v1477_v12 = vld [vmem:[%s1859_s1 + $0x278] sm:$0xff]   ;;  %v1481_v16 = vld [vmem:[%s1859_s1 + $0x270] sm:$0xff]  }
  0x18   :  { %1271 = vmatpush3.bf16.msra.mxu0 %v1427_v22  ;;  %v1472_v5 = vld [vmem:[%s1859_s1 + $0x180] sm:$0xff]   ;;  %v1478_v13 = vld [vmem:[%s1859_s1 + $0x2f8] sm:$0xff]   ;;  %v1482_v17 = vld [vmem:[%s1859_s1 + $0x2f0] sm:$0xff]  }
  0x19   :  { %1293 = vmatpush3.bf16.msra.mxu1 %v1428_v23  ;;  %1272 = vmatprep.subr.bf16.mxu0 %v1429_v24  ;;  %v1479_v14 = vld [vmem:[%s1859_s1 + $0x238] sm:$0xff]   ;;  %v1483_v18 = vld [vmem:[%s1859_s1 + $0x230] sm:$0xff]   ;;  %v1485_v20 = vld [vmem:[%s1859_s1 + $0x268] sm:$0xff]  }
  0x1a   :  { %1294 = vmatprep.subr.bf16.mxu1 %v1430_v25  ;;  %v1480_v15 = vld [vmem:[%s1859_s1 + $0x2b8] sm:$0xff]   ;;  %v1484_v19 = vld [vmem:[%s1859_s1 + $0x2b0] sm:$0xff]   ;;  %v1486_v21 = vld [vmem:[%s1859_s1 + $0x2e8] sm:$0xff]  }
  0x1b   :  { %v1487_v22 = vld [vmem:[%s1859_s1 + $0x228] sm:$0xff]   ;;  %v1489_v24 = vld [vmem:[%s1859_s1 + $0x260] sm:$0xff]   ;;  %v1497_v32 = vld [vmem:[%s1859_s1 + $0x250] sm:$0xff]  }
  0x1c   :  { %1273 = vmatpush3.bf16.msra.mxu0 %v1431_v26  ;;  %v1488_v23 = vld [vmem:[%s1859_s1 + $0x2a8] sm:$0xff]   ;;  %v1490_v25 = vld [vmem:[%s1859_s1 + $0x2e0] sm:$0xff]   ;;  %v1498_v33 = vld [vmem:[%s1859_s1 + $0x2d0] sm:$0xff]  }
  0x1d   :  { %1295 = vmatpush3.bf16.msra.mxu1 %v1432_v27  ;;  %1274 = vmatprep.subr.bf16.mxu0 %v1433_v28  ;;  %v1491_v26 = vld [vmem:[%s1859_s1 + $0x220] sm:$0xff]   ;;  %v1493_v28 = vld [vmem:[%s1859_s1 + $0x258] sm:$0xff]   ;;  %v1500_v35 = vld [vmem:[%s1859_s1 + $0x290] sm:$0xff]  }
  0x1e   :  { %1296 = vmatprep.subr.bf16.mxu1 %v1434_v29  ;;  %v1492_v27 = vld [vmem:[%s1859_s1 + $0x2a0] sm:$0xff]   ;;  %v1494_v29 = vld [vmem:[%s1859_s1 + $0x2d8] sm:$0xff]   ;;  %v1502_v37 = vld [vmem:[%s1859_s1 + $0x2c8] sm:$0xff]  }
  0x20   :  { %1275 = vmatpush3.bf16.msra.mxu0 %v1435_v30  ;;  %v1495_v30 = vld [vmem:[%s1859_s1 + $0x218] sm:$0xff]  }
  0x21   :  { %1297 = vmatpush3.bf16.msra.mxu1 %v1436_v31  ;;  %1304 = vmatprep.subr.bf16.mxu0 %v1441_v38  ;;  %v1496_v31 = vld [vmem:[%s1859_s1 + $0x298] sm:$0xff]   ;;  %v1503_v38 = vld [vmem:[%s1859_s1 + $0x208] sm:$0xff]  }
  0x22   :  { %1326 = vmatprep.subr.bf16.mxu1 %v1442_v39  ;;  %v1504_v39 = vld [vmem:[%s1859_s1 + $0x288] sm:$0xff]  }
  0x23   :  { %895 = vmatmul.mubr.bf16.vlgmr.msra.gmra.mxu0 %v1148_v34  ;;  %v1499_v34 = vld [vmem:[%s1859_s1 + $0x210] sm:$0xff]  }
  0x24   :  { %935 = vmatmul.mubr.bf16.vlgmr.msra.gmra.mxu1 %v1150_v36  ;;  %1305 = vmatpush3.bf16.msra.mxu0 %v1443_v40  ;;  %v1501_v36 = vld [vmem:[%s1859_s1 + $0x248] sm:$0xff]   ;;  %v1505_v40 = vld [vmem:[%s1859_s1 + $0x240] sm:$0xff]  }
  0x25   :  { %1327 = vmatpush3.bf16.msra.mxu1 %v1444_v41  ;;  %1306 = vmatprep.subr.bf16.mxu0 %v1445_v42  ;;  %v1506_v41 = vld [vmem:[%s1859_s1 + $0x2c0] sm:$0xff]  }
  0x26   :  { %1328 = vmatprep.subr.bf16.mxu1 %v1446_v43  ;;  %974 = vmatprep.mubr.bf16.mxu0 %v1153_v8  ;;  %v1507_v42 = vld [vmem:[%s1859_s1 + $0x200] sm:$0xff]  }
  0x27   :  { %1014 = vmatprep.mubr.bf16.mxu1 %v1155_v11  ;;  %v1508_v43 = vld [vmem:[%s1859_s1 + $0x280] sm:$0xff]  }
  0x28   :  { %1307 = vmatpush3.bf16.msra.mxu0 %v1447_v44  ;;  %v19_v44 = vld [vmem:[%s1860_s0 + $0x20] sm:$0xff] }
  0x29   :  { %1329 = vmatpush3.bf16.msra.mxu1 %v1448_v45  ;;  %1308 = vmatprep.subr.bf16.mxu0 %v1449_v46  ;;  %v20_v45 = vld [vmem:[%s1860_s0 + $0x28] sm:$0xff]  ;;  %v1156_v46 = vcombine.low %v19_v44, %v19_v44 }
  0x2a   :  { %1330 = vmatprep.subr.bf16.mxu1 %v1450_v47  ;;  %v1157_v47 = vcombine.high %v19_v44, %v19_v44 }
  0x2c   :  { %1309 = vmatpush3.bf16.msra.mxu0 %v1451_v48  ;;  %v1158_v48 = vcombine.low %v20_v45, %v20_v45 }
  0x2d   :  { %1331 = vmatpush3.bf16.msra.mxu1 %v1452_v49  ;;  %1310 = vmatprep.subr.bf16.mxu0 %v1453_v50  ;;  %v1159_v49 = vcombine.high %v20_v45, %v20_v45  ;;  %v1513_v50 = vld [vmem:[%s1859_s1 + $0x308] sm:$0xff]  }
  0x2e   :  { %1332 = vmatprep.subr.bf16.mxu1 %v1454_v51  ;;  %v1516_v51 = vmov 0.0  }
  0x30   :  { %1311 = vmatpush3.bf16.msra.mxu0 %v1455_v52  ;;  %v1514_v52 = vld [vmem:[%s1859_s1 + $0x300] sm:$0xff]  }
  0x31   :  { %1333 = vmatpush3.bf16.msra.mxu1 %v1456_v53  ;;  %1312 = vmatprep.subr.bf16.mxu0 %v1457_v54  ;;  %v1515_v53 = vld [vmem:[%s1860_s0 + $0x30] ss:$0 sps:$4 sm:$0xff]  }
  0x32   :  { %1334 = vmatprep.subr.bf16.mxu1 %v1458_v55 }
  0x34   :  { %1313 = vmatpush3.bf16.msra.mxu0 %v1459_v56 }
  0x35   :  { %1335 = vmatpush3.bf16.msra.mxu1 %v1460_v57  ;;  %1314 = vmatprep.subr.bf16.mxu0 %v1461_v58 }
  0x36   :  { %1336 = vmatprep.subr.bf16.mxu1 %v1462_v59 }
  0x38   :  { %1315 = vmatpush3.bf16.msra.mxu0 %v1463_v60 }
  0x39   :  { %1337 = vmatpush3.bf16.msra.mxu1 %v1464_v61  ;;  %1316 = vmatprep.subr.bf16.mxu0 %v1465_v62 }
  0x3a   :  { %1338 = vmatprep.subr.bf16.mxu1 %v1466_v63 }
  0x3c   :  { %1317 = vmatpush3.bf16.msra.mxu0 %v1467_v0 }
  0x3d   :  { %1339 = vmatpush3.bf16.msra.mxu1 %v1468_v1  ;;  %1318 = vmatprep.subr.bf16.mxu0 %v1469_v2 }
  0x3e   :  { %1340 = vmatprep.subr.bf16.mxu1 %v1470_v3 }
  0x40   :  { %1319 = vmatpush3.bf16.msra.mxu0 %v1471_v4 }
  0x41   :  { %1341 = vmatpush3.bf16.msra.mxu1 %v1472_v5  ;;  %1348 = vmatprep.subr.bf16.mxu0 %v1477_v12 }
  0x42   :  { %1370 = vmatprep.subr.bf16.mxu1 %v1478_v13 }
  0x43   :  { %975 = vmatmul.mubr.bf16.vlgmr.msra.gmra.mxu0 %v1152_v7  ;;  %v1147_v7 = vld [vmem:[%s1861_s2] ss:$0 sm:$0xff] }
  0x44   :  { %1015 = vmatmul.mubr.bf16.vlgmr.msra.gmra.mxu1 %v1154_v10  ;;  %1349 = vmatpush3.bf16.msra.mxu0 %v1479_v14 }
  0x45   :  { %1371 = vmatpush3.bf16.msra.mxu1 %v1480_v15  ;;  %1350 = vmatprep.subr.bf16.mxu0 %v1481_v16 }
  0x46   :  { %1372 = vmatprep.subr.bf16.mxu1 %v1482_v17  ;;  %1054 = vmatprep.mubr.bf16.mxu0 %v1157_v47 }
  0x47   :  { %1094 = vmatprep.mubr.bf16.mxu1 %v1159_v49 }
  0x48   :  { %1351 = vmatpush3.bf16.msra.mxu0 %v1483_v18 }
  0x49   :  { %1373 = vmatpush3.bf16.msra.mxu1 %v1484_v19  ;;  %1352 = vmatprep.subr.bf16.mxu0 %v1485_v20 }
  0x4a   :  { %1374 = vmatprep.subr.bf16.mxu1 %v1486_v21 }
  0x4c   :  { %1353 = vmatpush3.bf16.msra.mxu0 %v1487_v22 }
  0x4d   :  { %1375 = vmatpush3.bf16.msra.mxu1 %v1488_v23  ;;  %1354 = vmatprep.subr.bf16.mxu0 %v1489_v24 }
  0x4e   :  { %1376 = vmatprep.subr.bf16.mxu1 %v1490_v25 }
  0x50   :  { %1355 = vmatpush3.bf16.msra.mxu0 %v1491_v26 }
  0x51   :  { %1377 = vmatpush3.bf16.msra.mxu1 %v1492_v27  ;;  %1356 = vmatprep.subr.bf16.mxu0 %v1493_v28 }
  0x52   :  { %1378 = vmatprep.subr.bf16.mxu1 %v1494_v29 }
  0x54   :  { %1357 = vmatpush3.bf16.msra.mxu0 %v1495_v30 }
  0x55   :  { %1379 = vmatpush3.bf16.msra.mxu1 %v1496_v31  ;;  %1358 = vmatprep.subr.bf16.mxu0 %v1497_v32 }
  0x56   :  { %1380 = vmatprep.subr.bf16.mxu1 %v1498_v33 }
  0x58   :  { %1359 = vmatpush3.bf16.msra.mxu0 %v1499_v34 }
  0x59   :  { %1381 = vmatpush3.bf16.msra.mxu1 %v1500_v35  ;;  %1360 = vmatprep.subr.bf16.mxu0 %v1501_v36 }
  0x5a   :  { %1382 = vmatprep.subr.bf16.mxu1 %v1502_v37 }
  0x5c   :  { %1361 = vmatpush3.bf16.msra.mxu0 %v1503_v38 }
  0x5d   :  { %1383 = vmatpush3.bf16.msra.mxu1 %v1504_v39  ;;  %1362 = vmatprep.subr.bf16.mxu0 %v1505_v40 }
  0x5e   :  { %1384 = vmatprep.subr.bf16.mxu1 %v1506_v41 }
  0x60   :  { %1363 = vmatpush3.bf16.msra.mxu0 %v1507_v42 }
  0x61   :  { %1385 = vmatpush3.bf16.msra.mxu1 %v1508_v43  ;;  %1395 = vmatprep.subr.bf16.mxu0 %v1516_v51 }
  0x63   :  { %1055 = vmatmul.mubr.bf16.vlgmr.msra.gmra.mxu0 %v1156_v46 }
  0x64   :  { %1095 = vmatmul.mubr.bf16.vlgmr.msra.gmra.mxu1 %v1158_v48  ;;  %1396 = vmatpush3.bf16.msra.mxu0 %v1513_v50 }
  0x65   :  { %1397 = vmatprep.subr.bf16.mxu0 %v1516_v51  ;;  %1399 = vmatprep.mubr.msk.bf16.mxu0 %vm1517_vm0, %v1516_v51 }
  0x68   :  { %1398 = vmatpush3.bf16.msra.mxu0 %v1514_v52 }
  0x6b   :  { %1400 = vmatmul.mubr.msk.bf16.vlgmr.msra.gmra.mxu0 %vm858_vm1, %v1515_v53 }
  0xe3   :  { %v1276_v54 = vpop.f32.mrf.mxu0 }
  0xe4   :  { %v1298_v55 = vpop.f32.mrf.mxu1 }
  0xe5   :  { %v1277_v56 = vpop.f32.mrf.mxu0 }
  0xe6   :  { %v1299_v57 = vpop.f32.mrf.mxu1  ;;  %v1278_v6 = vadd.f32 %v1277_v56, %v1276_v54 }
  0xe7   :  { %v1279_v58 = vpop.f32.mrf.mxu0  ;;  %v1300_v9 = vadd.f32 %v1299_v57, %v1298_v55 }
  0xe8   :  { %v1301_v59 = vpop.f32.mrf.mxu1  ;;  %v897_v8 = vadd.f32 %v1278_v6, %v1147_v7 }
  0xe9   :  { %v1280_v60 = vpop.f32.mrf.mxu0 }
  0xea   :  { %v1302_v61 = vpop.f32.mrf.mxu1  ;;  %v937_v11 = vadd.f32 %v1300_v9, %v897_v8 }
 0x103   :  { %v1320_v62 = vpop.f32.mrf.mxu0 }
 0x104   :  { %v1342_v63 = vpop.f32.mrf.mxu1 }
 0x105   :  { %v1321_v0 = vpop.f32.mrf.mxu0 }
 0x106   :  { %v1343_v1 = vpop.f32.mrf.mxu1  ;;  %v1322_v10 = vadd.f32 %v1321_v0, %v1320_v62 }
 0x107   :  { %v1323_v2 = vpop.f32.mrf.mxu0  ;;  %v1344_v13 = vadd.f32 %v1343_v1, %v1342_v63 }
 0x108   :  { %v1345_v3 = vpop.f32.mrf.mxu1  ;;  %v977_v12 = vadd.f32 %v1322_v10, %v937_v11 }
 0x109   :  { %v1324_v4 = vpop.f32.mrf.mxu0 }
 0x10a   :  { %v1346_v5 = vpop.f32.mrf.mxu1  ;;  %v1017_v17 = vadd.f32 %v1344_v13, %v977_v12 }
 0x123   :  { %v1364_v14 = vpop.f32.mrf.mxu0 }
 0x124   :  { %v1386_v15 = vpop.f32.mrf.mxu1 }
 0x125   :  { %v1365_v16 = vpop.f32.mrf.mxu0 }
 0x126   :  { %v1366_v18 = vadd.f32 %v1365_v16, %v1364_v14  ;;  %v1387_v19 = vpop.f32.mrf.mxu1 }
 0x127   :  { %v1388_v20 = vadd.f32 %v1387_v19, %v1386_v15  ;;  %v1367_v21 = vpop.f32.mrf.mxu0 }
 0x128   :  { %v1057_v22 = vadd.f32 %v1366_v18, %v1017_v17  ;;  %v1389_v23 = vpop.f32.mrf.mxu1 }
 0x129   :  { %v1368_v24 = vpop.f32.mrf.mxu0 }
 0x12a   :  { %v1390_v25 = vpop.f32.mrf.mxu1  ;;  %v1097_v26 = vadd.f32 %v1388_v20, %v1057_v22 }
 0x12b   :  { %v1136_v27 = vpop.f32.mrf.mxu0 }
 0x12c   :  { %v1137_v28 = vadd.f32 %v1136_v27, %v1097_v26 }
 0x12d   :  { %v1401_v29 = vpop.f32.mrf.mxu0 }
 0x12e   :  { %1142 = vst [vmem:[%s1862_s3] sm:$0xff] %v1137_v28 }
 0x12f   :  { %v1139_v30 = vpop.f32.mrf.mxu0 }
 0x131   :  { %v1402_v31 = vpop.f32.mrf.mxu0 }

</bundles_post_ra>
